<compile_context>
chip_gen: v6e
topology: v6e:2x2x1
jax: 0.10.0
libtpu: 0.0.40
codegen_flags: <defaults>
</compile_context>

<pallas_src>
import numpy as np
import jax
import jax.numpy as jnp
from jax.experimental import pallas as pl
from jax.experimental.pallas import tpu as pltpu


# ----------------------------------------------------------------------------
# Host-side helpers: pooling / interpolation matrices.
# ----------------------------------------------------------------------------
def adaptive_pool_matrix(in_size: int, out_size: int) -> np.ndarray:
    """P[o, i] such that (P @ x) == adaptive_avg_pool1d(x, out_size)."""
    P = np.zeros((out_size, in_size), np.float32)
    for o in range(out_size):
        start = (o * in_size) // out_size
        end = -((-(o + 1) * in_size) // out_size)  # ceil((o+1)*in/out)
        P[o, start:end] = 1.0 / float(end - start)
    return P


def bilinear_matrix(out_size: int, in_size: int) -> np.ndarray:
    """A[i, p] such that (A @ x) == F.interpolate(x, out_size, 'linear', align_corners=True)."""
    A = np.zeros((out_size, in_size), np.float32)
    if out_size == 1:
        A[0, 0] = 1.0
        return A
    scale = (in_size - 1) / (out_size - 1)
    for i in range(out_size):
        src = i * scale
        p0 = min(int(np.floor(src)), in_size - 1)
        p1 = min(p0 + 1, in_size - 1)
        frac = src - p0
        A[i, p0] += 1.0 - frac
        A[i, p1] += frac
    return A


def _round_up(x: int, m: int) -> int:
    return ((x + m - 1) // m) * m


# ----------------------------------------------------------------------------
# Pallas kernel (channel-major throughout):
#   pool -> fused [q|k], v -> MHA over batch axis -> fused out_proj|up_cnn
#   -> bilinear upsample, stores directly in (B, C, H*W) layout.
# ----------------------------------------------------------------------------
def linear_sra_kernel(xc_ref, xt_ref, pct_ref, ptt_ref, wqk_ref, wv_ref,
                      hsum_ref, woc_ref, kct_ref, ktt_ref, bias_ref,
                      cnn_out_ref, trans_out_ref):
    f32, bf16 = jnp.float32, jnp.bfloat16
    B, c_cnn, _ = cnn_out_ref.shape
    _, c_tr, _ = trans_out_ref.shape
    c_pad = hsum_ref.shape[0]
    oc_rows = woc_ref.shape[0]            # c_tr + c_cnn

    # ---- Stage 1: adaptive average pooling, whole batch at once -------------
    # Batch is stacked along the sublane (row) dim, so one matmul per stream.
    pooled_c = jnp.dot(xc_ref[...].astype(bf16), pct_ref[...],
                       preferred_element_type=f32).astype(bf16)   # (B*c_cnn, s_pad)
    pooled_t = jnp.dot(xt_ref[...].astype(bf16), ptt_ref[...],
                       preferred_element_type=f32).astype(bf16)   # (B*c_tr, s_pad)

    # Packed per-channel biases (columns broadcast over the token lanes).
    biases = bias_ref[...]
    bqk_col = biases[:2 * c_pad, 0:1]     # (2*c_pad, 1) f32
    bv_col = biases[:c_pad, 1:2]          # (c_pad, 1)
    boc_col = biases[:oc_rows, 2:3]       # (c_tr + c_cnn, 1)

    wqk = wqk_ref[...]
    wv = wv_ref[...]
    hsum = hsum_ref[...]
    woc = woc_ref[...]
    kct = kct_ref[...]
    ktt = ktt_ref[...]

    # ---- Stage 2: fused [q|k] and v projections (per batch, channel-major) --
    q, k, v = [], [], []
    for b in range(B):
        pc_b = pooled_c[b * c_cnn:(b + 1) * c_cnn]    # (c_cnn, s_pad) bf16
        pt_b = pooled_t[b * c_tr:(b + 1) * c_tr]      # (c_tr,  s_pad) bf16
        qk = jnp.dot(wqk, pc_b, preferred_element_type=f32) + bqk_col
        q.append(qk[:c_pad])                          # (c_pad, s_pad) f32
        k.append(qk[c_pad:])
        v.append(jnp.dot(wv, pt_b, preferred_element_type=f32) + bv_col)

    # ---- Stages 3-5: attention over the batch axis, projections, upsample ---
    # nn.MultiheadAttention is seq-first, so (B, S, E) inputs mean L=B, N=S:
    # the softmax runs over j in [0, B), independently per token and per head.
    # hsum is a (c_pad, c_pad) 0/1 head mask: hsum @ (q*k) replicates each
    # head's 16-row sum over that head's rows, keeping the layout dense.
    for i in range(B):
        logits = []
        for j in range(B):
            prod = (q[i] * k[j]).astype(bf16)
            logits.append(jnp.dot(hsum, prod, preferred_element_type=f32))
        m = logits[0]
        for j in range(1, B):
            m = jnp.maximum(m, logits[j])
        exps = [jnp.exp(l - m) for l in logits]       # f32 softmax path
        denom = exps[0]
        for j in range(1, B):
            denom = denom + exps[j]
        inv = pl.reciprocal(denom, approx=True)       # EUP, not VALU
        out = exps[0] * v[0]
        for j in range(1, B):
            out = out + exps[j] * v[j]
        out = (out * inv).astype(bf16)                # (c_pad, s_pad)

        # Fused MHA out_proj + folded up_cnn: one matmul -> [attn ; cnn].
        oc = jnp.dot(woc, out, preferred_element_type=f32) + boc_col
        attn_cm = oc[:c_tr].astype(bf16)              # (c_tr,  s_pad)
        cnn_cm = oc[c_tr:].astype(bf16)               # (c_cnn, s_pad)

        # Bilinear upsample (align_corners=True) as matmuls; channel-major
        # stores match the (B, C, H*W) output layout -> no wrapper transpose.
        trans_out_ref[i] = jnp.dot(attn_cm, ktt, preferred_element_type=f32)
        cnn_out_ref[i] = jnp.dot(cnn_cm, kct, preferred_element_type=f32)


# ----------------------------------------------------------------------------
# Wrapper: weight folding + layout plumbing (all host-side work is on weights;
# activations only get free metadata reshapes).
# ----------------------------------------------------------------------------
def linear_sra_forward(x_cnn, x_trans, params, heads, pooling_size=7):
    B, c_cnn, Hc, Wc = x_cnn.shape
    _, c_tr, Ht, Wt = x_trans.shape
    head_dim = c_tr // heads
    S = pooling_size * pooling_size
    HWc, HWt = Hc * Wc, Ht * Wt

    s_pad = _round_up(S, 8)                           # 49 -> 56 (sublane mult.)
    c_pad = _round_up(c_tr, 128)                      # transformer channels,
    while c_pad % heads:                              # padded per head
        c_pad += 128
    hd_pad = c_pad // heads                           # 10 -> 16

    # Per-head channel scatter E: original channel c -> head(c)*hd_pad + offset.
    emb = np.zeros((c_tr, c_pad), np.float32)
    for c in range(c_tr):
        emb[c, (c // head_dim) * hd_pad + (c % head_dim)] = 1.0
    E = jnp.asarray(emb)

    # Per-head summation mask (replicates a head reduction over its rows).
    hs = np.zeros((c_pad, c_pad), np.float32)
    for a in range(c_pad):
        h = a // hd_pad
        hs[a, h * hd_pad:(h + 1) * hd_pad] = 1.0
    hsum = jnp.asarray(hs, jnp.bfloat16)

    # Pooling / interpolation matrices (kron of 1-D maps), token-padded and
    # transposed for channel-major use, bf16.
    Pc = np.kron(adaptive_pool_matrix(Hc, pooling_size),
                 adaptive_pool_matrix(Wc, pooling_size))        # (S, HWc)
    Pt = np.kron(adaptive_pool_matrix(Ht, pooling_size),
                 adaptive_pool_matrix(Wt, pooling_size))        # (S, HWt)
    Kc = np.kron(bilinear_matrix(Hc, pooling_size),
                 bilinear_matrix(Wc, pooling_size))             # (HWc, S)
    Kt = np.kron(bilinear_matrix(Ht, pooling_size),
                 bilinear_matrix(Wt, pooling_size))             # (HWt, S)
    PcT = jnp.asarray(np.pad(Pc, ((0, s_pad - S), (0, 0))).T, jnp.bfloat16)  # (HWc, s_pad)
    PtT = jnp.asarray(np.pad(Pt, ((0, s_pad - S), (0, 0))).T, jnp.bfloat16)  # (HWt, s_pad)
    KcT = jnp.asarray(np.pad(Kc, ((0, 0), (0, s_pad - S))).T, jnp.bfloat16)  # (s_pad, HWc)
    KtT = jnp.asarray(np.pad(Kt, ((0, 0), (0, s_pad - S))).T, jnp.bfloat16)  # (s_pad, HWt)

    # Fold Linear + MHA in_proj per stream (attention scale into q), fold the
    # MHA out_proj through up_cnn, and fold the per-head scatter E into every
    # weight -- all in f32, one bf16 cast per fused weight.
    scale = head_dim ** -0.5
    Wq_f = (params["Wq"] @ params["Wiq"]) * scale
    bq_f = (params["bq"] @ params["Wiq"] + params["biq"]) * scale
    Wk_f = params["Wk"] @ params["Wik"]
    bk_f = params["bk"] @ params["Wik"] + params["bik"]
    Wv_f = params["Wv"] @ params["Wiv"]
    bv_f = params["bv"] @ params["Wiv"] + params["biv"]

    Wqk = jnp.concatenate([(Wq_f @ E).T, (Wk_f @ E).T],
                          axis=0).astype(jnp.bfloat16)          # (2*c_pad, c_cnn)
    Wv_cm = (Wv_f @ E).T.astype(jnp.bfloat16)                   # (c_pad, c_tr)

    Wo_cm = (E.T @ params["Wo"]).T                               # (c_tr, c_pad)
    Wou_cm = (E.T @ (params["Wo"] @ params["Wu"])).T             # (c_cnn, c_pad)
    Woc = jnp.concatenate([Wo_cm, Wou_cm], axis=0).astype(jnp.bfloat16)  # (c_tr+c_cnn, c_pad)

    bqk = jnp.concatenate([(bq_f @ E).reshape(-1), (bk_f @ E).reshape(-1)])  # (2*c_pad,)
    bv_c = (bv_f @ E).reshape(-1)                                            # (c_pad,)
    boc = jnp.concatenate([params["bo"].reshape(-1),
                           (params["bo"] @ params["Wu"] + params["bu"]).reshape(-1)])

    oc_rows = c_tr + c_cnn
    pack_rows = _round_up(max(2 * c_pad, oc_rows), 8)
    bias_pack = jnp.zeros((pack_rows, 4), jnp.float32)           # one DMA for all biases
    bias_pack = bias_pack.at[:2 * c_pad, 0].set(bqk)
    bias_pack = bias_pack.at[:c_pad, 1].set(bv_c)
    bias_pack = bias_pack.at[:oc_rows, 2].set(boc)

    # NCHW -> (B*C, H*W): free metadata reshapes; bf16 cast happens in-kernel.
    xc_flat = x_cnn.reshape(B * c_cnn, HWc)
    xt_flat = x_trans.reshape(B * c_tr, HWt)

    inputs = (xc_flat, xt_flat, PcT, PtT, Wqk, Wv_cm, hsum, Woc, KcT, KtT,
              bias_pack)

    out_shape = (jax.ShapeDtypeStruct((B, c_cnn, HWc), jnp.float32),
                 jax.ShapeDtypeStruct((B, c_tr, HWt), jnp.float32))

    cnn_out, trans_out = pl.pallas_call(
        linear_sra_kernel,
        out_shape=out_shape,
        in_specs=[pl.BlockSpec(memory_space=pltpu.MemorySpace.VMEM)] * len(inputs),
        out_specs=(pl.BlockSpec(memory_space=pltpu.MemorySpace.VMEM),
                   pl.BlockSpec(memory_space=pltpu.MemorySpace.VMEM)),
    )(*inputs)

    # (B, C, H*W) -> (B, C, H, W): free reshapes, no transpose / slice pass.
    return (cnn_out.reshape(B, c_cnn, Hc, Wc),
            trans_out.reshape(B, c_tr, Ht, Wt))


# ----------------------------------------------------------------------------
# Pure-JAX reference (mirrors PyTorch semantics) for a correctness check.
# ----------------------------------------------------------------------------
def reference_forward(x_cnn, x_trans, params, heads, pooling_size=7):
    B, c_cnn, Hc, Wc = x_cnn.shape
    _, c_tr, Ht, Wt = x_trans.shape
    head_dim = c_tr // heads
    S = pooling_size * pooling_size

    Pc = jnp.asarray(np.kron(adaptive_pool_matrix(Hc, pooling_size),
                             adaptive_pool_matrix(Wc, pooling_size)))
    Pt = jnp.asarray(np.kron(adaptive_pool_matrix(Ht, pooling_size),
                             adaptive_pool_matrix(Wt, pooling_size)))
    Kc = jnp.asarray(np.kron(bilinear_matrix(Hc, pooling_size),
                             bilinear_matrix(Wc, pooling_size)))
    Kt = jnp.asarray(np.kron(bilinear_matrix(Ht, pooling_size),
                             bilinear_matrix(Wt, pooling_size)))

    xc = jnp.einsum('sp,bpc->bsc', Pc, x_cnn.reshape(B, c_cnn, -1).transpose(0, 2, 1))
    xt = jnp.einsum('sp,bpc->bsc', Pt, x_trans.reshape(B, c_tr, -1).transpose(0, 2, 1))

    q = xc @ params["Wq"] + params["bq"]
    k = xc @ params["Wk"] + params["bk"]
    v = xt @ params["Wv"] + params["bv"]
    q = q @ params["Wiq"] + params["biq"]
    k = k @ params["Wik"] + params["bik"]
    v = v @ params["Wiv"] + params["biv"]
    q = q * (head_dim ** -0.5)

    qh = q.reshape(B, S, heads, head_dim)
    kh = k.reshape(B, S, heads, head_dim)
    vh = v.reshape(B, S, heads, head_dim)
    logits = jnp.einsum('ishd,jshd->ijsh', qh, kh)
    a = jax.nn.softmax(logits, axis=1)
    oh = jnp.einsum('ijsh,jshd->ishd', a, vh)
    o = oh.reshape(B, S, c_tr)

    attn = o @ params["Wo"] + params["bo"]
    cnn = attn @ params["Wu"] + params["bu"]

    cnn_out = jnp.einsum('ps,bsc->bpc', Kc, cnn).transpose(0, 2, 1).reshape(B, c_cnn, Hc, Wc)
    trans_out = jnp.einsum('ps,bsc->bpc', Kt, attn).transpose(0, 2, 1).reshape(B, c_tr, Ht, Wt)
    return cnn_out, trans_out


# ----------------------------------------------------------------------------
# Deterministic parameter init (shapes from LinearSRA.__init__; weights stored
# (in, out) so x @ W + b applies the layer directly).
# ----------------------------------------------------------------------------
def init_params(key, c_cnn, c_tr):
    ks = jax.random.split(key, 16)
    w = lambda k, shape: 0.05 * jax.random.normal(k, shape, jnp.float32)
    return dict(
        Wq=w(ks[0], (c_cnn, c_tr)), bq=w(ks[1], (1, c_tr)),
        Wk=w(ks[2], (c_cnn, c_tr)), bk=w(ks[3], (1, c_tr)),
        Wv=w(ks[4], (c_tr, c_tr)),  bv=w(ks[5], (1, c_tr)),
        Wiq=w(ks[6], (c_tr, c_tr)), biq=w(ks[7], (1, c_tr)),
        Wik=w(ks[8], (c_tr, c_tr)), bik=w(ks[9], (1, c_tr)),
        Wiv=w(ks[10], (c_tr, c_tr)), biv=w(ks[11], (1, c_tr)),
        Wo=w(ks[12], (c_tr, c_tr)), bo=w(ks[13], (1, c_tr)),
        Wu=w(ks[14], (c_tr, c_cnn)), bu=w(ks[15], (1, c_cnn)),
    )


if __name__ == "__main__":
    B = 2
    cnn_channels, trans_channels, heads, pooling_size = 128, 80, 8, 7
    Hc, Wc = 16, 16
    Ht, Wt = 12, 12

    key = jax.random.PRNGKey(0)
    kx, ky, kp = jax.random.split(key, 3)
    x_cnn = jax.random.normal(kx, (B, cnn_channels, Hc, Wc), jnp.float32)
    x_trans = jax.random.normal(ky, (B, trans_channels, Ht, Wt), jnp.float32)
    params = init_params(kp, cnn_channels, trans_channels)

    cnn_res, trans_res = linear_sra_forward(x_cnn, x_trans, params,
                                            heads=heads, pooling_size=pooling_size)
    jax.block_until_ready((cnn_res, trans_res))

    assert cnn_res.shape == (B, cnn_channels, Hc, Wc)
    assert trans_res.shape == (B, trans_channels, Ht, Wt)

    # Tolerance sized for bf16 MXU operands with f32 accumulation.
    ref_cnn, ref_trans = reference_forward(x_cnn, x_trans, params,
                                           heads=heads, pooling_size=pooling_size)
    np.testing.assert_allclose(np.asarray(cnn_res), np.asarray(ref_cnn),
                               rtol=2e-2, atol=5e-3)
    np.testing.assert_allclose(np.asarray(trans_res), np.asarray(ref_trans),
                               rtol=2e-2, atol=5e-3)

    print("KERNEL_OK")
</pallas_src>

<mosaic_0001>
module attributes {stable_mosaic.version = 11 : i64} {
  func.func @linear_sra_kernel(%arg0: memref<256x256xf32, #tpu.memory_space<vmem>>, %arg1: memref<160x144xf32, #tpu.memory_space<vmem>>, %arg2: memref<256x56xbf16, #tpu.memory_space<vmem>>, %arg3: memref<144x56xbf16, #tpu.memory_space<vmem>>, %arg4: memref<256x128xbf16, #tpu.memory_space<vmem>>, %arg5: memref<128x80xbf16, #tpu.memory_space<vmem>>, %arg6: memref<128x128xbf16, #tpu.memory_space<vmem>>, %arg7: memref<208x128xbf16, #tpu.memory_space<vmem>>, %arg8: memref<56x256xbf16, #tpu.memory_space<vmem>>, %arg9: memref<56x144xbf16, #tpu.memory_space<vmem>>, %arg10: memref<256x4xf32, #tpu.memory_space<vmem>>, %arg11: memref<2x128x256xf32, #tpu.memory_space<vmem>>, %arg12: memref<2x80x144xf32, #tpu.memory_space<vmem>>) attributes {dimension_semantics = [], scalar_prefetch = 0 : i64, scratch_operands = 0 : i64, tpu.core_type = #tpu.core_type<tc>} {
    %c0 = arith.constant 0 : index
    %c0_0 = arith.constant 0 : index
    %0 = vector.load %arg0[%c0, %c0_0] : memref<256x256xf32, #tpu.memory_space<vmem>>, vector<256x256xf32>
    %1 = arith.truncf %0 : vector<256x256xf32> to vector<256x256xbf16>
    %c0_1 = arith.constant 0 : index
    %c0_2 = arith.constant 0 : index
    %2 = vector.load %arg2[%c0_1, %c0_2] : memref<256x56xbf16, #tpu.memory_space<vmem>>, vector<256x56xbf16>
    %cst = arith.constant dense<0.000000e+00> : vector<256x56xf32>
    %3 = tpu.matmul %1, %2, %cst {dimension_numbers = #tpu.dot_dimension_numbers<[1], [0], [0], [1], [0, 0, 1, 1], [], []>} : vector<256x256xbf16>, vector<256x56xbf16>, vector<256x56xf32> -> vector<256x56xf32>
    %4 = arith.truncf %3 : vector<256x56xf32> to vector<256x56xbf16>
    %c0_3 = arith.constant 0 : index
    %c0_4 = arith.constant 0 : index
    %5 = vector.load %arg1[%c0_3, %c0_4] : memref<160x144xf32, #tpu.memory_space<vmem>>, vector<160x144xf32>
    %6 = arith.truncf %5 : vector<160x144xf32> to vector<160x144xbf16>
    %c0_5 = arith.constant 0 : index
    %c0_6 = arith.constant 0 : index
    %7 = vector.load %arg3[%c0_5, %c0_6] : memref<144x56xbf16, #tpu.memory_space<vmem>>, vector<144x56xbf16>
    %cst_7 = arith.constant dense<0.000000e+00> : vector<160x56xf32>
    %8 = tpu.matmul %6, %7, %cst_7 {dimension_numbers = #tpu.dot_dimension_numbers<[1], [0], [0], [1], [0, 0, 1, 1], [], []>} : vector<160x144xbf16>, vector<144x56xbf16>, vector<160x56xf32> -> vector<160x56xf32>
    %9 = arith.truncf %8 : vector<160x56xf32> to vector<160x56xbf16>
    %c0_8 = arith.constant 0 : index
    %c0_9 = arith.constant 0 : index
    %10 = vector.load %arg10[%c0_8, %c0_9] : memref<256x4xf32, #tpu.memory_space<vmem>>, vector<256x4xf32>
    %11 = vector.extract_strided_slice %10 {offsets = [0, 0], sizes = [256, 1], strides = [1, 1]} : vector<256x4xf32> to vector<256x1xf32>
    %12 = vector.extract_strided_slice %10 {offsets = [0, 1], sizes = [128, 1], strides = [1, 1]} : vector<256x4xf32> to vector<128x1xf32>
    %13 = vector.extract_strided_slice %10 {offsets = [0, 2], sizes = [208, 1], strides = [1, 1]} : vector<256x4xf32> to vector<208x1xf32>
    %c0_10 = arith.constant 0 : index
    %c0_11 = arith.constant 0 : index
    %14 = vector.load %arg4[%c0_10, %c0_11] : memref<256x128xbf16, #tpu.memory_space<vmem>>, vector<256x128xbf16>
    %c0_12 = arith.constant 0 : index
    %c0_13 = arith.constant 0 : index
    %15 = vector.load %arg5[%c0_12, %c0_13] : memref<128x80xbf16, #tpu.memory_space<vmem>>, vector<128x80xbf16>
    %c0_14 = arith.constant 0 : index
    %c0_15 = arith.constant 0 : index
    %16 = vector.load %arg6[%c0_14, %c0_15] : memref<128x128xbf16, #tpu.memory_space<vmem>>, vector<128x128xbf16>
    %c0_16 = arith.constant 0 : index
    %c0_17 = arith.constant 0 : index
    %17 = vector.load %arg7[%c0_16, %c0_17] : memref<208x128xbf16, #tpu.memory_space<vmem>>, vector<208x128xbf16>
    %c0_18 = arith.constant 0 : index
    %c0_19 = arith.constant 0 : index
    %18 = vector.load %arg8[%c0_18, %c0_19] : memref<56x256xbf16, #tpu.memory_space<vmem>>, vector<56x256xbf16>
    %c0_20 = arith.constant 0 : index
    %c0_21 = arith.constant 0 : index
    %19 = vector.load %arg9[%c0_20, %c0_21] : memref<56x144xbf16, #tpu.memory_space<vmem>>, vector<56x144xbf16>
    %20 = vector.extract_strided_slice %4 {offsets = [0, 0], sizes = [128, 56], strides = [1, 1]} : vector<256x56xbf16> to vector<128x56xbf16>
    %21 = vector.extract_strided_slice %9 {offsets = [0, 0], sizes = [80, 56], strides = [1, 1]} : vector<160x56xbf16> to vector<80x56xbf16>
    %cst_22 = arith.constant dense<0.000000e+00> : vector<256x56xf32>
    %22 = tpu.matmul %14, %20, %cst_22 {dimension_numbers = #tpu.dot_dimension_numbers<[1], [0], [0], [1], [0, 0, 1, 1], [], []>} : vector<256x128xbf16>, vector<128x56xbf16>, vector<256x56xf32> -> vector<256x56xf32>
    %23 = vector.broadcast %11 : vector<256x1xf32> to vector<256x56xf32>
    %24 = arith.addf %22, %23 : vector<256x56xf32>
    %25 = vector.extract_strided_slice %24 {offsets = [0, 0], sizes = [128, 56], strides = [1, 1]} : vector<256x56xf32> to vector<128x56xf32>
    %26 = vector.extract_strided_slice %24 {offsets = [128, 0], sizes = [128, 56], strides = [1, 1]} : vector<256x56xf32> to vector<128x56xf32>
    %cst_23 = arith.constant dense<0.000000e+00> : vector<128x56xf32>
    %27 = tpu.matmul %15, %21, %cst_23 {dimension_numbers = #tpu.dot_dimension_numbers<[1], [0], [0], [1], [0, 0, 1, 1], [], []>} : vector<128x80xbf16>, vector<80x56xbf16>, vector<128x56xf32> -> vector<128x56xf32>
    %28 = vector.broadcast %12 : vector<128x1xf32> to vector<128x56xf32>
    %29 = arith.addf %27, %28 : vector<128x56xf32>
    %30 = vector.extract_strided_slice %4 {offsets = [128, 0], sizes = [128, 56], strides = [1, 1]} : vector<256x56xbf16> to vector<128x56xbf16>
    %31 = vector.extract_strided_slice %9 {offsets = [80, 0], sizes = [80, 56], strides = [1, 1]} : vector<160x56xbf16> to vector<80x56xbf16>
    %cst_24 = arith.constant dense<0.000000e+00> : vector<256x56xf32>
    %32 = tpu.matmul %14, %30, %cst_24 {dimension_numbers = #tpu.dot_dimension_numbers<[1], [0], [0], [1], [0, 0, 1, 1], [], []>} : vector<256x128xbf16>, vector<128x56xbf16>, vector<256x56xf32> -> vector<256x56xf32>
    %33 = vector.broadcast %11 : vector<256x1xf32> to vector<256x56xf32>
    %34 = arith.addf %32, %33 : vector<256x56xf32>
    %35 = vector.extract_strided_slice %34 {offsets = [0, 0], sizes = [128, 56], strides = [1, 1]} : vector<256x56xf32> to vector<128x56xf32>
    %36 = vector.extract_strided_slice %34 {offsets = [128, 0], sizes = [128, 56], strides = [1, 1]} : vector<256x56xf32> to vector<128x56xf32>
    %cst_25 = arith.constant dense<0.000000e+00> : vector<128x56xf32>
    %37 = tpu.matmul %15, %31, %cst_25 {dimension_numbers = #tpu.dot_dimension_numbers<[1], [0], [0], [1], [0, 0, 1, 1], [], []>} : vector<128x80xbf16>, vector<80x56xbf16>, vector<128x56xf32> -> vector<128x56xf32>
    %38 = vector.broadcast %12 : vector<128x1xf32> to vector<128x56xf32>
    %39 = arith.addf %37, %38 : vector<128x56xf32>
    %40 = arith.mulf %25, %26 : vector<128x56xf32>
    %41 = arith.truncf %40 : vector<128x56xf32> to vector<128x56xbf16>
    %cst_26 = arith.constant dense<0.000000e+00> : vector<128x56xf32>
    %42 = tpu.matmul %16, %41, %cst_26 {dimension_numbers = #tpu.dot_dimension_numbers<[1], [0], [0], [1], [0, 0, 1, 1], [], []>} : vector<128x128xbf16>, vector<128x56xbf16>, vector<128x56xf32> -> vector<128x56xf32>
    %43 = arith.mulf %25, %36 : vector<128x56xf32>
    %44 = arith.truncf %43 : vector<128x56xf32> to vector<128x56xbf16>
    %cst_27 = arith.constant dense<0.000000e+00> : vector<128x56xf32>
    %45 = tpu.matmul %16, %44, %cst_27 {dimension_numbers = #tpu.dot_dimension_numbers<[1], [0], [0], [1], [0, 0, 1, 1], [], []>} : vector<128x128xbf16>, vector<128x56xbf16>, vector<128x56xf32> -> vector<128x56xf32>
    %46 = arith.maximumf %42, %45 : vector<128x56xf32>
    %47 = arith.subf %42, %46 : vector<128x56xf32>
    %48 = math.exp %47 : vector<128x56xf32>
    %49 = arith.subf %45, %46 : vector<128x56xf32>
    %50 = math.exp %49 : vector<128x56xf32>
    %51 = arith.addf %48, %50 : vector<128x56xf32>
    %52 = tpu.reciprocal %51 {approx = true} : vector<128x56xf32> -> vector<128x56xf32>
    %53 = arith.mulf %48, %29 : vector<128x56xf32>
    %54 = arith.mulf %50, %39 : vector<128x56xf32>
    %55 = arith.addf %53, %54 : vector<128x56xf32>
    %56 = arith.mulf %55, %52 : vector<128x56xf32>
    %57 = arith.truncf %56 : vector<128x56xf32> to vector<128x56xbf16>
    %cst_28 = arith.constant dense<0.000000e+00> : vector<208x56xf32>
    %58 = tpu.matmul %17, %57, %cst_28 {dimension_numbers = #tpu.dot_dimension_numbers<[1], [0], [0], [1], [0, 0, 1, 1], [], []>} : vector<208x128xbf16>, vector<128x56xbf16>, vector<208x56xf32> -> vector<208x56xf32>
    %59 = vector.broadcast %13 : vector<208x1xf32> to vector<208x56xf32>
    %60 = arith.addf %58, %59 : vector<208x56xf32>
    %61 = vector.extract_strided_slice %60 {offsets = [0, 0], sizes = [80, 56], strides = [1, 1]} : vector<208x56xf32> to vector<80x56xf32>
    %62 = arith.truncf %61 : vector<80x56xf32> to vector<80x56xbf16>
    %63 = vector.extract_strided_slice %60 {offsets = [80, 0], sizes = [128, 56], strides = [1, 1]} : vector<208x56xf32> to vector<128x56xf32>
    %64 = arith.truncf %63 : vector<128x56xf32> to vector<128x56xbf16>
    %cst_29 = arith.constant dense<0.000000e+00> : vector<80x144xf32>
    %65 = tpu.matmul %62, %19, %cst_29 {dimension_numbers = #tpu.dot_dimension_numbers<[1], [0], [0], [1], [0, 0, 1, 1], [], []>} : vector<80x56xbf16>, vector<56x144xbf16>, vector<80x144xf32> -> vector<80x144xf32>
    %c0_30 = arith.constant 0 : index
    %c0_31 = arith.constant 0 : index
    %c0_32 = arith.constant 0 : index
    %66 = vector.load %arg12[%c0_30, %c0_31, %c0_32] : memref<2x80x144xf32, #tpu.memory_space<vmem>>, vector<1x80x144xf32>
    %67 = vector.shape_cast %66 : vector<1x80x144xf32> to vector<80x144xf32>
    %68 = vector.shape_cast %65 : vector<80x144xf32> to vector<1x80x144xf32>
    tpu.vector_store %arg12[%c0_30, %c0_31, %c0_32], %68 {strides = array<i32>} : memref<2x80x144xf32, #tpu.memory_space<vmem>>, vector<1x80x144xf32>,
    %cst_33 = arith.constant dense<0.000000e+00> : vector<128x256xf32>
    %69 = tpu.matmul %64, %18, %cst_33 {dimension_numbers = #tpu.dot_dimension_numbers<[1], [0], [0], [1], [0, 0, 1, 1], [], []>} : vector<128x56xbf16>, vector<56x256xbf16>, vector<128x256xf32> -> vector<128x256xf32>
    %c0_34 = arith.constant 0 : index
    %c0_35 = arith.constant 0 : index
    %c0_36 = arith.constant 0 : index
    %70 = vector.load %arg11[%c0_34, %c0_35, %c0_36] : memref<2x128x256xf32, #tpu.memory_space<vmem>>, vector<1x128x256xf32>
    %71 = vector.shape_cast %70 : vector<1x128x256xf32> to vector<128x256xf32>
    %72 = vector.shape_cast %69 : vector<128x256xf32> to vector<1x128x256xf32>
    tpu.vector_store %arg11[%c0_34, %c0_35, %c0_36], %72 {strides = array<i32>} : memref<2x128x256xf32, #tpu.memory_space<vmem>>, vector<1x128x256xf32>,
    %73 = arith.mulf %35, %26 : vector<128x56xf32>
    %74 = arith.truncf %73 : vector<128x56xf32> to vector<128x56xbf16>
    %cst_37 = arith.constant dense<0.000000e+00> : vector<128x56xf32>
    %75 = tpu.matmul %16, %74, %cst_37 {dimension_numbers = #tpu.dot_dimension_numbers<[1], [0], [0], [1], [0, 0, 1, 1], [], []>} : vector<128x128xbf16>, vector<128x56xbf16>, vector<128x56xf32> -> vector<128x56xf32>
    %76 = arith.mulf %35, %36 : vector<128x56xf32>
    %77 = arith.truncf %76 : vector<128x56xf32> to vector<128x56xbf16>
    %cst_38 = arith.constant dense<0.000000e+00> : vector<128x56xf32>
    %78 = tpu.matmul %16, %77, %cst_38 {dimension_numbers = #tpu.dot_dimension_numbers<[1], [0], [0], [1], [0, 0, 1, 1], [], []>} : vector<128x128xbf16>, vector<128x56xbf16>, vector<128x56xf32> -> vector<128x56xf32>
    %79 = arith.maximumf %75, %78 : vector<128x56xf32>
    %80 = arith.subf %75, %79 : vector<128x56xf32>
    %81 = math.exp %80 : vector<128x56xf32>
    %82 = arith.subf %78, %79 : vector<128x56xf32>
    %83 = math.exp %82 : vector<128x56xf32>
    %84 = arith.addf %81, %83 : vector<128x56xf32>
    %85 = tpu.reciprocal %84 {approx = true} : vector<128x56xf32> -> vector<128x56xf32>
    %86 = arith.mulf %81, %29 : vector<128x56xf32>
    %87 = arith.mulf %83, %39 : vector<128x56xf32>
    %88 = arith.addf %86, %87 : vector<128x56xf32>
    %89 = arith.mulf %88, %85 : vector<128x56xf32>
    %90 = arith.truncf %89 : vector<128x56xf32> to vector<128x56xbf16>
    %cst_39 = arith.constant dense<0.000000e+00> : vector<208x56xf32>
    %91 = tpu.matmul %17, %90, %cst_39 {dimension_numbers = #tpu.dot_dimension_numbers<[1], [0], [0], [1], [0, 0, 1, 1], [], []>} : vector<208x128xbf16>, vector<128x56xbf16>, vector<208x56xf32> -> vector<208x56xf32>
    %92 = vector.broadcast %13 : vector<208x1xf32> to vector<208x56xf32>
    %93 = arith.addf %91, %92 : vector<208x56xf32>
    %94 = vector.extract_strided_slice %93 {offsets = [0, 0], sizes = [80, 56], strides = [1, 1]} : vector<208x56xf32> to vector<80x56xf32>
    %95 = arith.truncf %94 : vector<80x56xf32> to vector<80x56xbf16>
    %96 = vector.extract_strided_slice %93 {offsets = [80, 0], sizes = [128, 56], strides = [1, 1]} : vector<208x56xf32> to vector<128x56xf32>
    %97 = arith.truncf %96 : vector<128x56xf32> to vector<128x56xbf16>
    %cst_40 = arith.constant dense<0.000000e+00> : vector<80x144xf32>
    %98 = tpu.matmul %95, %19, %cst_40 {dimension_numbers = #tpu.dot_dimension_numbers<[1], [0], [0], [1], [0, 0, 1, 1], [], []>} : vector<80x56xbf16>, vector<56x144xbf16>, vector<80x144xf32> -> vector<80x144xf32>
    %c1 = arith.constant 1 : index
    %c0_41 = arith.constant 0 : index
    %c0_42 = arith.constant 0 : index
    %99 = vector.load %arg12[%c1, %c0_41, %c0_42] : memref<2x80x144xf32, #tpu.memory_space<vmem>>, vector<1x80x144xf32>
    %100 = vector.shape_cast %99 : vector<1x80x144xf32> to vector<80x144xf32>
    %101 = vector.shape_cast %98 : vector<80x144xf32> to vector<1x80x144xf32>
    tpu.vector_store %arg12[%c1, %c0_41, %c0_42], %101 {strides = array<i32>} : memref<2x80x144xf32, #tpu.memory_space<vmem>>, vector<1x80x144xf32>,
    %cst_43 = arith.constant dense<0.000000e+00> : vector<128x256xf32>
    %102 = tpu.matmul %97, %18, %cst_43 {dimension_numbers = #tpu.dot_dimension_numbers<[1], [0], [0], [1], [0, 0, 1, 1], [], []>} : vector<128x56xbf16>, vector<56x256xbf16>, vector<128x256xf32> -> vector<128x256xf32>
    %c1_44 = arith.constant 1 : index
    %c0_45 = arith.constant 0 : index
    %c0_46 = arith.constant 0 : index
    %103 = vector.load %arg11[%c1_44, %c0_45, %c0_46] : memref<2x128x256xf32, #tpu.memory_space<vmem>>, vector<1x128x256xf32>
    %104 = vector.shape_cast %103 : vector<1x128x256xf32> to vector<128x256xf32>
    %105 = vector.shape_cast %102 : vector<128x256xf32> to vector<1x128x256xf32>
    tpu.vector_store %arg11[%c1_44, %c0_45, %c0_46], %105 {strides = array<i32>} : memref<2x128x256xf32, #tpu.memory_space<vmem>>, vector<1x128x256xf32>,
    return
  }
}

</mosaic_0001>

<bundles_post_ra>
// kernel: tpu_custom_call.1
= control target key start
LH: loop header
LB: loop body
LE: loop exit
PB: predicated region body
PF: predicated region fallthrough
CT: control target
= control target key end

     0   :  { %18 = vsyncpa [#allocation3], 0  ;;  %s7784_s0 = inlined_call_operand.vmem [shape: f32[256,256], index: 0, kind: input, shape index: {}]   ;;  %s7785_s1 = inlined_call_operand.vmem [shape: f32[160,144], index: 1, kind: input, shape index: {}]   ;;  %s7786_s2 = inlined_call_operand.vmem [shape: bf16[256,56], index: 2, kind: input, shape index: {}]   ;;  %s7787_s3 = inlined_call_operand.vmem [shape: bf16[144,56], index: 3, kind: input, shape index: {}]   ;;  %s7788_s4 = inlined_call_operand.vmem [shape: bf16[256,128], index: 4, kind: input, shape index: {}]   ;;  %s7789_s5 = inlined_call_operand.vmem [shape: bf16[128,80], index: 5, kind: input, shape index: {}]   ;;  %s7790_s6 = inlined_call_operand.vmem [shape: bf16[128,128], index: 6, kind: input, shape index: {}]   ;;  %s7791_s7 = inlined_call_operand.vmem [shape: bf16[208,128], index: 7, kind: input, shape index: {}]   ;;  %s7792_s8 = inlined_call_operand.vmem [shape: bf16[56,256], index: 8, kind: input, shape index: {}]   ;;  %s7793_s9 = inlined_call_operand.hbm [shape: bf16[56,144], index: 9, kind: input, shape index: {}]   ;;  %s7794_s10 = inlined_call_operand.vmem [shape: f32[256,4], index: 10, kind: input, shape index: {}]   ;;  %s7795_s11 = inlined_call_operand.hbm [shape: f32[2,128,256], index: 11, kind: output, shape index: {0}]   ;;  %s7796_s12 = inlined_call_operand.vmem [shape: f32[2,80,144], index: 12, kind: output, shape index: {1}]  }
   0x1   :  { %19 = vsyncpa [#allocation4], 0  ;;  %s5185_s21 = smov [#allocation2]  }
   0x2   :  { %s43_s22 = sshll.u32 %s5185_s21, 4  ;;  %s44_s22 = int_to_ptr.vmem [resolvable:$true] %s43_s22 }
   0x3   :  { %s5149_s23 = scalar_lea.vmem %s44_s22, 896  ;;  %p5154_p1 = scmp.lt.s32.totalorder %s44_s22, %s44_s22 }
   0x4   :  { %p5150_p0 = scmp.ne.s32.totalorder %s44_s22, %s5149_s23  ;;  %p5155_p2 = scmp.lt.s32.totalorder %s5149_s23, %s5149_s23 }
   0x6   :  { %p5156_p3 = por %p5155_p2, %p5154_p1 }
   0x8   :  { %p5157_p4 = pnand %p5156_p3, %p5150_p0 }
   0xa   :  { %5160 = shalt.err (!%p5157_p4)
}
   0xb   :  { %s5186_s24 = smov 128   ;;  %s5187_s25 = smov 8  }
   0xc   :  { %49 = dma.hbm_to_vmem [thread:$0]  %s7793_s9, 896, %s44_s22, [#allocation3], %s5186_s24, %s5186_s24, %s5187_s25  }
   0xd   :  { %5181 = dma.done.wait [#allocation3], 896  }
   0xe   :  { %5182 = vsyncadd [#allocation3], 4294966400  ;;  %v4798_v0 = vld [vmem:[%s7786_s2 + $0x78] sm:$0xff]   ;;  %v4800_v2 = vld [vmem:[%s7786_s2 + $0x70] sm:$0xff]   ;;  %v7797_v21 = vmov 0   ;;  %vm589_vm0 = vcmask 130048  }
   0xf   :  { %v4799_v1 = vld [vmem:[%s7786_s2 + $0x38] sm:$0xff]   ;;  %4069 = vmatprep.subr.bf16.mxu0 %v4798_v0  ;;  %v4801_v3 = vld [vmem:[%s7786_s2 + $0x30] sm:$0xff]   ;;  %v4802_v4 = vld [vmem:[%s7786_s2 + $0x68] sm:$0xff]   ;;  %620 = vmatprep.subr.bf16.mxu1 %v7797_v21  ;;  %vm1400_vm1 = vcmask 654336   ;;  %vm5191_vm2 = vmmov 0   ;;  %vm2669_vm3 = vcmask 1043456  }
  0x10   :  { %4070 = vmatpush3.bf16.msra.mxu0 %v4799_v1  ;;  %v4803_v5 = vld [vmem:[%s7786_s2 + $0x28] sm:$0xff]   ;;  %v4804_v6 = vld [vmem:[%s7786_s2 + $0x60] sm:$0xff]   ;;  %v4806_v8 = vld [vmem:[%s7786_s2 + $0x58] sm:$0xff]   ;;  %4793 = vset.pattern.permute.xlu1 %v7797_v21  ;;  %vm2653_vm4 = vcmask 457728  }
  0x11   :  { %4071 = vmatprep.subr.bf16.mxu0 %v4800_v2  ;;  %v4805_v7 = vld [vmem:[%s7786_s2 + $0x20] sm:$0xff]   ;;  %v4807_v9 = vld [vmem:[%s7786_s2 + $0x18] sm:$0xff]   ;;  %v4808_v10 = vld [vmem:[%s7786_s2 + $0x50] sm:$0xff]   ;;  %4792 = vset.pattern.permute.xlu0 %v7797_v21 }
  0x12   :  { %v57_v11 = vld [vmem:[%s7784_s0 + $0x8] sm:$0xff]  ;;  %v59_v12 = vld [vmem:[%s7784_s0 + $0x18] sm:$0xff]  ;;  %v4809_v14 = vld [vmem:[%s7786_s2 + $0x10] sm:$0xff]  }
  0x13   :  { %v121_v13 = vpack.c.bf16 %v59_v12, %v57_v11  ;;  %v4810_v15 = vld [vmem:[%s7786_s2 + $0x48] sm:$0xff]   ;;  %v4812_v17 = vld [vmem:[%s7786_s2 + $0x40] sm:$0xff]   ;;  %v58_v20 = vld [vmem:[%s7784_s0 + $0x10] sm:$0xff] }
  0x14   :  { %4072 = vmatpush3.bf16.msra.mxu0 %v4801_v3  ;;  %v4811_v16 = vld [vmem:[%s7786_s2 + $0x8] sm:$0xff]   ;;  %v4813_v18 = vld [vmem:[%s7786_s2] sm:$0xff]   ;;  %v63_v23 = vld [vmem:[%s7784_s0 + $0x38] sm:$0xff] }
  0x15   :  { %4073 = vmatprep.subr.bf16.mxu0 %v4802_v4  ;;  %312 = vmatprep.mubr.bf16.mxu0 %v121_v13  ;;  %v56_v19 = vld [vmem:[%s7784_s0] sm:$0xff]  ;;  %v61_v22 = vld [vmem:[%s7784_s0 + $0x28] sm:$0xff]  ;;  %v62_v27 = vld [vmem:[%s7784_s0 + $0x30] sm:$0xff] }
  0x16   :  { %v120_v24 = vpack.c.bf16 %v58_v20, %v56_v19  ;;  %v123_v25 = vpack.c.bf16 %v63_v23, %v61_v22  ;;  %v60_v26 = vld [vmem:[%s7784_s0 + $0x20] sm:$0xff]  ;;  %v65_v28 = vld [vmem:[%s7784_s0 + $0x48] sm:$0xff]  ;;  %v67_v29 = vld [vmem:[%s7784_s0 + $0x58] sm:$0xff] }
  0x17   :  { %v122_v30 = vpack.c.bf16 %v62_v27, %v60_v26  ;;  %v4814_v31 = vld [vmem:[%s7787_s3 + $0x38] sm:$0xff]   ;;  %v125_v32 = vpack.c.bf16 %v67_v29, %v65_v28  ;;  %v4815_v33 = vld [vmem:[%s7787_s3 + $0x30] sm:$0xff]   ;;  %v64_v34 = vld [vmem:[%s7784_s0 + $0x40] sm:$0xff] }
  0x18   :  { %4074 = vmatpush3.bf16.msra.mxu0 %v4803_v5  ;;  %621 = vmatpush1.bf16.msra.mxu1 %v4814_v31  ;;  %v66_v35 = vld [vmem:[%s7784_s0 + $0x50] sm:$0xff]  ;;  %v69_v36 = vld [vmem:[%s7784_s0 + $0x68] sm:$0xff]  ;;  %v71_v37 = vld [vmem:[%s7784_s0 + $0x78] sm:$0xff] }
  0x19   :  { %4075 = vmatprep.subr.bf16.mxu0 %v4804_v6  ;;  %622 = vmatprep.subr.bf16.mxu1 %v7797_v21  ;;  %v4816_v38 = vld [vmem:[%s7787_s3 + $0x28] sm:$0xff]   ;;  %v124_v39 = vpack.c.bf16 %v66_v35, %v64_v34  ;;  %v460_v41 = vld [vmem:[%s7785_s1 + $0x18] sm:$0xff]  ;;  %v127_v42 = vpack.c.bf16 %v71_v37, %v69_v36  ;;  %v4817_v44 = vld [vmem:[%s7787_s3 + $0x20] sm:$0xff]  }
  0x1a   :  { %v458_v40 = vld [vmem:[%s7785_s1 + $0x8] sm:$0xff]  ;;  %v68_v45 = vld [vmem:[%s7784_s0 + $0x60] sm:$0xff]  ;;  %v70_v46 = vld [vmem:[%s7784_s0 + $0x70] sm:$0xff] }
  0x1b   :  { %v498_v43 = vpack.c.bf16 %v460_v41, %v458_v40  ;;  %v73_v47 = vld [vmem:[%s7784_s0 + $0x88] sm:$0xff]  ;;  %v75_v48 = vld [vmem:[%s7784_s0 + $0x98] sm:$0xff]  ;;  %v126_v50 = vpack.c.bf16 %v70_v46, %v68_v45  ;;  %v4819_v51 = vld [vmem:[%s7787_s3 + $0x10] sm:$0xff]  }
  0x1c   :  { %4076 = vmatpush3.bf16.msra.mxu0 %v4805_v7  ;;  %623 = vmatpush1.bf16.msra.mxu1 %v4815_v33  ;;  %v4818_v49 = vld [vmem:[%s7787_s3 + $0x18] sm:$0xff]   ;;  %v129_v52 = vpack.c.bf16 %v75_v48, %v73_v47  ;;  %v72_v53 = vld [vmem:[%s7784_s0 + $0x80] sm:$0xff]  ;;  %v74_v54 = vld [vmem:[%s7784_s0 + $0x90] sm:$0xff] }
  0x1d   :  { %4077 = vmatprep.subr.bf16.mxu0 %v4806_v8  ;;  %624 = vmatprep.subr.bf16.mxu1 %v7797_v21  ;;  %v77_v55 = vld [vmem:[%s7784_s0 + $0xa8] sm:$0xff]  ;;  %v79_v56 = vld [vmem:[%s7784_s0 + $0xb8] sm:$0xff]  ;;  %v128_v58 = vpack.c.bf16 %v74_v54, %v72_v53  ;;  %v4821_v59 = vld [vmem:[%s7787_s3] sm:$0xff]  }
  0x1e   :  { %3932 = vmatprep.mubr.msk.bf16.mxu1 %vm589_vm0, %v498_v43  ;;  %v4820_v57 = vld [vmem:[%s7787_s3 + $0x8] sm:$0xff]   ;;  %v131_v60 = vpack.c.bf16 %v79_v56, %v77_v55  ;;  %v76_v61 = vld [vmem:[%s7784_s0 + $0xa0] sm:$0xff]  ;;  %v78_v62 = vld [vmem:[%s7784_s0 + $0xb0] sm:$0xff] }
  0x1f   :  { %v81_v63 = vld [vmem:[%s7784_s0 + $0xc8] sm:$0xff]  ;;  %v83_v0 = vld [vmem:[%s7784_s0 + $0xd8] sm:$0xff]  ;;  %v4822_v1 = vld [vmem:[%s7787_s3 + $0x40] sm:$0xff]   ;;  %v130_v6 = vpack.c.bf16 %v78_v62, %v76_v61 }
  0x20   :  { %4078 = vmatpush3.bf16.msra.mxu0 %v4807_v9  ;;  %625 = vmatpush1.bf16.msra.mxu1 %v4816_v38  ;;  %v457_v2 = vld [vmem:[%s7785_s1] sm:$0xff]  ;;  %v459_v3 = vld [vmem:[%s7785_s1 + $0x10] sm:$0xff]  ;;  %v462_v4 = vld [vmem:[%s7785_s1 + $0x28] sm:$0xff]  ;;  %v133_v7 = vpack.c.bf16 %v83_v0, %v81_v63 }
  0x21   :  { %4079 = vmatprep.subr.bf16.mxu0 %v4808_v10  ;;  %626 = vmatprep.subr.bf16.mxu1 %v7797_v21  ;;  %v464_v5 = vld [vmem:[%s7785_s1 + $0x38] sm:$0xff]  ;;  %v497_v8 = vpack.c.bf16 %v459_v3, %v457_v2  ;;  %v80_v10 = vld [vmem:[%s7784_s0 + $0xc0] sm:$0xff]  ;;  %v82_v11 = vld [vmem:[%s7784_s0 + $0xd0] sm:$0xff] }
  0x22   :  { %v500_v9 = vpack.c.bf16 %v464_v5, %v462_v4  ;;  %v85_v12 = vld [vmem:[%s7784_s0 + $0xe8] sm:$0xff]  ;;  %v87_v13 = vld [vmem:[%s7784_s0 + $0xf8] sm:$0xff]  ;;  %v84_v23 = vld [vmem:[%s7784_s0 + $0xe0] sm:$0xff] }
  0x23   :  { %v135_v19 = vpack.c.bf16 %v87_v13, %v85_v12  ;;  %v91_v26 = vld [vmem:[%s7784_s0 + $0x118] sm:$0xff]  ;;  %v465_v27 = vld [vmem:[%s7785_s1 + $0x40] sm:$0xff]  ;;  %v467_v28 = vld [vmem:[%s7785_s1 + $0x50] sm:$0xff] }
  0x24   :  { %4080 = vmatpush3.bf16.msra.mxu0 %v4809_v14  ;;  %627 = vmatpush1.bf16.msra.mxu1 %v4817_v44  ;;  %v461_v14 = vld [vmem:[%s7785_s1 + $0x20] sm:$0xff]  ;;  %v470_v29 = vld [vmem:[%s7785_s1 + $0x68] sm:$0xff]  ;;  %v501_v33 = vpack.c.bf16 %v467_v28, %v465_v27  ;;  %v90_v36 = vld [vmem:[%s7784_s0 + $0x110] sm:$0xff] }
  0x25   :  { %4081 = vmatprep.subr.bf16.mxu0 %v4810_v15  ;;  %628 = vmatprep.subr.bf16.mxu1 %v7797_v21  ;;  %v463_v15 = vld [vmem:[%s7785_s1 + $0x30] sm:$0xff]  ;;  %v88_v35 = vld [vmem:[%s7784_s0 + $0x100] sm:$0xff]  ;;  %v93_v37 = vld [vmem:[%s7784_s0 + $0x128] sm:$0xff] }
  0x26   :  { %v499_v20 = vpack.c.bf16 %v463_v15, %v461_v14  ;;  %v95_v38 = vld [vmem:[%s7784_s0 + $0x138] sm:$0xff]  ;;  %v471_v40 = vld [vmem:[%s7785_s1 + $0x70] sm:$0xff]  ;;  %v474_v41 = vld [vmem:[%s7785_s1 + $0x88] sm:$0xff]  ;;  %v136_v43 = vpack.c.bf16 %v90_v36, %v88_v35 }
  0x27   :  { %v139_v44 = vpack.c.bf16 %v95_v38, %v93_v37  ;;  %v92_v47 = vld [vmem:[%s7784_s0 + $0x120] sm:$0xff]  ;;  %v94_v48 = vld [vmem:[%s7784_s0 + $0x130] sm:$0xff]  ;;  %v478_v53 = vld [vmem:[%s7785_s1 + $0xa8] sm:$0xff] }
  0x28   :  { %4082 = vmatpush3.bf16.msra.mxu0 %v4811_v16  ;;  %629 = vmatpush1.bf16.msra.mxu1 %v4818_v49  ;;  %v466_v16 = vld [vmem:[%s7785_s1 + $0x48] sm:$0xff]  ;;  %v480_v54 = vld [vmem:[%s7785_s1 + $0xb8] sm:$0xff]  ;;  %v138_v55 = vpack.c.bf16 %v94_v48, %v92_v47  ;;  %v477_v63 = vld [vmem:[%s7785_s1 + $0xa0] sm:$0xff] }
  0x29   :  { %4083 = vmatprep.subr.bf16.mxu0 %v4812_v17  ;;  %630 = vmatprep.subr.bf16.mxu1 %v7797_v21  ;;  %v468_v17 = vld [vmem:[%s7785_s1 + $0x58] sm:$0xff]  ;;  %v97_v49 = vld [vmem:[%s7784_s0 + $0x148] sm:$0xff]  ;;  %v479_v0 = vld [vmem:[%s7785_s1 + $0xb0] sm:$0xff] }
  0x2a   :  { %v502_v22 = vpack.c.bf16 %v468_v17, %v466_v16  ;;  %v101_v61 = vld [vmem:[%s7784_s0 + $0x168] sm:$0xff]  ;;  %v103_v62 = vld [vmem:[%s7784_s0 + $0x178] sm:$0xff]  ;;  %v507_v5 = vpack.c.bf16 %v479_v0, %v477_v63  ;;  %v483_v12 = vld [vmem:[%s7785_s1 + $0xd0] sm:$0xff] }
  0x2b   :  { %v484_v2 = vld [vmem:[%s7785_s1 + $0xd8] sm:$0xff]  ;;  %v143_v4 = vpack.c.bf16 %v103_v62, %v101_v61  ;;  %v486_v13 = vld [vmem:[%s7785_s1 + $0xe8] sm:$0xff]  ;;  %v489_v36 = vld [vmem:[%s7785_s1 + $0x100] sm:$0xff] }
  0x2c   :  { %4084 = vmatpush3.bf16.msra.mxu0 %v4813_v18  ;;  %631 = vmatpush1.bf16.msra.mxu1 %v4819_v51  ;;  %v132_v18 = vpack.c.bf16 %v82_v11, %v80_v10  ;;  %v473_v51 = vld [vmem:[%s7785_s1 + $0x80] sm:$0xff]  ;;  %v107_v10 = vld [vmem:[%s7784_s0 + $0x198] sm:$0xff]  ;;  %v491_v37 = vld [vmem:[%s7785_s1 + $0x110] sm:$0xff] }
  0x2d   :  { %632 = vmatprep.subr.bf16.mxu1 %v7797_v21  ;;  %v481_v11 = vld [vmem:[%s7785_s1 + $0xc0] sm:$0xff]  ;;  %v488_v14 = vld [vmem:[%s7785_s1 + $0xf8] sm:$0xff]  ;;  %v494_v38 = vld [vmem:[%s7785_s1 + $0x128] sm:$0xff] }
  0x2e   :  { %v509_v17 = vpack.c.bf16 %v483_v12, %v481_v11  ;;  %v492_v27 = vld [vmem:[%s7785_s1 + $0x118] sm:$0xff]  ;;  %v493_v48 = vld [vmem:[%s7785_s1 + $0x120] sm:$0xff]  ;;  %v5705_v62 = vld [vmem:[%s7794_s10 + $0x68] sm:$0xff] }
  0x2f   :  { %313 = vmatmul.mubr.bf16.vlgmr.msra.gmra.mxu0 %v120_v24  ;;  %v86_v24 = vld [vmem:[%s7784_s0 + $0xf0] sm:$0xff]  ;;  %v115_v35 = vld [vmem:[%s7784_s0 + $0x1d8] sm:$0xff]  ;;  %v5699_v61 = vld [vmem:[%s7794_s10 + $0x60] sm:$0xff] }
  0x30   :  { %320 = vmatprep.mubr.bf16.mxu0 %v123_v25  ;;  %633 = vmatpush1.bf16.msra.mxu1 %v4820_v57  ;;  %v89_v25 = vld [vmem:[%s7784_s0 + $0x108] sm:$0xff]  ;;  %v134_v31 = vpack.c.bf16 %v86_v24, %v84_v23  ;;  %v111_v23 = vld [vmem:[%s7784_s0 + $0x1b8] sm:$0xff]  ;;  %v485_v24 = vld [vmem:[%s7785_s1 + $0xe0] sm:$0xff] }
  0x31   :  { %634 = vmatprep.subr.bf16.mxu1 %v7797_v21  ;;  %v119_v47 = vld [vmem:[%s7784_s0 + $0x1f8] sm:$0xff]  ;;  %v771_v63 = vld [vmem:[%s7794_s10 + $0xe0] sm:$0xff] }
  0x32   :  { %v770_v12 = vld [vmem:[%s7794_s10 + $0xd8] sm:$0xff] }
  0x34   :  { %635 = vmatpush1.bf16.msra.mxu1 %v4821_v59  ;;  %v96_v59 = vld [vmem:[%s7784_s0 + $0x140] sm:$0xff] }
  0x35   :  { %650 = vmatprep.subr.bf16.mxu1 %v7797_v21 }
  0x37   :  { %321 = vmatmul.mubr.bf16.gmra.mxu0 %v122_v30  ;;  %v472_v30 = vld [vmem:[%s7785_s1 + $0x78] sm:$0xff] }
  0x38   :  { %328 = vmatprep.mubr.bf16.mxu0 %v125_v32  ;;  %651 = vmatpush2.bf16.msra.mxu1 %v4822_v1  ;;  %v137_v32 = vpack.c.bf16 %v91_v26, %v89_v25  ;;  %v504_v34 = vpack.c.bf16 %v472_v30, %v470_v29  ;;  %v482_v1 = vld [vmem:[%s7785_s1 + $0xc8] sm:$0xff]  ;;  %v487_v25 = vld [vmem:[%s7785_s1 + $0xf0] sm:$0xff] }
  0x39   :  { %v490_v26 = vld [vmem:[%s7785_s1 + $0x108] sm:$0xff]  ;;  %v511_v30 = vpack.c.bf16 %v487_v25, %v485_v24  ;;  %v5759_v25 = vld [vmem:[%s7794_s10 + $0x30] sm:$0xff] }
  0x3a   :  { %v768_v24 = vld [vmem:[%s7794_s10 + $0xc8] sm:$0xff] }
  0x3b   :  { %653 = vmatmul.mubr.bf16.vlgmr.msra.gmra.mxu1 %v497_v8  ;;  %v102_v8 = vld [vmem:[%s7784_s0 + $0x170] sm:$0xff] }
  0x3c   :  { %3933 = vmatprep.mubr.msk.bf16.mxu1 %vm589_vm0, %v500_v9  ;;  %v105_v9 = vld [vmem:[%s7784_s0 + $0x188] sm:$0xff] }
  0x3d   :  { %v145_v16 = vpack.c.bf16 %v107_v10, %v105_v9 }
  0x3f   :  { %329 = vmatmul.mubr.bf16.gmra.mxu0 %v124_v39  ;;  %v469_v39 = vld [vmem:[%s7785_s1 + $0x60] sm:$0xff] }
  0x40   :  { %336 = vmatprep.mubr.bf16.mxu0 %v127_v42  ;;  %v476_v42 = vld [vmem:[%s7785_s1 + $0x98] sm:$0xff]  ;;  %v503_v45 = vpack.c.bf16 %v471_v40, %v469_v39 }
  0x41   :  { %v506_v46 = vpack.c.bf16 %v476_v42, %v474_v41  ;;  %v496_v39 = vld [vmem:[%s7785_s1 + $0x138] sm:$0xff]  ;;  %v513_v42 = vpack.c.bf16 %v491_v37, %v489_v36  ;;  %v5795_v36 = vld [vmem:[%s7794_s10 + $0x28] sm:$0xff]  ;;  %v763_v37 = vld [vmem:[%s7794_s10 + $0xa0] sm:$0xff] }
  0x43   :  { %661 = vmatmul.mubr.bf16.gmra.mxu1 %v499_v20  ;;  %v106_v20 = vld [vmem:[%s7784_s0 + $0x190] sm:$0xff] }
  0x44   :  { %3934 = vmatprep.mubr.msk.bf16.mxu1 %vm589_vm0, %v502_v22  ;;  %v109_v22 = vld [vmem:[%s7784_s0 + $0x1a8] sm:$0xff] }
  0x45   :  { %v147_v29 = vpack.c.bf16 %v111_v23, %v109_v22 }
  0x47   :  { %337 = vmatmul.mubr.bf16.gmra.mxu0 %v126_v50  ;;  %v99_v50 = vld [vmem:[%s7784_s0 + $0x158] sm:$0xff] }
  0x48   :  { %344 = vmatprep.mubr.bf16.mxu0 %v129_v52  ;;  %v475_v52 = vld [vmem:[%s7785_s1 + $0x90] sm:$0xff]  ;;  %v141_v56 = vpack.c.bf16 %v99_v50, %v97_v49 }
  0x49   :  { %v505_v57 = vpack.c.bf16 %v475_v52, %v473_v51  ;;  %v495_v49 = vld [vmem:[%s7785_s1 + $0x130] sm:$0xff] }
  0x4a   :  { %v515_v52 = vpack.c.bf16 %v495_v49, %v493_v48  ;;  %v762_v49 = vld [vmem:[%s7794_s10 + $0x98] sm:$0xff] }
  0x4b   :  { %669 = vmatmul.mubr.bf16.gmra.mxu1 %v501_v33  ;;  %v110_v33 = vld [vmem:[%s7784_s0 + $0x1b0] sm:$0xff] }
  0x4c   :  { %3935 = vmatprep.mubr.msk.bf16.mxu1 %vm589_vm0, %v504_v34  ;;  %v113_v34 = vld [vmem:[%s7784_s0 + $0x1c8] sm:$0xff] }
  0x4d   :  { %v149_v41 = vpack.c.bf16 %v115_v35, %v113_v34 }
  0x4f   :  { %345 = vmatmul.mubr.bf16.gmra.mxu0 %v128_v58  ;;  %v508_v58 = vpack.c.bf16 %v480_v54, %v478_v53  ;;  %v116_v53 = vld [vmem:[%s7784_s0 + $0x1e0] sm:$0xff]  ;;  %v118_v54 = vld [vmem:[%s7784_s0 + $0x1f0] sm:$0xff] }
  0x50   :  { %352 = vmatprep.mubr.bf16.mxu0 %v131_v60  ;;  %v98_v60 = vld [vmem:[%s7784_s0 + $0x150] sm:$0xff] }
  0x51   :  { %v140_v3 = vpack.c.bf16 %v98_v60, %v96_v59  ;;  %v5690_v59 = vld [vmem:[%s7794_s10 + $0x78] sm:$0xff] }
  0x52   :  { %v774_v60 = vld [vmem:[%s7794_s10 + $0xf8] sm:$0xff] }
  0x53   :  { %677 = vmatmul.mubr.bf16.gmra.mxu1 %v503_v45  ;;  %v114_v45 = vld [vmem:[%s7784_s0 + $0x1d0] sm:$0xff] }
  0x54   :  { %3936 = vmatprep.mubr.msk.bf16.mxu1 %vm589_vm0, %v506_v46  ;;  %v117_v46 = vld [vmem:[%s7784_s0 + $0x1e8] sm:$0xff] }
  0x55   :  { %v151_v51 = vpack.c.bf16 %v119_v47, %v117_v46 }
  0x57   :  { %353 = vmatmul.mubr.bf16.gmra.mxu0 %v130_v6  ;;  %v510_v6 = vpack.c.bf16 %v484_v2, %v482_v1  ;;  %v772_v1 = vld [vmem:[%s7794_s10 + $0xe8] sm:$0xff]  ;;  %v5717_v2 = vld [vmem:[%s7794_s10 + $0x50] sm:$0xff] }
  0x58   :  { %360 = vmatprep.mubr.bf16.mxu0 %v133_v7  ;;  %v100_v7 = vld [vmem:[%s7784_s0 + $0x160] sm:$0xff] }
  0x59   :  { %v142_v15 = vpack.c.bf16 %v102_v8, %v100_v7  ;;  %v769_v7 = vld [vmem:[%s7794_s10 + $0xd0] sm:$0xff] }
  0x5b   :  { %685 = vmatmul.mubr.bf16.gmra.mxu1 %v505_v57  ;;  %v5681_v57 = vld [vmem:[%s7794_s10 + $0x70] sm:$0xff] }
  0x5c   :  { %3937 = vmatprep.mubr.msk.bf16.mxu1 %vm589_vm0, %v508_v58  ;;  %951 = vperm.xlu0 %4792, %v5681_v57   ;;  %v773_v58 = vld [vmem:[%s7794_s10 + $0xf0] sm:$0xff] }
  0x5d   :  { %1031 = vperm.xlu1 %4793, %v773_v58  }
  0x5f   :  { %361 = vmatmul.mubr.bf16.gmra.mxu0 %v132_v18  ;;  %v512_v18 = vpack.c.bf16 %v488_v14, %v486_v13  ;;  %v5737_v13 = vld [vmem:[%s7794_s10 + $0x40] sm:$0xff] }
  0x60   :  { %368 = vmatprep.mubr.bf16.mxu0 %v135_v19  ;;  %v104_v19 = vld [vmem:[%s7784_s0 + $0x180] sm:$0xff]  ;;  %956 = vperm.xlu0 %4792, %v5690_v59  }
  0x61   :  { %v144_v28 = vpack.c.bf16 %v106_v20, %v104_v19  ;;  %1036 = vperm.xlu1 %4793, %v774_v60  }
  0x63   :  { %693 = vmatmul.mubr.bf16.gmra.mxu1 %v507_v5 }
  0x64   :  { %3938 = vmatprep.mubr.msk.bf16.mxu1 %vm589_vm0, %v510_v6  ;;  %941 = vperm.xlu0 %4792, %v5699_v61   ;;  %v5723_v6 = vld [vmem:[%s7794_s10 + $0x58] sm:$0xff] }
  0x65   :  { %946 = vperm.xlu1 %4793, %v5705_v62  }
  0x67   :  { %369 = vmatmul.mubr.bf16.gmra.mxu0 %v134_v31  ;;  %v514_v31 = vpack.c.bf16 %v492_v27, %v490_v26 }
  0x68   :  { %376 = vmatprep.mubr.bf16.mxu0 %v137_v32  ;;  %v108_v32 = vld [vmem:[%s7784_s0 + $0x1a0] sm:$0xff]  ;;  %1021 = vperm.xlu0 %4792, %v771_v63  }
  0x69   :  { %v146_v40 = vpack.c.bf16 %v110_v33, %v108_v32  ;;  %1026 = vperm.xlu1 %4793, %v772_v1   ;;  %v766_v32 = vld [vmem:[%s7794_s10 + $0xb8] sm:$0xff]  ;;  %v5785_v33 = vld [vmem:[%s7794_s10 + $0x20] sm:$0xff] }
  0x6b   :  { %701 = vmatmul.mubr.bf16.gmra.mxu1 %v509_v17  ;;  %v5743_v17 = vld [vmem:[%s7794_s10 + $0x48] sm:$0xff] }
  0x6c   :  { %3939 = vmatprep.mubr.msk.bf16.mxu1 %vm589_vm0, %v512_v18  ;;  %931 = vperm.xlu0 %4792, %v5717_v2   ;;  %v767_v18 = vld [vmem:[%s7794_s10 + $0xc0] sm:$0xff] }
  0x6d   :  { %936 = vperm.xlu1 %4793, %v5723_v6  }
  0x6f   :  { %377 = vmatmul.mubr.bf16.gmra.mxu0 %v136_v43  ;;  %v516_v43 = vpack.c.bf16 %v496_v39, %v494_v38 }
  0x70   :  { %384 = vmatprep.mubr.bf16.mxu0 %v139_v44  ;;  %v112_v44 = vld [vmem:[%s7784_s0 + $0x1c0] sm:$0xff]  ;;  %1011 = vperm.xlu0 %4792, %v769_v7  }
  0x71   :  { %v148_v50 = vpack.c.bf16 %v114_v45, %v112_v44  ;;  %1016 = vperm.xlu1 %4793, %v770_v12   ;;  %v5819_v44 = vld [vmem:[%s7794_s10 + $0x18] sm:$0xff]  ;;  %v761_v45 = vld [vmem:[%s7794_s10 + $0x90] sm:$0xff] }
  0x72   :  { %7886 = vst [vmem:[#allocation8_spill] sm:$0xff] %v5819_v44 }
  0x73   :  { %709 = vmatmul.mubr.bf16.gmra.mxu1 %v511_v30 }
  0x74   :  { %3940 = vmatprep.mubr.msk.bf16.mxu1 %vm589_vm0, %v514_v31  ;;  %921 = vperm.xlu0 %4792, %v5737_v13  }
  0x75   :  { %926 = vperm.xlu1 %4793, %v5743_v17  }
  0x77   :  { %385 = vmatmul.mubr.bf16.gmra.mxu0 %v138_v55  ;;  %v150_v55 = vpack.c.bf16 %v118_v54, %v116_v53 }
  0x78   :  { %392 = vmatprep.mubr.bf16.mxu0 %v141_v56  ;;  %v5675_v56 = vld [vmem:[%s7788_s4] sm:$0xff]   ;;  %1001 = vperm.xlu0 %4792, %v767_v18  }
  0x79   :  { %1006 = vperm.xlu1 %4793, %v768_v24  }
  0x7b   :  { %717 = vmatmul.mubr.bf16.gmra.mxu1 %v513_v42 }
  0x7c   :  { %3941 = vmatprep.mubr.msk.bf16.mxu1 %vm589_vm0, %v516_v43  ;;  %911 = vperm.xlu0 %4792, %v5759_v25  }
  0x7f   :  { %393 = vmatmul.mubr.bf16.gmra.mxu0 %v140_v3 }
  0x80   :  { %400 = vmatprep.mubr.bf16.mxu0 %v143_v4 }
  0x83   :  { %725 = vmatmul.mubr.bf16.gmra.mxu1 %v515_v52 }
  0x84   :  { %4377 = vmatprep.mubr.bf16.mxu1 %v5675_v56 }
  0x87   :  { %401 = vmatmul.mubr.bf16.gmra.mxu0 %v142_v15 }
  0x88   :  { %408 = vmatprep.mubr.bf16.mxu0 %v145_v16 }
  0x8f   :  { %409 = vmatmul.mubr.bf16.gmra.mxu0 %v144_v28  ;;  %v5769_v28 = vld [vmem:[%s7794_s10 + $0x38] sm:$0xff] }
  0x90   :  { %416 = vmatprep.mubr.bf16.mxu0 %v147_v29  ;;  %v765_v29 = vld [vmem:[%s7794_s10 + $0xb0] sm:$0xff]  ;;  %916 = vperm.xlu1 %4793, %v5769_v28  }
  0x91   :  { %991 = vperm.xlu0 %4792, %v765_v29  }
  0x94   :  { %996 = vperm.xlu1 %4793, %v766_v32  }
  0x95   :  { %901 = vperm.xlu0 %4792, %v5785_v33  }
  0x97   :  { %417 = vmatmul.mubr.bf16.gmra.mxu0 %v146_v40  ;;  %v764_v40 = vld [vmem:[%s7794_s10 + $0xa8] sm:$0xff] }
  0x98   :  { %424 = vmatprep.mubr.bf16.mxu0 %v149_v41  ;;  %906 = vperm.xlu1 %4793, %v5795_v36   ;;  %v5811_v41 = vld [vmem:[%s7794_s10 + $0x10] sm:$0xff] }
  0x99   :  { %981 = vperm.xlu0 %4792, %v763_v37  }
  0x9c   :  { %986 = vperm.xlu1 %4793, %v764_v40  }
  0x9d   :  { %891 = vperm.xlu0 %4792, %v5811_v41  }
  0x9f   :  { %425 = vmatmul.mubr.bf16.gmra.mxu0 %v148_v50  ;;  %v5833_v50 = vld [vmem:[%s7794_s10] sm:$0xff] }
  0xa0   :  { %432 = vmatprep.mubr.bf16.mxu0 %v151_v51  ;;  %896 = vperm.xlu1 %4793, %v5819_v44   ;;  %7887 = vst [vmem:[#allocation9_spill] sm:$0xff] %v5833_v50 }
  0xa1   :  { %971 = vperm.xlu0 %4792, %v761_v45  }
  0xa4   :  { %976 = vperm.xlu1 %4793, %v762_v49  }
  0xa5   :  { %881 = vperm.xlu0 %4792, %v5833_v50  }
  0xa7   :  { %433 = vmatmul.mubr.bf16.gmra.mxu0 %v150_v55  ;;  %v5841_v55 = vld [vmem:[%s7794_s10 + $0x8] sm:$0xff] }
  0xa8   :  { %7888 = vst [vmem:[#allocation10_spill] sm:$0xff] %v5841_v55  ;;  %886 = vperm.xlu1 %4793, %v5841_v55  }
  0xef   :  { %v4085_v0 = vpop.f32.mrf.mxu0 }
  0xf1   :  { %v4086_v3 = vpop.f32.mrf.mxu0 }
  0xf2   :  { %v4087_v4 = vadd.f32 %v4086_v3, %v4085_v0 }
  0xf3   :  { %v4088_v5 = vpop.f32.mrf.mxu0 }
  0xf5   :  { %v4089_v8 = vpop.f32.mrf.mxu0 }
  0xf6   :  { %v4090_v9 = vadd.f32 %v4089_v8, %v4088_v5 }
  0xf7   :  { %v4091_v10 = vpop.f32.mrf.mxu0 }
  0xf8   :  { %v5729_v11 = vpack.c.bf16 %v4090_v9, %v4087_v4 }
  0xf9   :  { %v4092_v14 = vpop.f32.mrf.mxu0 }
  0xfa   :  { %v4093_v15 = vadd.f32 %v4092_v14, %v4091_v10 }
  0xfb   :  { %v4094_v16 = vpop.f32.mrf.mxu0  ;;  %v5825_v48 = vpop.f32.mrf.mxu1 }
  0xfd   :  { %v4095_v19 = vpop.f32.mrf.mxu0  ;;  %v656_v52 = vpop.f32.mrf.mxu1 }
  0xfe   :  { %v4096_v20 = vadd.f32 %v4095_v19, %v4094_v16 }
  0xff   :  { %v5749_v22 = vpop.f32.mrf.mxu0  ;;  %v5836_v54 = vpop.f32.mrf.mxu1 }
 0x100   :  { %v5751_v23 = vpack.c.bf16 %v4096_v20, %v4093_v15 }
 0x101   :  { %v5761_v26 = vpop.f32.mrf.mxu0  ;;  %v659_v60 = vpop.f32.mrf.mxu1 }
 0x103   :  { %v5764_v27 = vpop.f32.mrf.mxu0  ;;  %v5844_v0 = vpop.f32.mrf.mxu1 }
 0x105   :  { %v5774_v30 = vpop.f32.mrf.mxu0  ;;  %v664_v3 = vpop.f32.mrf.mxu1 }
 0x107   :  { %v5777_v31 = vpop.f32.mrf.mxu0  ;;  %v5846_v5 = vpop.f32.mrf.mxu1 }
 0x109   :  { %v5787_v34 = vpop.f32.mrf.mxu0  ;;  %v667_v8 = vpop.f32.mrf.mxu1 }
 0x10b   :  { %v5790_v35 = vpop.f32.mrf.mxu0  ;;  %v5848_v10 = vpop.f32.mrf.mxu1 }
 0x10d   :  { %v5800_v38 = vpop.f32.mrf.mxu0  ;;  %v672_v14 = vpop.f32.mrf.mxu1 }
 0x10e   :  { %v759_v14 = vld [vmem:[%s7794_s10 + $0x80] sm:$0xff] }
 0x10f   :  { %v5803_v39 = vpop.f32.mrf.mxu0  ;;  %v673_v16 = vpop.f32.mrf.mxu1  ;;  %961 = vperm.xlu0 %4792, %v759_v14  }
 0x111   :  { %v5813_v42 = vpop.f32.mrf.mxu0  ;;  %v675_v29 = vpop.f32.mrf.mxu1 }
 0x113   :  { %v4112_v43 = vpop.f32.mrf.mxu0  ;;  %v678_v45 = vpop.f32.mrf.mxu1 }
 0x115   :  { %v4113_v46 = vpop.f32.mrf.mxu0  ;;  %v680_v8 = vpop.f32.mrf.mxu1 }
 0x117   :  { %v4115_v47 = vpop.f32.mrf.mxu0 }
 0x119   :  { %v4116_v51 = vpop.f32.mrf.mxu0 }
 0x11b   :  { %v4118_v53 = vpop.f32.mrf.mxu0 }
 0x11d   :  { %v4119_v58 = vpop.f32.mrf.mxu0 }
 0x11e   :  { %v4120_v52 = vadd.f32 %v4119_v58, %v4118_v53  ;;  %v4111_v58 = vadd.f32 %v5813_v42, %v5803_v39  ;;  %v4105_v39 = vadd.f32 %v5787_v34, %v5777_v31 }
 0x11f   :  { %v4121_v63 = vpop.f32.mrf.mxu0 }
 0x121   :  { %v4122_v1 = vpop.f32.mrf.mxu0 }
 0x122   :  { %v4123_v37 = vadd.f32 %v4122_v1, %v4121_v63  ;;  %v4114_v63 = vadd.f32 %v4113_v46, %v4112_v43 }
 0x123   :  { %v4124_v4 = vpop.f32.mrf.mxu0 }
 0x125   :  { %v4125_v7 = vpop.f32.mrf.mxu0 }
 0x126   :  { %v4126_v19 = vadd.f32 %v4125_v7, %v4124_v4  ;;  %v4117_v4 = vadd.f32 %v4116_v51, %v4115_v47  ;;  %v681_v7 = vpop.f32.mrf.mxu1  ;;  %v4108_v47 = vadd.f32 %v5800_v38, %v5790_v35  ;;  %v445_v51 = vpack.c.bf16 %v4114_v63, %v4111_v58 }
 0x127   :  { %v4127_v9 = vpop.f32.mrf.mxu0  ;;  %v4102_v35 = vadd.f32 %v5774_v30, %v5764_v27  ;;  %v735_v27 = vpack.c.bf16 %v673_v16, %v5848_v10 }
 0x128   :  { %v447_v60 = vpack.c.bf16 %v4126_v19, %v4123_v37  ;;  %v446_v1 = vpack.c.bf16 %v4120_v52, %v4117_v4  ;;  %v444_v38 = vpack.c.bf16 %v4108_v47, %v4105_v39 }
 0x129   :  { %v4128_v12 = vpop.f32.mrf.mxu0 }
 0x12a   :  { %v4129_v20 = vadd.f32 %v4128_v12, %v4127_v9 }
 0x12b   :  { %v4130_v15 = vpop.f32.mrf.mxu0 }
 0x12d   :  { %v4131_v18 = vpop.f32.mrf.mxu0 }
 0x12e   :  { %v4132_v24 = vadd.f32 %v4131_v18, %v4130_v15  ;;  %v683_v15 = vpop.f32.mrf.mxu1 }
 0x12f   :  { %v4133_v32 = vpop.f32.mrf.mxu0 }
 0x130   :  { %v448_v40 = vpack.c.bf16 %v4132_v24, %v4129_v20  ;;  %v686_v19 = vpop.f32.mrf.mxu1 }
 0x131   :  { %v4134_v49 = vpop.f32.mrf.mxu0 }
 0x132   :  { %v4135_v3 = vadd.f32 %v4134_v49, %v4133_v32  ;;  %4361 = vmatprep.subr.bf16.mxu1 %v448_v40  ;;  %v688_v43 = vpop.f32.mrf.mxu1  ;;  %v736_v32 = vpack.c.bf16 %v681_v7, %v678_v45 }
 0x133   :  { %v4136_v21 = vpop.f32.mrf.mxu0  ;;  %4362 = vmatpush3.bf16.msra.mxu1 %v448_v40 }
 0x134   :  { %4363 = vmatprep.subr.bf16.mxu1 %v447_v60  ;;  %v689_v42 = vpop.f32.mrf.mxu1 }
 0x135   :  { %v4137_v9 = vpop.f32.mrf.mxu0  ;;  %v737_v37 = vpack.c.bf16 %v689_v42, %v686_v19 }
 0x136   :  { %v4138_v12 = vadd.f32 %v4137_v9, %v4136_v21  ;;  %v760_v21 = vld [vmem:[%s7794_s10 + $0x88] sm:$0xff]  ;;  %v691_v49 = vpop.f32.mrf.mxu1  ;;  %v733_v9 = vpack.c.bf16 %v5836_v54, %v5825_v48 }
 0x137   :  { %v4139_v53 = vpop.f32.mrf.mxu0  ;;  %4364 = vmatpush3.bf16.msra.mxu1 %v447_v60  ;;  %966 = vperm.xlu1 %4793, %v760_v21   ;;  %v4099_v60 = vadd.f32 %v5761_v26, %v5749_v22  ;;  %v734_v26 = vpack.c.bf16 %v5846_v5, %v5844_v0  ;;  %v5897_v0 = vld [vmem:[%s7789_s5] sm:$0xff]   ;;  %v5910_v48 = vld [vmem:[%s7788_s4 + $0x8] sm:$0xff]  }
 0x138   :  { %v5855_v18 = vpack.c.bf16 %v4138_v12, %v4135_v3  ;;  %4365 = vmatprep.subr.bf16.mxu1 %v446_v1  ;;  %4409 = vmatprep.subr.bf16.mxu0 %v737_v37  ;;  %v5872_v31 = vpop.f32.mrf.mxu1 }
 0x139   :  { %v4140_v20 = vpop.f32.mrf.mxu0  ;;  %4410 = vmatpush3.bf16.msra.mxu0 %v737_v37  ;;  %v443_v30 = vpack.c.bf16 %v4102_v35, %v4099_v60  ;;  %4419 = vmatprep.mubr.msk.bf16.mxu0 %vm1400_vm1, %v5897_v0  ;;  %v5955_v60 = vld [vmem:[%s7788_s4 + $0x30] sm:$0xff]  }
 0x13a   :  { %v4141_v24 = vadd.f32 %v4140_v20, %v4139_v53  ;;  %4411 = vmatprep.subr.bf16.mxu0 %v736_v32  ;;  %v696_v45 = vpop.f32.mrf.mxu1  ;;  %v5923_v53 = vld [vmem:[%s7789_s5 + $0x8] sm:$0xff]  }
 0x13b   :  { %v4142_v46 = vpop.f32.mrf.mxu0  ;;  %4366 = vmatpush3.bf16.msra.mxu1 %v446_v1 }
 0x13c   :  { %4367 = vmatprep.subr.bf16.mxu1 %v445_v51  ;;  %v5879_v14 = vpop.f32.mrf.mxu1 }
 0x13d   :  { %v4143_v29 = vpop.f32.mrf.mxu0  ;;  %4412 = vmatpush3.bf16.msra.mxu0 %v736_v32 }
 0x13e   :  { %v4144_v40 = vadd.f32 %v4143_v29, %v4142_v46  ;;  %4413 = vmatprep.subr.bf16.mxu0 %v735_v27  ;;  %v699_v4 = vpop.f32.mrf.mxu1  ;;  %v5943_v46 = vld [vmem:[%s7788_s4 + $0x20] sm:$0xff]  }
 0x13f   :  { %v5866_v52 = vpop.f32.mrf.mxu0  ;;  %4368 = vmatpush3.bf16.msra.mxu1 %v445_v51 }
 0x140   :  { %v5870_v3 = vpack.c.bf16 %v4144_v40, %v4141_v24  ;;  %4369 = vmatprep.subr.bf16.mxu1 %v444_v38  ;;  %v5888_v10 = vpop.f32.mrf.mxu1  ;;  %v5938_v24 = vld [vmem:[%s7788_s4 + $0x18] sm:$0xff]  }
 0x141   :  { %v5874_v34 = vpop.f32.mrf.mxu0  ;;  %4414 = vmatpush3.bf16.msra.mxu0 %v735_v27 }
 0x142   :  { %4415 = vmatprep.subr.bf16.mxu0 %v734_v26  ;;  %v704_v63 = vpop.f32.mrf.mxu1 }
 0x143   :  { %v5877_v8 = vpop.f32.mrf.mxu0  ;;  %4370 = vmatpush3.bf16.msra.mxu1 %v444_v38  ;;  %v5950_v38 = vld [vmem:[%s7788_s4 + $0x28] sm:$0xff]  }
 0x144   :  { %4371 = vmatprep.subr.bf16.mxu1 %v443_v30  ;;  %v705_v1 = vpop.f32.mrf.mxu1 }
 0x145   :  { %v5881_v22 = vpop.f32.mrf.mxu0  ;;  %4416 = vmatpush3.bf16.msra.mxu0 %v734_v26 }
 0x146   :  { %4417 = vmatprep.subr.bf16.mxu0 %v733_v9  ;;  %v707_v54 = vpop.f32.mrf.mxu1 }
 0x147   :  { %v5885_v7 = vpop.f32.mrf.mxu0  ;;  %4372 = vmatpush3.bf16.msra.mxu1 %v443_v30 }
 0x148   :  { %4373 = vmatprep.subr.bf16.mxu1 %v5751_v23  ;;  %v710_v58 = vpop.f32.mrf.mxu1 }
 0x149   :  { %v5890_v16 = vpop.f32.mrf.mxu0  ;;  %4418 = vmatpush3.bf16.msra.mxu0 %v733_v9 }
 0x14a   :  { %v712_v20 = vpop.f32.mrf.mxu1 }
 0x14b   :  { %v5899_v5 = vpop.f32.mrf.mxu0  ;;  %4374 = vmatpush3.bf16.msra.mxu1 %v5751_v23  ;;  %v5918_v23 = vld [vmem:[%s7788_s4 + $0x10] sm:$0xff]   ;;  %v5962_v20 = vld [vmem:[%s7788_s4 + $0x38] sm:$0xff]  }
 0x14c   :  { %4375 = vmatprep.subr.bf16.mxu1 %v5729_v11  ;;  %4420 = vmatmul.mubr.msk.bf16.vlgmr.msra.gmra.mxu0 %vm1400_vm1, %v5923_v53 }
 0x14d   :  { %v5903_v12 = vpop.f32.mrf.mxu0 }
 0x14f   :  { %v5912_v15 = vpop.f32.mrf.mxu0  ;;  %4376 = vmatpush3.bf16.msra.mxu1 %v5729_v11  ;;  %v713_v11 = vpop.f32.mrf.mxu1 }
 0x150   :  { %v740_v55 = vpack.c.bf16 %v713_v11, %v710_v58  ;;  %v4833_v58 = vld [vmem:[%s7788_s4 + $0x50] sm:$0xff]  }
 0x151   :  { %v5925_v19 = vpop.f32.mrf.mxu0  ;;  %v715_v21 = vpop.f32.mrf.mxu1 }
 0x152   :  { %4378 = vmatmul.mubr.bf16.vlgmr.msra.gmra.mxu1 %v5910_v48 }
 0x153   :  { %v5928_v47 = vpop.f32.mrf.mxu0  ;;  %4381 = vmatprep.mubr.bf16.mxu1 %v5918_v23  ;;  %v718_v39 = vpop.f32.mrf.mxu1 }
 0x155   :  { %v5933_v51 = vpop.f32.mrf.mxu0  ;;  %v720_v29 = vpop.f32.mrf.mxu1 }
 0x157   :  { %v4163_v43 = vpop.f32.mrf.mxu0  ;;  %v721_v37 = vpop.f32.mrf.mxu1 }
 0x158   :  { %v741_v63 = vpack.c.bf16 %v721_v37, %v718_v39 }
 0x159   :  { %v4164_v42 = vpop.f32.mrf.mxu0  ;;  %v723_v40 = vpop.f32.mrf.mxu1 }
 0x15a   :  { %4382 = vmatmul.mubr.bf16.gmra.mxu1 %v5938_v24  ;;  %v5967_v40 = vld [vmem:[%s7788_s4 + $0x40] sm:$0xff]  }
 0x15b   :  { %v4166_v32 = vpop.f32.mrf.mxu0  ;;  %4385 = vmatprep.mubr.bf16.mxu1 %v5943_v46  ;;  %v726_v27 = vpop.f32.mrf.mxu1 }
 0x15d   :  { %v4167_v35 = vpop.f32.mrf.mxu0  ;;  %v728_v45 = vpop.f32.mrf.mxu1 }
 0x15f   :  { %v4169_v49 = vpop.f32.mrf.mxu0  ;;  %v729_v4 = vpop.f32.mrf.mxu1 }
 0x160   :  { %v742_v54 = vpack.c.bf16 %v729_v4, %v726_v27  ;;  %v739_v27 = vpack.c.bf16 %v705_v1, %v5888_v10  ;;  %v4168_v10 = vadd.f32 %v4167_v35, %v4166_v32 }
 0x161   :  { %v4170_v30 = vpop.f32.mrf.mxu0  ;;  %v731_v21 = vpop.f32.mrf.mxu1 }
 0x162   :  { %4386 = vmatmul.mubr.bf16.gmra.mxu1 %v5950_v38  ;;  %4483 = vmatprep.subr.bf16.mxu0 %v742_v54  ;;  %v4171_v11 = vadd.f32 %v4170_v30, %v4169_v49 }
 0x163   :  { %v4172_v26 = vpop.f32.mrf.mxu0  ;;  %4389 = vmatprep.mubr.bf16.mxu1 %v5955_v60  ;;  %4484 = vmatpush3.bf16.msra.mxu0 %v742_v54  ;;  %v4832_v54 = vld [vmem:[%s7788_s4 + $0x48] sm:$0xff]  }
 0x164   :  { %4485 = vmatprep.subr.bf16.mxu0 %v741_v63 }
 0x165   :  { %v4173_v9 = vpop.f32.mrf.mxu0 }
 0x166   :  { %v4174_v4 = vadd.f32 %v4173_v9, %v4172_v26  ;;  %v4165_v26 = vadd.f32 %v4164_v42, %v4163_v43  ;;  %v4162_v9 = vadd.f32 %v5933_v51, %v5928_v47  ;;  %v4153_v47 = vadd.f32 %v5890_v16, %v5885_v7  ;;  %v6051_v7 = vpop.permute.xlu0 %951  ;;  %v6055_v16 = vpop.permute.xlu1 %1031 }
 0x167   :  { %v4175_v29 = vpop.f32.mrf.mxu0  ;;  %4486 = vmatpush3.bf16.msra.mxu0 %v741_v63  ;;  %v738_v63 = vpack.c.bf16 %v5879_v14, %v5872_v31  ;;  %v4156_v31 = vadd.f32 %v5903_v12, %v5899_v5  ;;  %v4150_v51 = vadd.f32 %v5881_v22, %v5877_v8  ;;  %v4837_v5 = vld [vmem:[%s7788_s4 + $0x70] sm:$0xff]   ;;  %v4147_v12 = vadd.f32 %v5874_v34, %v5866_v52  ;;  %v4838_v8 = vld [vmem:[%s7788_s4 + $0x78] sm:$0xff]   ;;  %v4843_v52 = vld [vmem:[%s7789_s5 + $0x20] sm:$0xff]  }
 0x168   :  { %4487 = vmatprep.subr.bf16.mxu0 %v740_v55  ;;  %v455_v1 = vpack.c.bf16 %v4174_v4, %v4171_v11  ;;  %v454_v49 = vpack.c.bf16 %v4168_v10, %v4165_v26  ;;  %v4845_v34 = vld [vmem:[%s7789_s5 + $0x30] sm:$0xff]   ;;  %v4846_v22 = vld [vmem:[%s7789_s5 + $0x38] sm:$0xff]   ;;  %7889 = vst [vmem:[#allocation11_spill] sm:$0xff] %v6055_v16  ;;  %v5189_v11 = vmov 1  }
 0x169   :  { %v4176_v45 = vpop.f32.mrf.mxu0  ;;  %v452_v43 = vpack.c.bf16 %v4156_v31, %v4153_v47  ;;  %4795 = vset.pattern.permute.xlu1 %v5189_v11  ;;  %4794 = vset.pattern.permute.xlu0 %v5189_v11 }
 0x16a   :  { %4390 = vmatmul.mubr.bf16.gmra.mxu1 %v5962_v20  ;;  %v4177_v21 = vadd.f32 %v4176_v45, %v4175_v29  ;;  %1357 = vperm.xlu1 %4795, %v5690_v59  }
 0x16b   :  { %v4178_v39 = vpop.f32.mrf.mxu0  ;;  %4393 = vmatprep.mubr.bf16.mxu1 %v5967_v40  ;;  %4488 = vmatpush3.bf16.msra.mxu0 %v740_v55  ;;  %v4835_v55 = vld [vmem:[%s7788_s4 + $0x60] sm:$0xff]  }
 0x16c   :  { %4489 = vmatprep.subr.bf16.mxu0 %v739_v27  ;;  %1353 = vperm.xlu0 %4794, %v5681_v57  }
 0x16d   :  { %v4179_v37 = vpop.f32.mrf.mxu0 }
 0x16e   :  { %v4180_v50 = vadd.f32 %v4179_v37, %v4178_v39  ;;  %1345 = vperm.xlu1 %4795, %v5699_v61  }
 0x16f   :  { %4490 = vmatpush3.bf16.msra.mxu0 %v739_v27 }
 0x170   :  { %v456_v44 = vpack.c.bf16 %v4180_v50, %v4177_v21  ;;  %4491 = vmatprep.subr.bf16.mxu0 %v738_v63  ;;  %v4834_v50 = vld [vmem:[%s7788_s4 + $0x58] sm:$0xff]   ;;  %1349 = vperm.xlu0 %4794, %v5705_v62   ;;  %v4847_v62 = vld [vmem:[%s7790_s6] sm:$0xff]  }
 0x172   :  { %4394 = vmatmul.mubr.bf16.gmra.mxu1 %v4832_v54  ;;  %4435 = vmatprep.subr.bf16.mxu1 %v456_v44 }
 0x173   :  { %4436 = vmatpush3.bf16.msra.mxu1 %v456_v44  ;;  %4397 = vmatprep.mubr.bf16.mxu1 %v4833_v58  ;;  %v4159_v44 = vadd.f32 %v5925_v19, %v5912_v15  ;;  %v4836_v15 = vld [vmem:[%s7788_s4 + $0x68] sm:$0xff]   ;;  %v451_v19 = vpack.c.bf16 %v4150_v51, %v4147_v12 }
 0x174   :  { %4437 = vmatprep.subr.bf16.mxu1 %v455_v1  ;;  %4492 = vmatpush3.bf16.msra.mxu0 %v738_v63 }
 0x175   :  { %v453_v14 = vpack.c.bf16 %v4162_v9, %v4159_v44  ;;  %1337 = vperm.xlu1 %4795, %v5717_v2   ;;  %1341 = vperm.xlu0 %4794, %v5723_v6  }
 0x177   :  { %4438 = vmatpush3.bf16.msra.mxu1 %v455_v1 }
 0x178   :  { %4439 = vmatprep.subr.bf16.mxu1 %v454_v49 }
 0x179   :  { %1329 = vperm.xlu1 %4795, %v5737_v13   ;;  %1333 = vperm.xlu0 %4794, %v5743_v17  }
 0x17a   :  { %4398 = vmatmul.mubr.bf16.gmra.mxu1 %v4834_v50 }
 0x17b   :  { %4440 = vmatpush3.bf16.msra.mxu1 %v454_v49  ;;  %4401 = vmatprep.mubr.bf16.mxu1 %v4835_v55 }
 0x17c   :  { %4441 = vmatprep.subr.bf16.mxu1 %v453_v14 }
 0x17d   :  { %1321 = vperm.xlu1 %4795, %v5759_v25   ;;  %1325 = vperm.xlu0 %4794, %v5769_v28  }
 0x17f   :  { %4442 = vmatpush3.bf16.msra.mxu1 %v453_v14 }
 0x180   :  { %4443 = vmatprep.subr.bf16.mxu1 %v452_v43 }
 0x181   :  { %1313 = vperm.xlu1 %4795, %v5785_v33   ;;  %1317 = vperm.xlu0 %4794, %v5795_v36   ;;  %v7900_v33 = vld [vmem:[#allocation8_spill] sm:$0xff] }
 0x182   :  { %4402 = vmatmul.mubr.bf16.gmra.mxu1 %v4836_v15 }
 0x183   :  { %4444 = vmatpush3.bf16.msra.mxu1 %v452_v43  ;;  %4405 = vmatprep.mubr.bf16.mxu1 %v4837_v5 }
 0x184   :  { %4445 = vmatprep.subr.bf16.mxu1 %v451_v19 }
 0x185   :  { %1305 = vperm.xlu1 %4795, %v5811_v41   ;;  %1309 = vperm.xlu0 %4794, %v7900_v33  }
 0x187   :  { %4446 = vmatpush3.bf16.msra.mxu1 %v451_v19 }
 0x188   :  { %4447 = vmatprep.subr.bf16.mxu1 %v5870_v3 }
 0x18a   :  { %4406 = vmatmul.mubr.bf16.gmra.mxu1 %v4838_v8 }
 0x18b   :  { %4448 = vmatpush3.bf16.msra.mxu1 %v5870_v3  ;;  %4451 = vmatprep.mubr.bf16.mxu1 %v5675_v56  ;;  %v4841_v56 = vld [vmem:[%s7789_s5 + $0x10] sm:$0xff]   ;;  %v4844_v3 = vld [vmem:[%s7789_s5 + $0x28] sm:$0xff]  }
 0x18c   :  { %4449 = vmatprep.subr.bf16.mxu1 %v5855_v18  ;;  %4423 = vmatprep.mubr.msk.bf16.mxu0 %vm1400_vm1, %v4841_v56 }
 0x18f   :  { %4450 = vmatpush3.bf16.msra.mxu1 %v5855_v18  ;;  %v4842_v18 = vld [vmem:[%s7789_s5 + $0x18] sm:$0xff]  }
 0x190   :  { %4424 = vmatmul.mubr.msk.bf16.gmra.mxu0 %vm1400_vm1, %v4842_v18 }
 0x191   :  { %4427 = vmatprep.mubr.msk.bf16.mxu0 %vm1400_vm1, %v4843_v52 }
 0x192   :  { %4452 = vmatmul.mubr.bf16.vlgmr.msra.gmra.mxu1 %v5910_v48  ;;  %v6057_v48 = vpop.permute.xlu0 %956 }
 0x193   :  { %4455 = vmatprep.mubr.bf16.mxu1 %v5918_v23 }
 0x196   :  { %v6062_v23 = vpop.permute.xlu0 %941 }
 0x198   :  { %4428 = vmatmul.mubr.msk.bf16.gmra.mxu0 %vm1400_vm1, %v4844_v3 }
 0x199   :  { %4431 = vmatprep.mubr.msk.bf16.mxu0 %vm1400_vm1, %v4845_v34 }
 0x19a   :  { %4456 = vmatmul.mubr.bf16.gmra.mxu1 %v5938_v24  ;;  %v6066_v24 = vpop.permute.xlu0 %1021 }
 0x19b   :  { %4459 = vmatprep.mubr.bf16.mxu1 %v5943_v46  ;;  %7891 = vst [vmem:[#allocation13_spill] sm:$0xff] %v6066_v24 }
 0x19e   :  { %v6070_v42 = vpop.permute.xlu0 %931 }
 0x1a0   :  { %4432 = vmatmul.mubr.msk.bf16.gmra.mxu0 %vm1400_vm1, %v4846_v22 }
 0x1a1   :  { %4493 = vmatprep.mubr.msk.bf16.mxu0 %vm1400_vm1, %v5897_v0  ;;  %v6059_v0 = vpop.permute.xlu1 %1036 }
 0x1a2   :  { %4460 = vmatmul.mubr.bf16.gmra.mxu1 %v5950_v38  ;;  %7890 = vst [vmem:[#allocation12_spill] sm:$0xff] %v6059_v0  ;;  %v6074_v35 = vpop.permute.xlu0 %1011 }
 0x1a3   :  { %4463 = vmatprep.mubr.bf16.mxu1 %v5955_v60  ;;  %7893 = vst [vmem:[#allocation15_spill] sm:$0xff] %v6074_v35 }
 0x1a6   :  { %v6078_v60 = vpop.permute.xlu0 %921 }
 0x1a8   :  { %4494 = vmatmul.mubr.msk.bf16.vlgmr.msra.gmra.mxu0 %vm1400_vm1, %v5923_v53  ;;  %v6064_v53 = vpop.permute.xlu1 %946 }
 0x1a9   :  { %4497 = vmatprep.mubr.msk.bf16.mxu0 %vm1400_vm1, %v4841_v56 }
 0x1aa   :  { %4464 = vmatmul.mubr.bf16.gmra.mxu1 %v5962_v20  ;;  %v6082_v20 = vpop.permute.xlu0 %1001 }
 0x1ab   :  { %4467 = vmatprep.mubr.bf16.mxu1 %v5967_v40 }
 0x1ac   :  { %v6068_v46 = vpop.permute.xlu1 %1026 }
 0x1ad   :  { %7892 = vst [vmem:[#allocation14_spill] sm:$0xff] %v6068_v46 }
 0x1ae   :  { %v6088_v39 = vpop.permute.xlu0 %911 }
 0x1b0   :  { %4498 = vmatmul.mubr.msk.bf16.gmra.mxu0 %vm1400_vm1, %v4842_v18  ;;  %v6072_v32 = vpop.permute.xlu1 %936 }
 0x1b1   :  { %4501 = vmatprep.mubr.msk.bf16.mxu0 %vm1400_vm1, %v4843_v52  ;;  %v7901_v52 = vld [vmem:[#allocation9_spill] sm:$0xff] }
 0x1b2   :  { %4468 = vmatmul.mubr.bf16.gmra.mxu1 %v4832_v54  ;;  %v6096_v54 = vpop.permute.xlu0 %991  ;;  %1297 = vperm.xlu1 %4795, %v7901_v52  }
 0x1b3   :  { %4471 = vmatprep.mubr.bf16.mxu1 %v4833_v58 }
 0x1b4   :  { %v6076_v38 = vpop.permute.xlu1 %1016 }
 0x1b5   :  { %7894 = vst [vmem:[#allocation16_spill] sm:$0xff] %v6076_v38 }
 0x1b6   :  { %v6108_v26 = vpop.permute.xlu0 %901 }
 0x1b8   :  { %4502 = vmatmul.mubr.msk.bf16.gmra.mxu0 %vm1400_vm1, %v4844_v3  ;;  %v6080_v30 = vpop.permute.xlu1 %926  ;;  %v7902_v3 = vld [vmem:[#allocation10_spill] sm:$0xff] }
 0x1b9   :  { %4505 = vmatprep.mubr.msk.bf16.mxu0 %vm1400_vm1, %v4845_v34  ;;  %1301 = vperm.xlu0 %4794, %v7902_v3  }
 0x1ba   :  { %4472 = vmatmul.mubr.bf16.gmra.mxu1 %v4834_v50  ;;  %v6122_v57 = vpop.permute.xlu0 %981 }
 0x1bb   :  { %4475 = vmatprep.mubr.bf16.mxu1 %v4835_v55 }
 0x1bc   :  { %v6084_v29 = vpop.permute.xlu1 %1006 }
 0x1bd   :  { %7895 = vst [vmem:[#allocation17_spill] sm:$0xff] %v6084_v29 }
 0x1be   :  { %v892_v14 = vpop.permute.xlu0 %891 }
 0x1c0   :  { %4506 = vmatmul.mubr.msk.bf16.gmra.mxu0 %vm1400_vm1, %v4846_v22  ;;  %v6090_v27 = vpop.permute.xlu1 %916 }
 0x1c1   :  { %4525 = vmatprep.mubr.bf16.mxu0 %v4847_v62 }
 0x1c2   :  { %4476 = vmatmul.mubr.bf16.gmra.mxu1 %v4836_v15  ;;  %v6139_v13 = vpop.permute.xlu0 %971 }
 0x1c3   :  { %4479 = vmatprep.mubr.bf16.mxu1 %v4837_v5  ;;  %7896 = vst [vmem:[#allocation18_spill] sm:$0xff] %v6139_v13 }
 0x1c4   :  { %v6100_v63 = vpop.permute.xlu1 %996 }
 0x1c6   :  { %v6167_v33 = vpop.permute.xlu0 %881 }
 0x1c8   :  { %v6114_v49 = vpop.permute.xlu1 %906 }
 0x1ca   :  { %4480 = vmatmul.mubr.bf16.gmra.mxu1 %v4838_v8 }
 0x1cb   :  { %4557 = vmatprep.mubr.bf16.mxu1 %v4847_v62 }
 0x1cc   :  { %v6126_v44 = vpop.permute.xlu1 %986 }
 0x1d0   :  { %v6135_v6 = vpop.permute.xlu1 %896 }
 0x1d4   :  { %v6142_v15 = vpop.permute.xlu1 %976 }
 0x1d5   :  { %7897 = vst [vmem:[#allocation19_spill] sm:$0xff] %v6142_v15 }
 0x212   :  { %v4379_v40 = vpop.f32.mrf.mxu1 }
 0x213   :  { %v6147_v28 = vadd.f32 %v4379_v40, %v892_v14 }
 0x214   :  { %v6086_v45 = vpop.f32.mrf.mxu1 }
 0x215   :  { %7899 = vst [vmem:[#allocation21_spill] sm:$0xff] %v6147_v28 }
 0x216   :  { %v4380_v37 = vpop.f32.mrf.mxu1 }
 0x217   :  { %v6145_v25 = vadd.f32 %v4380_v37, %v6135_v6 }
 0x218   :  { %v6092_v4 = vpop.f32.mrf.mxu1 }
 0x219   :  { %7898 = vst [vmem:[#allocation20_spill] sm:$0xff] %v6145_v25 }
 0x21a   :  { %v6094_v21 = vpop.f32.mrf.mxu1 }
 0x21c   :  { %v6098_v58 = vpop.f32.mrf.mxu1 }
 0x21e   :  { %v6102_v10 = vpop.f32.mrf.mxu1 }
 0x220   :  { %v6106_v1 = vpop.f32.mrf.mxu1 }
 0x222   :  { %v6110_v9 = vpop.f32.mrf.mxu1 }
 0x224   :  { %v6116_v50 = vpop.f32.mrf.mxu1 }
 0x226   :  { %v6118_v55 = vpop.f32.mrf.mxu1 }
 0x228   :  { %v6124_v59 = vpop.f32.mrf.mxu1 }
 0x22a   :  { %v4391_v31 = vpop.f32.mrf.mxu1 }
 0x22b   :  { %v6173_v52 = vadd.f32 %v4391_v31, %v6051_v7 }
 0x22c   :  { %v1217_v61 = vpop.f32.mrf.mxu1 }
 0x22d   :  { %7903 = vst [vmem:[#allocation8_spill] sm:$0xff] %v6173_v52 }
 0x22e   :  { %v4392_v2 = vpop.f32.mrf.mxu1 }
 0x22f   :  { %v6176_v3 = vadd.f32 %v4392_v2, %v6057_v48  ;;  %v6195_v2 = vpop.permute.xlu0 %961 }
 0x230   :  { %v1220_v47 = vpop.f32.mrf.mxu1 }
 0x231   :  { %7904 = vst [vmem:[#allocation9_spill] sm:$0xff] %v6176_v3  ;;  %v6193_v31 = vadd.f32 %v1220_v47, %v6064_v53 }
 0x232   :  { %v4395_v51 = vpop.f32.mrf.mxu1 }
 0x233   :  { %v1242_v43 = vadd.f32 %v4395_v51, %v6139_v13  ;;  %7906 = vst [vmem:[#allocation22_spill] sm:$0xff] %v6193_v31 }
 0x234   :  { %v1233_v17 = vpop.f32.mrf.mxu1 }
 0x235   :  { %v1782_v19 = vmul.f32 %v1242_v43, %v6147_v28 }
 0x236   :  { %v4396_v5 = vpop.f32.mrf.mxu1 }
 0x237   :  { %v6150_v12 = vadd.f32 %v4396_v5, %v6142_v15  ;;  %v6185_v15 = vadd.f32 %v1217_v61, %v6062_v23 }
 0x238   :  { %v1236_v36 = vpop.f32.mrf.mxu1 }
 0x239   :  { %v1783_v8 = vmul.f32 %v6150_v12, %v6145_v25  ;;  %7905 = vst [vmem:[#allocation10_spill] sm:$0xff] %v6185_v15 }
 0x23a   :  { %v6157_v56 = vpop.f32.mrf.mxu1 }
 0x23b   :  { %v6159_v18 = vpack.c.bf16 %v1783_v8, %v1782_v19 }
 0x23c   :  { %v6163_v34 = vpop.f32.mrf.mxu1 }
 0x23e   :  { %v4400_v22 = vpop.f32.mrf.mxu1 }
 0x240   :  { %v6165_v41 = vpop.f32.mrf.mxu1 }
 0x242   :  { %v4403_v40 = vpop.f32.mrf.mxu1 }
 0x244   :  { %v1265_v37 = vpop.f32.mrf.mxu1 }
 0x246   :  { %v4404_v11 = vpop.f32.mrf.mxu1 }
 0x247   :  { %v6188_v13 = vadd.f32 %v4404_v11, %v6076_v38  ;;  %v6206_v11 = vadd.f32 %v6118_v55, %v6072_v32  ;;  %v6222_v55 = vadd.f32 %v1233_v17, %v6195_v2  ;;  %v6237_v17 = vadd.f32 %v6124_v59, %v6080_v30 }
 0x248   :  { %v1268_v62 = vpop.f32.mrf.mxu1  ;;  %v1261_v59 = vadd.f32 %v4400_v22, %v6100_v63 }
 0x249   :  { %7907 = vst [vmem:[#allocation23_spill] sm:$0xff] %v6206_v11  ;;  %7908 = vst [vmem:[#allocation24_spill] sm:$0xff] %v6237_v17 }
 0x24a   :  { %v4407_v51 = vpop.f32.mrf.mxu1 }
 0x24b   :  { %v6170_v19 = vadd.f32 %v4407_v51, %v6055_v16  ;;  %v6190_v16 = vpop.permute.xlu1 %886 }
 0x24c   :  { %v1281_v5 = vpop.f32.mrf.mxu1 }
 0x24d   :  { %v6179_v25 = vadd.f32 %v1281_v5, %v6066_v24  ;;  %v1794_v5 = vmul.f32 %v6170_v19, %v6173_v52 }
 0x24e   :  { %v4408_v8 = vpop.f32.mrf.mxu1 }
 0x24f   :  { %v6182_v28 = vadd.f32 %v4408_v8, %v6059_v0  ;;  %v6209_v0 = vadd.f32 %v4403_v40, %v6074_v35  ;;  %v1792_v24 = vmul.f32 %v6179_v25, %v6185_v15  ;;  %v1791_v40 = vmul.f32 %v6188_v13, %v6206_v11  ;;  %v6226_v35 = vpop.permute.xlu1 %966 }
 0x250   :  { %v1284_v51 = vpop.f32.mrf.mxu1  ;;  %v6229_v15 = vadd.f32 %v1268_v62, %v6084_v29 }
 0x251   :  { %v1795_v8 = vmul.f32 %v6182_v28, %v6176_v3  ;;  %v6202_v61 = vadd.f32 %v1284_v51, %v6068_v46  ;;  %v6219_v51 = vadd.f32 %v6110_v9, %v6070_v42 }
 0x252   :  { %v4453_v47 = vpop.f32.mrf.mxu1 }
 0x253   :  { %v1793_v52 = vmul.f32 %v6202_v61, %v6193_v31  ;;  %v6215_v38 = vadd.f32 %v4453_v47, %v892_v14  ;;  %v1803_v3 = vpack.c.bf16 %v1795_v8, %v1794_v5  ;;  %v1790_v47 = vmul.f32 %v6209_v0, %v6219_v51 }
 0x254   :  { %v1556_v46 = vpop.f32.mrf.mxu1  ;;  %v1266_v31 = vadd.f32 %v1265_v37, %v6082_v20 }
 0x255   :  { %v2991_v14 = vmul.f32 %v6215_v38, %v1242_v43  ;;  %v6233_v5 = vadd.f32 %v1556_v46, %v6167_v33  ;;  %4509 = vmatprep.subr.bf16.mxu0 %v1803_v3  ;;  %v1802_v9 = vpack.c.bf16 %v1793_v52, %v1792_v24  ;;  %v6249_v24 = vadd.f32 %v6116_v50, %v6078_v60 }
 0x256   :  { %v4454_v8 = vpop.f32.mrf.mxu1  ;;  %4510 = vmatpush3.bf16.msra.mxu0 %v1803_v3  ;;  %v1237_v46 = vadd.f32 %v1236_v36, %v6226_v35  ;;  %v1789_v3 = vmul.f32 %v6229_v15, %v6237_v17  ;;  %v1258_v50 = vadd.f32 %v6157_v56, %v6096_v54 }
 0x257   :  { %v2989_v62 = vmul.f32 %v6233_v5, %v6222_v55  ;;  %v6245_v43 = vadd.f32 %v4454_v8, %v6135_v6  ;;  %4511 = vmatprep.subr.bf16.mxu0 %v1802_v9  ;;  %v1801_v6 = vpack.c.bf16 %v1791_v40, %v1790_v47  ;;  %v6262_v8 = vadd.f32 %v6102_v10, %v6090_v27 }
 0x258   :  { %v1559_v52 = vpop.f32.mrf.mxu1  ;;  %v1788_v22 = vmul.f32 %v1266_v31, %v6249_v24  ;;  %v6275_v40 = vadd.f32 %v6094_v21, %v6088_v39  ;;  %v1250_v10 = vadd.f32 %v6163_v34, %v6122_v57 }
 0x259   :  { %v2992_v37 = vmul.f32 %v6245_v43, %v6150_v12  ;;  %v6258_v29 = vadd.f32 %v1559_v52, %v6190_v16  ;;  %v1787_v56 = vmul.f32 %v1261_v59, %v6262_v8 }
 0x25a   :  { %v4457_v36 = vpop.f32.mrf.mxu1  ;;  %4512 = vmatpush3.bf16.msra.mxu0 %v1802_v9  ;;  %v1253_v9 = vadd.f32 %v6165_v41, %v6126_v44  ;;  %v1786_v21 = vmul.f32 %v1258_v50, %v6275_v40 }
 0x25b   :  { %v2990_v17 = vmul.f32 %v6258_v29, %v1237_v46  ;;  %v6269_v11 = vadd.f32 %v4457_v36, %v6088_v39  ;;  %4513 = vmatprep.subr.bf16.mxu0 %v1801_v6  ;;  %v6271_v12 = vpack.c.bf16 %v2992_v37, %v2991_v14  ;;  %v1800_v14 = vpack.c.bf16 %v1789_v3, %v1788_v22 }
 0x25c   :  { %v1572_v47 = vpop.f32.mrf.mxu1  ;;  %v6290_v39 = vadd.f32 %v6106_v1, %v6114_v49 }
 0x25d   :  { %7909 = vst [vmem:[#allocation25_spill] sm:$0xff] %v6271_v12  ;;  %v2995_v52 = vmul.f32 %v6269_v11, %v1258_v50  ;;  %v6284_v36 = vadd.f32 %v1572_v47, %v6108_v26  ;;  %v6286_v37 = vpack.c.bf16 %v2990_v17, %v2989_v62  ;;  %v6299_v47 = vadd.f32 %v6098_v58, %v6108_v26 }
 0x25e   :  { %v4458_v12 = vpop.f32.mrf.mxu1  ;;  %4514 = vmatpush3.bf16.msra.mxu0 %v1801_v6  ;;  %v1785_v62 = vmul.f32 %v1253_v9, %v6290_v39  ;;  %v1799_v6 = vpack.c.bf16 %v1787_v56, %v1786_v21 }
 0x25f   :  { %7910 = vst [vmem:[#allocation26_spill] sm:$0xff] %v6286_v37  ;;  %v2993_v34 = vmul.f32 %v6284_v36, %v1250_v10  ;;  %v6295_v41 = vadd.f32 %v4458_v12, %v6090_v27  ;;  %4515 = vmatprep.subr.bf16.mxu0 %v1800_v14  ;;  %v1784_v22 = vmul.f32 %v1250_v10, %v6299_v47 }
 0x260   :  { %v1575_v17 = vpop.f32.mrf.mxu1  ;;  %v1173_v10 = vadd.f32 %v6092_v4, %v6190_v16 }
 0x261   :  { %v2996_v3 = vmul.f32 %v6295_v41, %v1261_v59  ;;  %v6304_v1 = vadd.f32 %v1575_v17, %v6114_v49  ;;  %v1798_v56 = vpack.c.bf16 %v1785_v62, %v1784_v22 }
 0x262   :  { %v4461_v50 = vpop.f32.mrf.mxu1  ;;  %4516 = vmatpush3.bf16.msra.mxu0 %v1800_v14 }
 0x263   :  { %v2994_v27 = vmul.f32 %v6304_v1, %v1253_v9  ;;  %v6309_v12 = vadd.f32 %v4461_v50, %v6070_v42  ;;  %4517 = vmatprep.subr.bf16.mxu0 %v1799_v6  ;;  %v6311_v58 = vpack.c.bf16 %v2996_v3, %v2995_v52  ;;  %v7915_v50 = vld [vmem:[#allocation18_spill] sm:$0xff] }
 0x264   :  { %v1588_v26 = vpop.f32.mrf.mxu1 }
 0x265   :  { %7911 = vst [vmem:[#allocation27_spill] sm:$0xff] %v6311_v58  ;;  %v2999_v59 = vmul.f32 %v6309_v12, %v6209_v0  ;;  %v6316_v49 = vadd.f32 %v1588_v26, %v6078_v60  ;;  %v6318_v21 = vpack.c.bf16 %v2994_v27, %v2993_v34  ;;  %v1170_v0 = vadd.f32 %v6086_v45, %v6167_v33 }
 0x266   :  { %v4462_v14 = vpop.f32.mrf.mxu1  ;;  %4518 = vmatpush3.bf16.msra.mxu0 %v1799_v6  ;;  %v1781_v60 = vmul.f32 %v1237_v46, %v1173_v10  ;;  %v6363_v6 = vld [vmem:[%s7790_s6 + $0x8] sm:$0xff]  }
 0x267   :  { %7912 = vst [vmem:[#allocation28_spill] sm:$0xff] %v6318_v21  ;;  %v2997_v42 = vmul.f32 %v6316_v49, %v1266_v31  ;;  %v6324_v9 = vadd.f32 %v4462_v14, %v6072_v32  ;;  %4519 = vmatprep.subr.bf16.mxu0 %v1798_v56  ;;  %v1780_v16 = vmul.f32 %v6222_v55, %v1170_v0 }
 0x268   :  { %v1591_v52 = vpop.f32.mrf.mxu1 }
 0x269   :  { %v3000_v34 = vmul.f32 %v6324_v9, %v6188_v13  ;;  %v6331_v17 = vadd.f32 %v1591_v52, %v6080_v30  ;;  %v1796_v31 = vpack.c.bf16 %v1781_v60, %v1780_v16  ;;  %v7919_v60 = vld [vmem:[#allocation21_spill] sm:$0xff] }
 0x26a   :  { %v4465_v62 = vpop.f32.mrf.mxu1  ;;  %4520 = vmatpush3.bf16.msra.mxu0 %v1798_v56 }
 0x26b   :  { %v2998_v32 = vmul.f32 %v6331_v17, %v6229_v15  ;;  %v6337_v4 = vadd.f32 %v4465_v62, %v6051_v7  ;;  %4521 = vmatprep.subr.bf16.mxu0 %v6159_v18  ;;  %v6340_v45 = vpack.c.bf16 %v3000_v34, %v2999_v59  ;;  %v7920_v62 = vld [vmem:[#allocation20_spill] sm:$0xff] }
 0x26c   :  { %v1604_v33 = vpop.f32.mrf.mxu1 }
 0x26d   :  { %7913 = vst [vmem:[#allocation29_spill] sm:$0xff] %v6340_v45  ;;  %v3003_v13 = vmul.f32 %v6337_v4, %v6170_v19  ;;  %v6345_v30 = vadd.f32 %v1604_v33, %v6062_v23  ;;  %v6347_v46 = vpack.c.bf16 %v2998_v32, %v2997_v42  ;;  %v7918_v42 = vld [vmem:[#allocation19_spill] sm:$0xff]  ;;  %v6390_v32 = vld [vmem:[%s7790_s6 + $0x18] sm:$0xff]  }
 0x26e   :  { %v4466_v55 = vpop.f32.mrf.mxu1  ;;  %4522 = vmatpush3.bf16.msra.mxu0 %v6159_v18 }
 0x26f   :  { %7914 = vst [vmem:[#allocation30_spill] sm:$0xff] %v6347_v46  ;;  %v3001_v7 = vmul.f32 %v6345_v30, %v6179_v25  ;;  %v6353_v15 = vadd.f32 %v4466_v55, %v6057_v48  ;;  %4523 = vmatprep.subr.bf16.mxu0 %v1796_v31  ;;  %v6368_v48 = vld [vmem:[%s7790_s6 + $0x10] sm:$0xff]  }
 0x270   :  { %v1607_v3 = vpop.f32.mrf.mxu1 }
 0x271   :  { %v3004_v19 = vmul.f32 %v6353_v15, %v6182_v28  ;;  %v6358_v23 = vadd.f32 %v1607_v3, %v6064_v53 }
 0x272   :  { %v4469_v18 = vpop.f32.mrf.mxu1  ;;  %4524 = vmatpush3.bf16.msra.mxu0 %v1796_v31 }
 0x273   :  { %v3002_v25 = vmul.f32 %v6358_v23, %v6202_v61  ;;  %v1629_v28 = vadd.f32 %v4469_v18, %v7915_v50  ;;  %v6373_v22 = vpack.c.bf16 %v3004_v19, %v3003_v13 }
 0x274   :  { %v1620_v53 = vpop.f32.mrf.mxu1 }
 0x275   :  { %7916 = vst [vmem:[#allocation18_spill] sm:$0xff] %v6373_v22  ;;  %v3112_v27 = vmul.f32 %v1629_v28, %v6215_v38  ;;  %v1621_v26 = vadd.f32 %v1620_v53, %v6195_v2  ;;  %4526 = vmatmul.mubr.bf16.vlgmr.msra.gmra.mxu0 %v6363_v6  ;;  %v6378_v59 = vpack.c.bf16 %v3002_v25, %v3001_v7 }
 0x276   :  { %v4470_v56 = vpop.f32.mrf.mxu1  ;;  %4529 = vmatprep.mubr.bf16.mxu0 %v6368_v48  ;;  %v1951_v34 = vmul.f32 %v1629_v28, %v7919_v60 }
 0x277   :  { %7917 = vst [vmem:[#allocation31_spill] sm:$0xff] %v6378_v59  ;;  %v3110_v14 = vmul.f32 %v1621_v26, %v6233_v5  ;;  %v1632_v61 = vadd.f32 %v4470_v56, %v7918_v42  ;;  %v1949_v33 = vmul.f32 %v1621_v26, %v1170_v0  ;;  %v6395_v5 = vld [vmem:[%s7790_s6 + $0x20] sm:$0xff]  }
 0x278   :  { %v1623_v52 = vpop.f32.mrf.mxu1 }
 0x279   :  { %v1952_v16 = vmul.f32 %v1632_v61, %v7920_v62  ;;  %v3113_v38 = vmul.f32 %v1632_v61, %v6245_v43  ;;  %v1624_v2 = vadd.f32 %v1623_v52, %v6226_v35 }
 0x27a   :  { %v4473_v13 = vpop.f32.mrf.mxu1 }
 0x27b   :  { %v1950_v31 = vmul.f32 %v1624_v2, %v1173_v10  ;;  %v3111_v55 = vmul.f32 %v1624_v2, %v6258_v29  ;;  %v1645_v7 = vadd.f32 %v4473_v13, %v6096_v54  ;;  %v6399_v43 = vpack.c.bf16 %v1952_v16, %v1951_v34  ;;  %v7927_v2 = vld [vmem:[#allocation23_spill] sm:$0xff] }
 0x27c   :  { %v1636_v35 = vpop.f32.mrf.mxu1  ;;  %v6401_v3 = vpack.c.bf16 %v3113_v38, %v3112_v27  ;;  %v6420_v27 = vld [vmem:[%s7790_s6 + $0x28] sm:$0xff]  }
 0x27d   :  { %v3116_v19 = vmul.f32 %v1645_v7, %v6269_v11  ;;  %v1637_v0 = vadd.f32 %v1636_v35, %v6122_v57  ;;  %v6405_v18 = vpack.c.bf16 %v1950_v31, %v1949_v33  ;;  %4530 = vmatmul.mubr.bf16.gmra.mxu0 %v6390_v32  ;;  %v6409_v10 = vpack.c.bf16 %v3111_v55, %v3110_v14  ;;  %v4854_v31 = vld [vmem:[%s7790_s6 + $0x38] sm:$0xff]  }
 0x27e   :  { %7921 = vst [vmem:[#allocation19_spill] sm:$0xff] %v6401_v3  ;;  %v4474_v25 = vpop.f32.mrf.mxu1  ;;  %4533 = vmatprep.mubr.bf16.mxu0 %v6395_v5  ;;  %v1955_v28 = vmul.f32 %v1645_v7, %v6275_v40  ;;  %v7929_v35 = vld [vmem:[#allocation24_spill] sm:$0xff] }
 0x27f   :  { %7922 = vst [vmem:[#allocation21_spill] sm:$0xff] %v6409_v10  ;;  %v3114_v29 = vmul.f32 %v1637_v0, %v6284_v36  ;;  %v1648_v54 = vadd.f32 %v4474_v25, %v6100_v63  ;;  %v1953_v26 = vmul.f32 %v1637_v0, %v6299_v47  ;;  %v6426_v63 = vld [vmem:[%s7790_s6 + $0x30] sm:$0xff]  }
 0x280   :  { %v1639_v50 = vpop.f32.mrf.mxu1  ;;  %v7923_v36 = vld [vmem:[#allocation15_spill] sm:$0xff] }
 0x281   :  { %v1956_v11 = vmul.f32 %v1648_v54, %v6262_v8  ;;  %v3117_v57 = vmul.f32 %v1648_v54, %v6295_v41  ;;  %v1640_v53 = vadd.f32 %v1639_v50, %v6126_v44  ;;  %v7930_v0 = vld [vmem:[#allocation11_spill] sm:$0xff]  ;;  %v7932_v50 = vld [vmem:[#allocation13_spill] sm:$0xff] }
 0x282   :  { %v4477_v56 = vpop.f32.mrf.mxu1 }
 0x283   :  { %v1954_v40 = vmul.f32 %v1640_v53, %v6290_v39  ;;  %v3115_v8 = vmul.f32 %v1640_v53, %v6304_v1  ;;  %v1661_v41 = vadd.f32 %v4477_v56, %v7923_v36  ;;  %v1968_v44 = vpack.c.bf16 %v1956_v11, %v1955_v28  ;;  %v7926_v1 = vld [vmem:[#allocation16_spill] sm:$0xff]  ;;  %v7936_v36 = vld [vmem:[#allocation9_spill] sm:$0xff] }
 0x284   :  { %v1652_v14 = vpop.f32.mrf.mxu1  ;;  %v6431_v42 = vpack.c.bf16 %v3117_v57, %v3116_v19 }
 0x285   :  { %v3120_v61 = vmul.f32 %v1661_v41, %v6309_v12  ;;  %v1653_v47 = vadd.f32 %v1652_v14, %v6082_v20  ;;  %v1967_v52 = vpack.c.bf16 %v1954_v40, %v1953_v26  ;;  %4534 = vmatmul.mubr.bf16.gmra.mxu0 %v6420_v27  ;;  %v6437_v34 = vpack.c.bf16 %v3115_v8, %v3114_v29  ;;  %v7928_v20 = vld [vmem:[#allocation17_spill] sm:$0xff]  ;;  %v7934_v26 = vld [vmem:[#allocation12_spill] sm:$0xff] }
 0x286   :  { %7924 = vst [vmem:[#allocation20_spill] sm:$0xff] %v6431_v42  ;;  %v4478_v60 = vpop.f32.mrf.mxu1  ;;  %4537 = vmatprep.mubr.bf16.mxu0 %v6426_v63  ;;  %v1959_v38 = vmul.f32 %v1661_v41, %v6219_v51  ;;  %v7935_v40 = vld [vmem:[#allocation8_spill] sm:$0xff]  ;;  %v5192_v42 = vmov 2  }
 0x287   :  { %7925 = vst [vmem:[#allocation15_spill] sm:$0xff] %v6437_v34  ;;  %v3118_v39 = vmul.f32 %v1653_v47, %v6316_v49  ;;  %v1664_v62 = vadd.f32 %v4478_v60, %v7926_v1  ;;  %v1957_v55 = vmul.f32 %v1653_v47, %v6249_v24  ;;  %v7938_v47 = vld [vmem:[#allocation10_spill] sm:$0xff]  ;;  %4796 = vset.pattern.permute.xlu1 %v5192_v42 }
 0x288   :  { %v1655_v16 = vpop.f32.mrf.mxu1  ;;  %v7939_v1 = vld [vmem:[#allocation22_spill] sm:$0xff]  ;;  %4797 = vset.pattern.permute.xlu0 %v5192_v42  ;;  %v5084_v42 = vld [vmem:[%s7794_s10 + $0x10] sm:$0xff] }
 0x289   :  { %v1960_v33 = vmul.f32 %v1664_v62, %v7927_v2  ;;  %v3121_v12 = vmul.f32 %v1664_v62, %v6324_v9  ;;  %v1656_v13 = vadd.f32 %v1655_v16, %v7928_v20 }
 0x28a   :  { %v4481_v7 = vpop.f32.mrf.mxu1 }
 0x28b   :  { %v1958_v49 = vmul.f32 %v1656_v13, %v7929_v35  ;;  %v3119_v19 = vmul.f32 %v1656_v13, %v6331_v17  ;;  %v1677_v25 = vadd.f32 %v4481_v7, %v7930_v0  ;;  %v1970_v51 = vpack.c.bf16 %v1960_v33, %v1959_v38 }
 0x28c   :  { %v1668_v29 = vpop.f32.mrf.mxu1  ;;  %v6452_v54 = vpack.c.bf16 %v3121_v12, %v3120_v61  ;;  %v7937_v61 = vld [vmem:[#allocation14_spill] sm:$0xff] }
 0x28d   :  { %v3124_v9 = vmul.f32 %v1677_v25, %v6337_v4  ;;  %v1669_v28 = vadd.f32 %v1668_v29, %v7932_v50  ;;  %v1969_v11 = vpack.c.bf16 %v1958_v49, %v1957_v55  ;;  %4538 = vmatmul.mubr.bf16.gmra.mxu0 %v4854_v31  ;;  %v6456_v53 = vpack.c.bf16 %v3119_v19, %v3118_v39 }
 0x28e   :  { %7931 = vst [vmem:[#allocation16_spill] sm:$0xff] %v6452_v54  ;;  %v4482_v57 = vpop.f32.mrf.mxu1  ;;  %v1963_v8 = vmul.f32 %v1677_v25, %v7935_v40  ;;  %v5082_v54 = vld [vmem:[%s7794_s10] sm:$0xff] }
 0x28f   :  { %7933 = vst [vmem:[#allocation23_spill] sm:$0xff] %v6456_v53  ;;  %v3122_v24 = vmul.f32 %v1669_v28, %v6345_v30  ;;  %v1680_v56 = vadd.f32 %v4482_v57, %v7934_v26  ;;  %v1961_v60 = vmul.f32 %v1669_v28, %v7938_v47  ;;  %2287 = vperm.xlu1 %4796, %v5082_v54   ;;  %v5085_v54 = vld [vmem:[%s7794_s10 + $0x20] sm:$0xff] }
 0x290   :  { %v1671_v17 = vpop.f32.mrf.mxu1 }
 0x291   :  { %v1964_v41 = vmul.f32 %v1680_v56, %v7936_v36  ;;  %v3125_v14 = vmul.f32 %v1680_v56, %v6353_v15  ;;  %v1672_v4 = vadd.f32 %v1671_v17, %v7937_v61  ;;  %v7942_v15 = vmov 0  }
 0x293   :  { %v1962_v62 = vmul.f32 %v1672_v4, %v7939_v1  ;;  %v3123_v39 = vmul.f32 %v1672_v4, %v6358_v23  ;;  %v1972_v16 = vpack.c.bf16 %v1964_v41, %v1963_v8  ;;  %v6467_v38 = vpack.c.bf16 %v3125_v14, %v3124_v9  ;;  %v6482_v23 = vpop.f32.mrf.mxu0  ;;  %2295 = vperm.xlu1 %4796, %v5084_v42   ;;  %v5086_v42 = vld [vmem:[%s7794_s10 + $0x18] sm:$0xff] }
 0x294   :  { %7943 = vst [vmem:[#allocation11_spill] sm:$0xff] %v6482_v23 }
 0x295   :  { %7940 = vst [vmem:[#allocation17_spill] sm:$0xff] %v6467_v38  ;;  %4541 = vmatprep.subr.bf16.mxu1 %v1972_v16  ;;  %v1971_v30 = vpack.c.bf16 %v1962_v62, %v1961_v60  ;;  %v6469_v2 = vpack.c.bf16 %v3123_v39, %v3122_v24 }
 0x296   :  { %4542 = vmatpush3.bf16.msra.mxu1 %v1972_v16 }
 0x297   :  { %7941 = vst [vmem:[#allocation24_spill] sm:$0xff] %v6469_v2  ;;  %4543 = vmatprep.subr.bf16.mxu1 %v1971_v30  ;;  %v5083_v2 = vld [vmem:[%s7794_s10 + $0x8] sm:$0xff]  ;;  %2299 = vperm.xlu1 %4796, %v5086_v42  }
 0x298   :  { %2291 = vperm.xlu0 %4797, %v5083_v2  }
 0x29a   :  { %4544 = vmatpush3.bf16.msra.mxu1 %v1971_v30 }
 0x29b   :  { %4545 = vmatprep.subr.bf16.mxu1 %v1970_v51 }
 0x29c   :  { %2303 = vperm.xlu0 %4797, %v5085_v54   ;;  %v5087_v54 = vld [vmem:[%s7794_s10 + $0x30] sm:$0xff] }
 0x29e   :  { %4546 = vmatpush3.bf16.msra.mxu1 %v1970_v51  ;;  %v7820_v51 = vmov 0.0  }
 0x29f   :  { %4547 = vmatprep.subr.bf16.mxu1 %v1969_v11  ;;  %4573 = vmatprep.subr.bf16.mxu0 %v7820_v51 }
 0x2a0   :  { %4589 = vmatprep.mubr.msk.bf16.mxu0 %vm5191_vm2, %v7820_v51  ;;  %2311 = vperm.xlu0 %4797, %v5087_v54   ;;  %v5088_v54 = vld [vmem:[%s7794_s10 + $0x28] sm:$0xff] }
 0x2a1   :  { %2307 = vperm.xlu1 %4796, %v5088_v54   ;;  %v5090_v54 = vld [vmem:[%s7794_s10 + $0x38] sm:$0xff] }
 0x2a2   :  { %4548 = vmatpush3.bf16.msra.mxu1 %v1969_v11 }
 0x2a3   :  { %4549 = vmatprep.subr.bf16.mxu1 %v1968_v44 }
 0x2a5   :  { %2315 = vperm.xlu1 %4796, %v5090_v54  }
 0x2a6   :  { %4550 = vmatpush3.bf16.msra.mxu1 %v1968_v44 }
 0x2a7   :  { %4551 = vmatprep.subr.bf16.mxu1 %v1967_v52 }
 0x2aa   :  { %4552 = vmatpush3.bf16.msra.mxu1 %v1967_v52 }
 0x2ab   :  { %4553 = vmatprep.subr.bf16.mxu1 %v6399_v43 }
 0x2ae   :  { %4554 = vmatpush3.bf16.msra.mxu1 %v6399_v43  ;;  %v6484_v43 = vpop.f32.mrf.mxu0 }
 0x2af   :  { %4555 = vmatprep.subr.bf16.mxu1 %v6405_v18  ;;  %7944 = vst [vmem:[#allocation13_spill] sm:$0xff] %v6484_v43 }
 0x2b2   :  { %4556 = vmatpush3.bf16.msra.mxu1 %v6405_v18  ;;  %v6486_v18 = vpop.f32.mrf.mxu0 }
 0x2b3   :  { %7945 = vst [vmem:[#allocation12_spill] sm:$0xff] %v6486_v18 }
 0x2b5   :  { %4558 = vmatmul.mubr.bf16.vlgmr.msra.gmra.mxu1 %v6363_v6  ;;  %v6488_v6 = vpop.f32.mrf.mxu0 }
 0x2b6   :  { %4561 = vmatprep.mubr.bf16.mxu1 %v6368_v48  ;;  %7946 = vst [vmem:[#allocation8_spill] sm:$0xff] %v6488_v6 }
 0x2b7   :  { %v6490_v48 = vpop.f32.mrf.mxu0 }
 0x2b8   :  { %7947 = vst [vmem:[#allocation9_spill] sm:$0xff] %v6490_v48 }
 0x2bd   :  { %4562 = vmatmul.mubr.bf16.gmra.mxu1 %v6390_v32  ;;  %v6492_v32 = vpop.f32.mrf.mxu0 }
 0x2be   :  { %4565 = vmatprep.mubr.bf16.mxu1 %v6395_v5  ;;  %7948 = vst [vmem:[#allocation14_spill] sm:$0xff] %v6492_v32 }
 0x2bf   :  { %v6494_v5 = vpop.f32.mrf.mxu0 }
 0x2c5   :  { %4566 = vmatmul.mubr.bf16.gmra.mxu1 %v6420_v27  ;;  %v6496_v27 = vpop.f32.mrf.mxu0 }
 0x2c6   :  { %4569 = vmatprep.mubr.bf16.mxu1 %v6426_v63  ;;  %7949 = vst [vmem:[#allocation10_spill] sm:$0xff] %v6496_v27 }
 0x2c7   :  { %v6498_v63 = vpop.f32.mrf.mxu0 }
 0x2c9   :  { %v6500_v44 = vpop.f32.mrf.mxu0 }
 0x2cb   :  { %v6502_v52 = vpop.f32.mrf.mxu0 }
 0x2cd   :  { %4570 = vmatmul.mubr.bf16.gmra.mxu1 %v4854_v31  ;;  %v6504_v33 = vpop.f32.mrf.mxu0 }
 0x2ce   :  { %2708 = vmatprep.mubr.bf16.mxu1 %v7942_v15 }
 0x2cf   :  { %v6506_v12 = vpop.f32.mrf.mxu0 }
 0x2d1   :  { %v6508_v20 = vpop.f32.mrf.mxu0 }
 0x2d3   :  { %v6510_v13 = vpop.f32.mrf.mxu0 }
 0x2d5   :  { %v6512_v31 = vpop.f32.mrf.mxu0 }
 0x2d7   :  { %v6514_v55 = vpop.f32.mrf.mxu0 }
 0x2d8   :  { %7950 = vst [vmem:[#allocation22_spill] sm:$0xff] %v6514_v55 }
 0x2d9   :  { %v6516_v7 = vpop.f32.mrf.mxu0 }
 0x2da   :  { %7951 = vst [vmem:[#allocation32_spill] sm:$0xff] %v6516_v7 }
 0x2db   :  { %v6518_v35 = vpop.f32.mrf.mxu0 }
 0x2dc   :  { %7952 = vst [vmem:[#allocation33_spill] sm:$0xff] %v6518_v35 }
 0x2dd   :  { %v6520_v49 = vpop.f32.mrf.mxu0 }
 0x2de   :  { %7953 = vst [vmem:[#allocation34_spill] sm:$0xff] %v6520_v49 }
 0x2df   :  { %v6522_v19 = vpop.f32.mrf.mxu0 }
 0x2e0   :  { %7954 = vst [vmem:[#allocation35_spill] sm:$0xff] %v6522_v19 }
 0x2e1   :  { %v6524_v0 = vpop.f32.mrf.mxu0 }
 0x2e2   :  { %7955 = vst [vmem:[#allocation36_spill] sm:$0xff] %v6524_v0 }
 0x2e3   :  { %v6526_v25 = vpop.f32.mrf.mxu0 }
 0x2e5   :  { %v6529_v29 = vpop.f32.mrf.mxu0 }
 0x2e6   :  { %7956 = vst [vmem:[#allocation37_spill] sm:$0xff] %v6529_v29 }
 0x2e7   :  { %v6531_v9 = vpop.f32.mrf.mxu0 }
 0x2e9   :  { %v6533_v50 = vpop.f32.mrf.mxu0 }
 0x2eb   :  { %v6535_v28 = vpop.f32.mrf.mxu0 }
 0x2ed   :  { %v6537_v11 = vpop.f32.mrf.mxu0 }
 0x2ef   :  { %v6539_v57 = vpop.f32.mrf.mxu0 }
 0x2f1   :  { %v6541_v24 = vpop.f32.mrf.mxu0 }
 0x2f3   :  { %v6543_v26 = vpop.f32.mrf.mxu0 }
 0x2f5   :  { %v6545_v56 = vpop.f32.mrf.mxu0 }
 0x335   :  { %v4527_v17 = vpop.f32.mrf.mxu0 }
 0x337   :  { %v6547_v40 = vpop.f32.mrf.mxu0 }
 0x339   :  { %v6549_v8 = vpop.f32.mrf.mxu0 }
 0x33b   :  { %v6553_v36 = vpop.f32.mrf.mxu0 }
 0x33d   :  { %v6555_v41 = vpop.f32.mrf.mxu0 }
 0x33f   :  { %v6557_v14 = vpop.f32.mrf.mxu0 }
 0x341   :  { %v6559_v61 = vpop.f32.mrf.mxu0 }
 0x343   :  { %v6563_v60 = vpop.f32.mrf.mxu0 }
 0x345   :  { %v6567_v39 = vpop.f32.mrf.mxu0 }
 0x347   :  { %v6573_v51 = vpop.f32.mrf.mxu0 }
 0x349   :  { %v6579_v34 = vpop.f32.mrf.mxu0 }
 0x34b   :  { %v6589_v15 = vpop.f32.mrf.mxu0 }
 0x34d   :  { %v4539_v45 = vpop.f32.mrf.mxu0 }
 0x34f   :  { %v1934_v23 = vpop.f32.mrf.mxu0 }
 0x375   :  { %v4559_v4 = vpop.f32.mrf.mxu1 }
 0x376   :  { %v2072_v37 = vmax.f32 %v4527_v17, %v4559_v4 }
 0x377   :  { %v6561_v47 = vpop.f32.mrf.mxu1 }
 0x378   :  { %v6601_v2 = vmax.f32 %v6547_v40, %v6561_v47  ;;  %v2088_v59 = vsub.f32 %v4527_v17, %v2072_v37  ;;  %v2136_v7 = vsub.f32 %v4559_v4, %v2072_v37  ;;  %v5089_v37 = vld [vmem:[%s7794_s10 + $0x40] sm:$0xff] }
 0x379   :  { %v4560_v1 = vpop.f32.mrf.mxu1  ;;  %2319 = vperm.xlu0 %4797, %v5089_v37  }
 0x37a   :  { %v2073_v46 = vmax.f32 %v6549_v8, %v4560_v1  ;;  %v2086_v49 = vsub.f32 %v6547_v40, %v6601_v2  ;;  %v2106_v35 = vmul.f32 1.442695, %v2088_v59  ;;  %v2154_v40 = vmul.f32 1.442695, %v2136_v7  ;;  %v5091_v7 = vld [vmem:[%s7794_s10 + $0x50] sm:$0xff] }
 0x37b   :  { %v6565_v62 = vpop.f32.mrf.mxu1 }
 0x37c   :  { %v2089_v17 = vsub.f32 %v6549_v8, %v2073_v46  ;;  %v2137_v42 = vsub.f32 %v4560_v1, %v2073_v46  ;;  %v2102_v0 = vmul.f32 1.442695, %v2086_v49  ;;  %v4540_v1 = vpop.f32.mrf.mxu0  ;;  %4890 = vpow2.f32 %v2106_v35 }
 0x37d   :  { %v6569_v16 = vpop.f32.mrf.mxu1  ;;  %2327 = vperm.xlu0 %4797, %v5091_v7   ;;  %4892 = vpow2.f32 %v2154_v40 }
 0x37e   :  { %v2108_v29 = vmul.f32 1.442695, %v2089_v17  ;;  %v2156_v27 = vmul.f32 1.442695, %v2137_v42  ;;  %4894 = vpow2.f32 %v2102_v0  ;;  %v1937_v37 = vpop.f32.mrf.mxu0 }
 0x37f   :  { %v6571_v30 = vpop.f32.mrf.mxu1 }
 0x380   :  { %4896 = vpow2.f32 %v2108_v29 }
 0x381   :  { %v6575_v10 = vpop.f32.mrf.mxu1  ;;  %4898 = vpow2.f32 %v2156_v27 }
 0x383   :  { %v6577_v3 = vpop.f32.mrf.mxu1 }
 0x385   :  { %v4567_v53 = vpop.f32.mrf.mxu1 }
 0x386   :  { %v2080_v43 = vmax.f32 %v6567_v39, %v4567_v53 }
 0x387   :  { %v6587_v38 = vpop.f32.mrf.mxu1 }
 0x388   :  { %v2096_v8 = vsub.f32 %v6567_v39, %v2080_v43  ;;  %v2144_v32 = vsub.f32 %v4567_v53, %v2080_v43  ;;  %v2078_v0 = vmax.f32 %v6573_v51, %v6587_v38 }
 0x389   :  { %v6591_v21 = vpop.f32.mrf.mxu1 }
 0x38a   :  { %v2081_v55 = vmax.f32 %v6579_v34, %v6591_v21  ;;  %v2122_v53 = vmul.f32 1.442695, %v2096_v8  ;;  %v2170_v39 = vmul.f32 1.442695, %v2144_v32  ;;  %v5094_v8 = vld [vmem:[%s7794_s10 + $0x58] sm:$0xff] }
 0x38b   :  { %v6603_v58 = vpop.f32.mrf.mxu1 }
 0x38c   :  { %v2097_v46 = vsub.f32 %v6579_v34, %v2081_v55  ;;  %v2145_v35 = vsub.f32 %v6591_v21, %v2081_v55  ;;  %v5093_v21 = vld [vmem:[%s7794_s10 + $0x60] sm:$0xff]  ;;  %4900 = vpow2.f32 %v2122_v53 }
 0x38d   :  { %v4571_v22 = vpop.f32.mrf.mxu1  ;;  %2335 = vperm.xlu0 %4797, %v5093_v21   ;;  %4902 = vpow2.f32 %v2170_v39  ;;  %v2074_v21 = vmax.f32 %v6557_v14, %v6571_v30 }
 0x38e   :  { %v2084_v18 = vmax.f32 %v4539_v45, %v4571_v22  ;;  %v2124_v17 = vmul.f32 1.442695, %v2097_v46 }
 0x38f   :  { %v2055_v6 = vpop.f32.mrf.mxu1 }
 0x390   :  { %v2082_v59 = vmax.f32 %v1934_v23, %v2055_v6  ;;  %v2100_v19 = vsub.f32 %v4539_v45, %v2084_v18  ;;  %v2148_v43 = vsub.f32 %v4571_v22, %v2084_v18  ;;  %v2079_v45 = vmax.f32 %v6589_v15, %v6603_v58  ;;  %v5092_v22 = vld [vmem:[%s7794_s10 + $0x48] sm:$0xff] }
 0x391   :  { %v4572_v4 = vpop.f32.mrf.mxu1  ;;  %2323 = vperm.xlu1 %4796, %v5092_v22   ;;  %4904 = vpow2.f32 %v2124_v17 }
 0x392   :  { %v2085_v49 = vmax.f32 %v4540_v1, %v4572_v4  ;;  %v2098_v42 = vsub.f32 %v1934_v23, %v2082_v59  ;;  %v2130_v54 = vmul.f32 1.442695, %v2100_v19  ;;  %v2146_v48 = vsub.f32 %v2055_v6, %v2082_v59 }
 0x393   :  { %v2058_v34 = vpop.f32.mrf.mxu1  ;;  %v2178_v18 = vmul.f32 1.442695, %v2148_v43  ;;  %v2172_v23 = vmul.f32 1.442695, %v2145_v35  ;;  %v2095_v27 = vsub.f32 %v6589_v15, %v2079_v45  ;;  %v2077_v6 = vmax.f32 %v6559_v61, %v6575_v10  ;;  %v5095_v15 = vld [vmem:[%s7794_s10 + $0x70] sm:$0xff]  ;;  %v5096_v35 = vld [vmem:[%s7794_s10 + $0x68] sm:$0xff] }
 0x394   :  { %v2083_v7 = vmax.f32 %v1937_v37, %v2058_v34  ;;  %v2101_v32 = vsub.f32 %v4540_v1, %v2085_v49  ;;  %v2126_v55 = vmul.f32 1.442695, %v2098_v42  ;;  %v2149_v19 = vsub.f32 %v4572_v4, %v2085_v49  ;;  %2343 = vperm.xlu0 %4797, %v5095_v15  }
 0x395   :  { %4906 = vpow2.f32 %v2130_v54  ;;  %v2174_v29 = vmul.f32 1.442695, %v2146_v48  ;;  %2331 = vperm.xlu1 %4796, %v5094_v8   ;;  %v2120_v4 = vmul.f32 1.442695, %v2095_v27  ;;  %v2143_v1 = vsub.f32 %v6603_v58, %v2079_v45  ;;  %v5097_v58 = vld [vmem:[%s7794_s10 + $0x80] sm:$0xff] }
 0x396   :  { %v2099_v40 = vsub.f32 %v1937_v37, %v2083_v7  ;;  %4908 = vpow2.f32 %v2178_v18  ;;  %v2132_v46 = vmul.f32 1.442695, %v2101_v32  ;;  %v2147_v59 = vsub.f32 %v2058_v34, %v2083_v7  ;;  %v6663_v34 = vpop.eup %4890  ;;  %v6673_v7 = vpop.permute.xlu0 %1353 }
 0x397   :  { %4910 = vpow2.f32 %v2172_v23  ;;  %v2076_v48 = vmax.f32 %v6555_v41, %v6569_v16  ;;  %v2093_v53 = vsub.f32 %v6559_v61, %v2077_v6  ;;  %v2180_v43 = vmul.f32 1.442695, %v2149_v19  ;;  %v6668_v17 = vpop.eup %4892 }
 0x398   :  { %4912 = vpow2.f32 %v2126_v55  ;;  %v2094_v49 = vsub.f32 %v6573_v51, %v2078_v0  ;;  %v2128_v39 = vmul.f32 1.442695, %v2099_v40  ;;  %2351 = vperm.xlu0 %4797, %v5097_v58   ;;  %v2075_v61 = vmax.f32 %v6563_v60, %v6577_v3  ;;  %v6671_v54 = vpop.eup %4894 }
 0x399   :  { %4914 = vpow2.f32 %v2174_v29  ;;  %2339 = vperm.xlu1 %4796, %v5096_v35   ;;  %v2142_v45 = vsub.f32 %v6587_v38, %v2078_v0  ;;  %v2176_v51 = vmul.f32 1.442695, %v2147_v59  ;;  %v2141_v42 = vsub.f32 %v6575_v10, %v2077_v6  ;;  %v6678_v38 = vpop.eup %4896  ;;  %v5098_v10 = vld [vmem:[%s7794_s10 + $0x78] sm:$0xff]  ;;  %v6689_v6 = vpop.permute.xlu1 %1357 }
 0x39a   :  { %4916 = vpow2.f32 %v2132_v46  ;;  %v2168_v37 = vmul.f32 1.442695, %v2143_v1  ;;  %v2092_v22 = vsub.f32 %v6555_v41, %v2076_v48  ;;  %v2116_v18 = vmul.f32 1.442695, %v2093_v53  ;;  %v5099_v41 = vld [vmem:[%s7794_s10 + $0x90] sm:$0xff]  ;;  %v6687_v27 = vpop.eup %4898  ;;  %v5100_v1 = vld [vmem:[%s7794_s10 + $0x88] sm:$0xff] }
 0x39b   :  { %4918 = vpow2.f32 %v2120_v4  ;;  %v2140_v32 = vsub.f32 %v6569_v16, %v2076_v48  ;;  %v2118_v23 = vmul.f32 1.442695, %v2094_v49  ;;  %v2091_v55 = vsub.f32 %v6563_v60, %v2075_v61  ;;  %v6692_v16 = vpop.eup %4900 }
 0x39c   :  { %4920 = vpow2.f32 %v2180_v43  ;;  %2359 = vperm.xlu0 %4797, %v5099_v41   ;;  %v2166_v19 = vmul.f32 1.442695, %v2142_v45  ;;  %v2071_v0 = vmax.f32 %v6553_v36, %v6565_v62  ;;  %v2164_v29 = vmul.f32 1.442695, %v2141_v42  ;;  %v6697_v8 = vpop.eup %4902 }
 0x39d   :  { %4922 = vpow2.f32 %v2128_v39  ;;  %2347 = vperm.xlu1 %4796, %v5098_v10   ;;  %v2139_v40 = vsub.f32 %v6577_v3, %v2075_v61  ;;  %v2114_v15 = vmul.f32 1.442695, %v2092_v22  ;;  %v2090_v46 = vsub.f32 %v6557_v14, %v2074_v21  ;;  %v5101_v3 = vld [vmem:[%s7794_s10 + $0xa0] sm:$0xff]  ;;  %v6711_v14 = vpop.permute.xlu0 %1349  ;;  %v6718_v35 = vpop.permute.xlu1 %1345 }
 0x39e   :  { %4924 = vpow2.f32 %v2176_v51  ;;  %v6700_v59 = vpop.eup %4904  ;;  %v2162_v60 = vmul.f32 1.442695, %v2140_v32  ;;  %v2138_v4 = vsub.f32 %v6571_v30, %v2074_v21  ;;  %v2112_v53 = vmul.f32 1.442695, %v2091_v55  ;;  %v5102_v51 = vld [vmem:[%s7794_s10 + $0x98] sm:$0xff] }
 0x39f   :  { %4926 = vpow2.f32 %v2168_v37  ;;  %v2087_v30 = vsub.f32 %v6553_v36, %v2071_v0  ;;  %v2160_v49 = vmul.f32 1.442695, %v2139_v40  ;;  %v2110_v58 = vmul.f32 1.442695, %v2090_v46  ;;  %v5103_v36 = vld [vmem:[%s7794_s10 + $0xb0] sm:$0xff] }
 0x3a0   :  { %4928 = vpow2.f32 %v2116_v18  ;;  %2367 = vperm.xlu0 %4797, %v5101_v3   ;;  %v2158_v45 = vmul.f32 1.442695, %v2138_v4  ;;  %v2135_v18 = vsub.f32 %v6565_v62, %v2071_v0  ;;  %v2134_v41 = vsub.f32 %v6561_v47, %v6601_v2  ;;  %v5105_v62 = vld [vmem:[%s7794_s10 + $0xc0] sm:$0xff]  ;;  %v5106_v3 = vld [vmem:[%s7794_s10 + $0xb8] sm:$0xff] }
 0x3a1   :  { %4930 = vpow2.f32 %v2118_v23  ;;  %2355 = vperm.xlu1 %4796, %v5100_v1   ;;  %v2104_v21 = vmul.f32 1.442695, %v2087_v30  ;;  %v6737_v23 = vpop.permute.xlu0 %1341 }
 0x3a2   :  { %v6709_v48 = vpop.eup %4906  ;;  %4932 = vpow2.f32 %v2166_v19  ;;  %v5104_v19 = vld [vmem:[%s7794_s10 + $0xa8] sm:$0xff]  ;;  %v2152_v2 = vmul.f32 1.442695, %v2135_v18  ;;  %v2150_v1 = vmul.f32 1.442695, %v2134_v41  ;;  %v6783_v18 = vadd.f32 %v6512_v31, %v6711_v14 }
 0x3a3   :  { %v6713_v43 = vpop.eup %4908  ;;  %4934 = vpow2.f32 %v2164_v29  ;;  %v1338_v29 = vpop.permute.xlu1 %1337 }
 0x3a4   :  { %v6716_v39 = vpop.eup %4910  ;;  %4936 = vpow2.f32 %v2114_v15  ;;  %2375 = vperm.xlu0 %4797, %v5103_v36   ;;  %v2196_v37 = vadd.f32 %v6713_v43, %v6709_v48 }
 0x3a5   :  { %v6720_v61 = vpop.eup %4912  ;;  %4938 = vpow2.f32 %v2162_v60  ;;  %2363 = vperm.xlu1 %4796, %v5102_v51   ;;  %v2193_v46 = vadd.f32 %v6716_v39, %v6700_v59  ;;  %v1334_v30 = vpop.permute.xlu0 %1333 }
 0x3a6   :  { %v6728_v42 = vpop.eup %4914  ;;  %4940 = vpow2.f32 %v2112_v53 }
 0x3a7   :  { %v6732_v22 = vpop.eup %4916  ;;  %4942 = vpow2.f32 %v2160_v49  ;;  %v2194_v55 = vadd.f32 %v6728_v42, %v6720_v61  ;;  %v2192_v49 = vadd.f32 %v6697_v8, %v6692_v16 }
 0x3a8   :  { %v6735_v32 = vpop.eup %4918  ;;  %4944 = vpow2.f32 %v2110_v58  ;;  %2383 = vperm.xlu0 %4797, %v5105_v62   ;;  %v6804_v62 = vadd.f32 %v6539_v57, %v6673_v7 }
 0x3a9   :  { %v4921_v10 = vpop.eup %4920  ;;  %4946 = vpow2.f32 %v2158_v45  ;;  %2371 = vperm.xlu1 %4796, %v5104_v19   ;;  %v6767_v45 = vadd.f32 %v6506_v12, %v6673_v7  ;;  %v1330_v12 = vpop.permute.xlu1 %1329  ;;  %v6792_v19 = vadd.f32 %v6502_v52, %v6737_v23 }
 0x3aa   :  { %v4923_v0 = vpop.eup %4922  ;;  %4948 = vrcp.f32 %v2196_v37  ;;  %v2197_v40 = vadd.f32 %v4921_v10, %v6732_v22  ;;  %v6775_v37 = vadd.f32 %v6508_v20, %v6718_v35  ;;  %v6795_v20 = vadd.f32 %v6500_v44, %v1330_v12 }
 0x3ab   :  { %v4925_v47 = vpop.eup %4924  ;;  %4950 = vpow2.f32 %v2104_v21  ;;  %v6779_v21 = vadd.f32 %v6510_v13, %v6689_v6  ;;  %v5107_v13 = vld [vmem:[%s7794_s10 + $0xc8] sm:$0xff] }
 0x3ac   :  { %v6750_v15 = vpop.eup %4926  ;;  %4952 = vrcp.f32 %v2197_v40  ;;  %v2195_v60 = vadd.f32 %v4925_v47, %v4923_v0  ;;  %7957 = vst [vmem:[#allocation38_spill] sm:$0xff] %v6795_v20  ;;  %v6815_v40 = vadd.f32 %v6504_v33, %v1334_v30  ;;  %v2244_v33 = vmul.f32 %v6713_v43, %v6804_v62 }
 0x3ad   :  { %v6754_v4 = vpop.eup %4928  ;;  %4954 = vrcp.f32 %v2194_v55  ;;  %2379 = vperm.xlu1 %4796, %v5106_v3   ;;  %v2191_v51 = vadd.f32 %v6750_v15, %v6735_v32  ;;  %v6788_v55 = vadd.f32 %v6498_v63, %v1338_v29  ;;  %v6808_v63 = vadd.f32 %v6543_v26, %v6689_v6  ;;  %v1326_v26 = vpop.permute.xlu0 %1325 }
 0x3ae   :  { %v6759_v53 = vpop.eup %4930  ;;  %4956 = vrcp.f32 %v2195_v60  ;;  %v2228_v6 = vmul.f32 %v6709_v48, %v6767_v45  ;;  %v6841_v3 = vadd.f32 %v6533_v50, %v1330_v12  ;;  %v6845_v48 = vadd.f32 %v6541_v24, %v6718_v35 }
 0x3af   :  { %v6763_v58 = vpop.eup %4932  ;;  %4958 = vpow2.f32 %v2152_v2  ;;  %v6819_v2 = vadd.f32 %v6545_v56, %v6711_v14  ;;  %v2245_v60 = vmul.f32 %v4921_v10, %v6808_v63  ;;  %v6835_v14 = vadd.f32 %v6494_v5, %v1326_v26 }
 0x3b0   :  { %v6771_v36 = vpop.eup %4934  ;;  %4960 = vrcp.f32 %v2193_v46  ;;  %v2190_v44 = vadd.f32 %v6763_v58, %v6759_v53  ;;  %v2229_v46 = vmul.f32 %v6732_v22, %v6779_v21  ;;  %7960 = vst [vmem:[#allocation41_spill] sm:$0xff] %v6841_v3  ;;  %v2227_v10 = vmul.f32 %v4923_v0, %v6783_v18 }
 0x3b1   :  { %v6785_v41 = vpop.eup %4936  ;;  %4962 = vpow2.f32 %v2150_v1  ;;  %2387 = vperm.xlu1 %4796, %v5107_v13   ;;  %v2189_v57 = vadd.f32 %v6771_v36, %v6754_v4  ;;  %7958 = vst [vmem:[#allocation39_spill] sm:$0xff] %v6835_v14  ;;  %v6838_v1 = vadd.f32 %v6531_v9, %v1338_v29  ;;  %v2243_v5 = vmul.f32 %v4925_v47, %v6819_v2  ;;  %v1322_v29 = vpop.permute.xlu1 %1321 }
 0x3b2   :  { %v6800_v31 = vpop.eup %4938  ;;  %4964 = vrcp.f32 %v2192_v49  ;;  %v6854_v9 = vadd.f32 %v6526_v25, %v1326_v26  ;;  %v6858_v50 = vadd.f32 %v6535_v28, %v6737_v23  ;;  %v2261_v12 = vadd.f32 %v2245_v60, %v2229_v46 }
 0x3b3   :  { %v6812_v52 = vpop.eup %4940  ;;  %4966 = vrcp.f32 %v2191_v51  ;;  %7959 = vst [vmem:[#allocation40_spill] sm:$0xff] %v6838_v1  ;;  %v2188_v43 = vadd.f32 %v6800_v31, %v6785_v41  ;;  %v2260_v51 = vadd.f32 %v2244_v33, %v2228_v6  ;;  %v2226_v0 = vmul.f32 %v6720_v61, %v6775_v37 }
 0x3b4   :  { %v6823_v7 = vpop.eup %4942  ;;  %4968 = vrcp.f32 %v2190_v44  ;;  %7961 = vst [vmem:[#allocation42_spill] sm:$0xff] %v6854_v9  ;;  %v2242_v25 = vmul.f32 %v6728_v42, %v6845_v48  ;;  %v6869_v13 = vadd.f32 %v6537_v11, %v1334_v30  ;;  %v2225_v23 = vmul.f32 %v6700_v59, %v6792_v19 }
 0x3b5   :  { %v6832_v56 = vpop.eup %4944  ;;  %4970 = vrcp.f32 %v2189_v57  ;;  %v2187_v24 = vadd.f32 %v6823_v7, %v6812_v52  ;;  %v2241_v44 = vmul.f32 %v6716_v39, %v6858_v50  ;;  %v2259_v6 = vadd.f32 %v2243_v5, %v2227_v10  ;;  %v1318_v39 = vpop.permute.xlu0 %1317 }
 0x3b6   :  { %v6847_v22 = vpop.eup %4946  ;;  %4972 = vrcp.f32 %v2188_v43  ;;  %v2184_v42 = vadd.f32 %v6668_v17, %v6663_v34  ;;  %v2185_v11 = vadd.f32 %v6687_v27, %v6678_v38  ;;  %v2224_v30 = vmul.f32 %v6692_v16, %v6788_v55  ;;  %v1314_v16 = vpop.permute.xlu1 %1313 }
 0x3b7   :  { %v4949_v49 = vpop.eup %4948  ;;  %v2186_v28 = vadd.f32 %v6847_v22, %v6832_v56  ;;  %v2240_v59 = vmul.f32 %v6697_v8, %v6838_v1  ;;  %4974 = vrcp.f32 %v2187_v24  ;;  %v2258_v43 = vadd.f32 %v2242_v25, %v2226_v0  ;;  %v6895_v25 = vld [vmem:[#allocation2 + $0x24] ss:$8 sps:$4 sm:$0xff]  }
 0x3b8   :  { %v6862_v35 = vpop.eup %4950  ;;  %v2276_v26 = vmul.f32 %v4949_v49, %v2260_v51  ;;  %v2257_v49 = vadd.f32 %v2241_v44, %v2225_v23  ;;  %v2223_v51 = vmul.f32 %v6735_v32, %v6815_v40  ;;  %v2239_v1 = vmul.f32 %v6750_v15, %v6869_v13 }
 0x3b9   :  { %v4953_v47 = vpop.eup %4952  ;;  %4976 = vrcp.f32 %v2186_v28  ;;  %v7963_v23 = vmov 0.0   ;;  %v2256_v44 = vadd.f32 %v2240_v59, %v2224_v30  ;;  %v2238_v15 = vmul.f32 %v6763_v58, %v6841_v3  ;;  %v6920_v58 = vld [vmem:[#allocation2 + $0x20] ss:$8 sps:$4 sm:$0xff]  }
 0x3ba   :  { %v4955_v57 = vpop.eup %4954  ;;  %v2277_v61 = vmul.f32 %v4953_v47, %v2261_v12  ;;  %v878_v12 = vld [vmem:[#allocation2 + $0x30] sm:$0xff]  ;;  %4978 = vrcp.f32 %v2185_v11  ;;  %v7965_v11 = vld [vmem:[#allocation9_spill] sm:$0xff]  ;;  %v2221_v59 = vmul.f32 %v6754_v4, %v6835_v14 }
 0x3bb   :  { %v4957_v46 = vpop.eup %4956  ;;  %v2274_v8 = vmul.f32 %v4955_v57, %v2258_v43  ;;  %v6893_v24 = vcombine.high %v878_v12, %v878_v12  ;;  %v4009_v0 = vcombine.low %v878_v12, %v878_v12  ;;  %v7967_v43 = vld [vmem:[#allocation35_spill] sm:$0xff]  ;;  %4980 = vrcp.f32 %v2184_v42 }
 0x3bc   :  { %v6885_v33 = vpop.eup %4958  ;;  %v2285_v60 = vpack.c.bf16 %v2277_v61, %v2276_v26  ;;  %v2275_v10 = vmul.f32 %v4957_v46, %v2259_v6  ;;  %v2222_v26 = vmul.f32 %v6759_v53, %v6795_v20  ;;  %v6913_v30 = vadd.f32 %v7967_v43, %v1322_v29  ;;  %v7973_v43 = vld [vmem:[#allocation14_spill] sm:$0xff] }
 0x3bd   :  { %v4961_v5 = vpop.eup %4960  ;;  %7962 = vst [vmem:[#allocation43_spill] sm:$0xff] %v6893_v24  ;;  %v2183_v32 = vadd.f32 %v6885_v33, %v6862_v35  ;;  %4011 = vmatprep.subr.msk.bf16.mxu1 %vm2669_vm3, %v6893_v24  ;;  %v6907_v46 = vsel %vm2669_vm3, %v4009_v0, 0  ;;  %v2237_v12 = vmul.f32 %v6771_v36, %v6854_v9  ;;  %v7975_v9 = vld [vmem:[#allocation36_spill] sm:$0xff] }
 0x3be   :  { %v6889_v47 = vpop.eup %4962  ;;  %4574 = vmatpush3.bf16.msra.mxu0 %v2285_v60  ;;  %v2284_v61 = vpack.c.bf16 %v2275_v10, %v2274_v8  ;;  %v2273_v6 = vmul.f32 %v4961_v5, %v2257_v49  ;;  %7964 = vst [vmem:[#allocation44_spill] sm:$0xff] %v6907_v46  ;;  %v6910_v60 = vadd.f32 %v7965_v11, %v1322_v29  ;;  %7968 = vst [vmem:[#allocation35_spill] sm:$0xff] %v6913_v30  ;;  %v1310_v10 = vpop.permute.xlu0 %1309  ;;  %v7969_v8 = vld [vmem:[#allocation10_spill] sm:$0xff]  ;;  %v7971_v11 = vld [vmem:[#allocation37_spill] sm:$0xff] }
 0x3bf   :  { %v4965_v28 = vpop.eup %4964  ;;  %4575 = vmatprep.subr.bf16.mxu0 %v7963_v23  ;;  %v2182_v53 = vadd.f32 %v6889_v47, %v6671_v54  ;;  %2685 = vmatpush1.bf16.msra.mxu1 %v6907_v46  ;;  %v2255_v49 = vadd.f32 %v2239_v1, %v2223_v51  ;;  %v6926_v0 = vadd.f32 %v7969_v8, %v1318_v39  ;;  %4982 = vrcp.f32 %v2183_v32  ;;  %v1306_v1 = vpop.permute.xlu1 %1305 }
 0x3c0   :  { %v4967_v57 = vpop.eup %4966  ;;  %7966 = vst [vmem:[#allocation9_spill] sm:$0xff] %v6910_v60  ;;  %v2272_v5 = vmul.f32 %v4965_v28, %v2256_v44  ;;  %2686 = vmatprep.subr.bf16.mxu1 %v6895_v25  ;;  %v6929_v4 = vadd.f32 %v7971_v11, %v1318_v39  ;;  %v2220_v42 = vmul.f32 %v6785_v41, %v6910_v60 }
 0x3c1   :  { %v4969_v29 = vpop.eup %4968  ;;  %7970 = vst [vmem:[#allocation10_spill] sm:$0xff] %v6926_v0  ;;  %v2254_v44 = vadd.f32 %v2238_v15, %v2222_v26  ;;  %v2271_v36 = vmul.f32 %v4967_v57, %v2255_v49  ;;  %v6937_v8 = vadd.f32 %v7973_v43, %v1314_v16  ;;  %v6940_v39 = vadd.f32 %v7975_v9, %v1314_v16 }
 0x3c2   :  { %4576 = vmatpush3.bf16.msra.mxu0 %v2284_v61  ;;  %7972 = vst [vmem:[#allocation37_spill] sm:$0xff] %v6929_v4  ;;  %v4971_v28 = vpop.eup %4970  ;;  %v2283_v51 = vpack.c.bf16 %v2273_v6, %v2272_v5  ;;  %v2236_v61 = vmul.f32 %v6800_v31, %v6913_v30  ;;  %4984 = vrcp.f32 %v2182_v53  ;;  %v2253_v41 = vadd.f32 %v2237_v12, %v2221_v59  ;;  %v7977_v31 = vld [vmem:[#allocation12_spill] sm:$0xff]  ;;  %v7979_v5 = vld [vmem:[#allocation33_spill] sm:$0xff]  ;;  %v1302_v16 = vpop.permute.xlu0 %1301 }
 0x3c3   :  { %4577 = vmatprep.subr.bf16.mxu0 %v7963_v23  ;;  %7974 = vst [vmem:[#allocation14_spill] sm:$0xff] %v6937_v8  ;;  %7976 = vst [vmem:[#allocation36_spill] sm:$0xff] %v6940_v39  ;;  %2687 = vmatpush1.bf16.msra.mxu1 %v6920_v58  ;;  %v2270_v32 = vmul.f32 %v4969_v29, %v2254_v44  ;;  %v2219_v6 = vmul.f32 %v6812_v52, %v6926_v0  ;;  %v4973_v57 = vpop.eup %4972  ;;  %v7981_v29 = vld [vmem:[#allocation11_spill] sm:$0xff]  ;;  %v1298_v43 = vpop.permute.xlu1 %1297 }
 0x3c4   :  { %v2235_v26 = vmul.f32 %v6823_v7, %v6929_v4  ;;  %v6948_v15 = vadd.f32 %v7977_v31, %v1310_v10  ;;  %v6951_v49 = vadd.f32 %v7979_v5, %v1310_v10  ;;  %v2218_v9 = vmul.f32 %v6832_v56, %v6937_v8  ;;  %v4975_v7 = vpop.eup %4974 }
 0x3c5   :  { %v2282_v53 = vpack.c.bf16 %v2271_v36, %v2270_v32  ;;  %v2252_v59 = vadd.f32 %v2236_v61, %v2220_v42  ;;  %v2269_v12 = vmul.f32 %v4971_v28, %v2253_v41  ;;  %v2234_v52 = vmul.f32 %v6847_v22, %v6940_v39  ;;  %v7985_v28 = vld [vmem:[#allocation8_spill] sm:$0xff]  ;;  %v7987_v32 = vld [vmem:[#allocation34_spill] sm:$0xff] }
 0x3c6   :  { %4578 = vmatpush3.bf16.msra.mxu0 %v2283_v51  ;;  %7978 = vst [vmem:[#allocation12_spill] sm:$0xff] %v6948_v15  ;;  %7980 = vst [vmem:[#allocation33_spill] sm:$0xff] %v6951_v49  ;;  %v6959_v11 = vadd.f32 %v7981_v29, %v1306_v1  ;;  %v7983_v51 = vld [vmem:[#allocation22_spill] sm:$0xff]  ;;  %v4977_v10 = vpop.eup %4976  ;;  %v2251_v5 = vadd.f32 %v2235_v26, %v2219_v6  ;;  %v2217_v56 = vmul.f32 %v6678_v38, %v6948_v15 }
 0x3c7   :  { %4579 = vmatprep.subr.bf16.mxu0 %v7963_v23  ;;  %v6962_v44 = vadd.f32 %v7983_v51, %v1306_v1  ;;  %v2268_v31 = vmul.f32 %v4973_v57, %v2252_v59  ;;  %v2233_v42 = vmul.f32 %v6687_v27, %v6951_v49  ;;  %v6969_v22 = vadd.f32 %v7985_v28, %v1302_v16  ;;  %v4979_v61 = vpop.eup %4978  ;;  %v7989_v57 = vld [vmem:[#allocation13_spill] sm:$0xff] }
 0x3c8   :  { %7982 = vst [vmem:[#allocation11_spill] sm:$0xff] %v6959_v11  ;;  %v2216_v1 = vmul.f32 %v6663_v34, %v6959_v11  ;;  %v6977_v41 = vadd.f32 %v7987_v32, %v1302_v16  ;;  %v2250_v38 = vadd.f32 %v2234_v52, %v2218_v9  ;;  %v2267_v26 = vmul.f32 %v4975_v7, %v2251_v5  ;;  %v4981_v16 = vpop.eup %4980  ;;  %v7995_v32 = vld [vmem:[#allocation29_spill] sm:$0xff] }
 0x3c9   :  { %7984 = vst [vmem:[#allocation22_spill] sm:$0xff] %v6962_v44  ;;  %7986 = vst [vmem:[#allocation8_spill] sm:$0xff] %v6969_v22  ;;  %v2232_v36 = vmul.f32 %v6668_v17, %v6962_v44  ;;  %v2281_v6 = vpack.c.bf16 %v2269_v12, %v2268_v31  ;;  %v6980_v27 = vadd.f32 %v7989_v57, %v1298_v43  ;;  %v7998_v57 = vld [vmem:[#allocation28_spill] sm:$0xff] }
 0x3ca   :  { %4580 = vmatpush3.bf16.msra.mxu0 %v2282_v53  ;;  %7988 = vst [vmem:[#allocation34_spill] sm:$0xff] %v6977_v41  ;;  %v7991_v53 = vld [vmem:[#allocation32_spill] sm:$0xff]  ;;  %v2266_v29 = vmul.f32 %v4977_v10, %v2250_v38  ;;  %v2249_v51 = vadd.f32 %v2233_v42, %v2217_v56  ;;  %v2215_v34 = vmul.f32 %v6862_v35, %v6969_v22  ;;  %v4857_v38 = vld [vmem:[%s7791_s7 + $0x10] sm:$0xff]  }
 0x3cb   :  { %4581 = vmatprep.subr.bf16.mxu0 %v7963_v23  ;;  %7990 = vst [vmem:[#allocation13_spill] sm:$0xff] %v6980_v27  ;;  %v6983_v59 = vadd.f32 %v7991_v53, %v1298_v43  ;;  %v2231_v17 = vmul.f32 %v6885_v33, %v6977_v41  ;;  %v2248_v9 = vadd.f32 %v2232_v36, %v2216_v1  ;;  %v7994_v36 = vld [vmem:[#allocation31_spill] sm:$0xff]  ;;  %v4858_v53 = vld [vmem:[%s7791_s7 + $0x18] sm:$0xff]  }
 0x3cc   :  { %v4983_v12 = vpop.eup %4982  ;;  %v2280_v52 = vpack.c.bf16 %v2267_v26, %v2266_v29  ;;  %v2265_v7 = vmul.f32 %v4979_v61, %v2249_v51  ;;  %v2214_v43 = vmul.f32 %v6671_v54, %v6980_v27  ;;  %v4855_v54 = vld [vmem:[%s7791_s7] sm:$0xff]   ;;  %v4856_v61 = vld [vmem:[%s7791_s7 + $0x8] sm:$0xff]   ;;  %v7997_v26 = vld [vmem:[#allocation27_spill] sm:$0xff] }
 0x3cd   :  { %7992 = vst [vmem:[#allocation32_spill] sm:$0xff] %v6983_v59  ;;  %v2230_v10 = vmul.f32 %v6889_v47, %v6983_v59  ;;  %v2264_v5 = vmul.f32 %v4981_v16, %v2248_v9  ;;  %v2247_v35 = vadd.f32 %v2231_v17, %v2215_v34  ;;  %v7993_v47 = vld [vmem:[#allocation18_spill] sm:$0xff]  ;;  %v7999_v29 = vld [vmem:[#allocation25_spill] sm:$0xff]  ;;  %v4861_v16 = vld [vmem:[%s7791_s7 + $0x30] sm:$0xff]  }
 0x3ce   :  { %4582 = vmatpush3.bf16.msra.mxu0 %v2281_v6  ;;  %v7996_v6 = vld [vmem:[#allocation30_spill] sm:$0xff]  ;;  %v4859_v34 = vld [vmem:[%s7791_s7 + $0x20] sm:$0xff]   ;;  %v4862_v9 = vld [vmem:[%s7791_s7 + $0x38] sm:$0xff]  }
 0x3cf   :  { %4583 = vmatprep.subr.bf16.mxu0 %v7963_v23  ;;  %v4985_v31 = vpop.eup %4984  ;;  %v2279_v33 = vpack.c.bf16 %v2265_v7, %v2264_v5  ;;  %v2246_v56 = vadd.f32 %v2230_v10, %v2214_v43  ;;  %v2263_v42 = vmul.f32 %v4983_v12, %v2247_v35  ;;  %v8000_v51 = vld [vmem:[#allocation26_spill] sm:$0xff]  ;;  %v4863_v12 = vld [vmem:[%s7791_s7 + $0x40] sm:$0xff]   ;;  %v7060_v7 = vld [vmem:[#allocation2 + $0x14] ss:$8 sps:$4 sm:$0xff]  }
 0x3d0   :  { %v4860_v17 = vld [vmem:[%s7791_s7 + $0x28] sm:$0xff]   ;;  %2688 = vmatprep.subr.bf16.mxu1 %v7060_v7  ;;  %v871_v5 = vld [vmem:[%s7792_s8 + $0x30] sm:$0xff] }
 0x3d1   :  { %v2262_v28 = vmul.f32 %v4985_v31, %v2246_v56  ;;  %v4864_v43 = vld [vmem:[%s7791_s7 + $0x48] sm:$0xff]   ;;  %v7078_v35 = vcombine.high %v871_v5, %v871_v5  ;;  %v4866_v56 = vld [vmem:[%s7791_s7 + $0x58] sm:$0xff]  }
 0x3d2   :  { %4584 = vmatpush3.bf16.msra.mxu0 %v2280_v52  ;;  %v7058_v52 = vld [vmem:[#allocation2 + $0x10] ss:$8 sps:$4 sm:$0xff]   ;;  %v7067_v10 = vld [vmem:[#allocation2] ss:$8 sps:$4 sm:$0xff]   ;;  %v7069_v31 = vld [vmem:[#allocation2 + $0x4] ss:$8 sps:$4 sm:$0xff]  }
 0x3d3   :  { %4585 = vmatprep.subr.bf16.mxu0 %v7963_v23  ;;  %v2278_v1 = vpack.c.bf16 %v2263_v42, %v2262_v28  ;;  %2689 = vmatpush1.bf16.msra.mxu1 %v7058_v52  ;;  %v4867_v42 = vld [vmem:[%s7791_s7 + $0x60] sm:$0xff]  }
 0x3d4   :  { %2690 = vmatprep.subr.bf16.mxu1 %v7069_v31  ;;  %v7098_v28 = vld [vmem:[%s7790_s6] sm:$0xff]  }
 0x3d6   :  { %4586 = vmatpush3.bf16.msra.mxu0 %v2279_v33  ;;  %v4865_v33 = vld [vmem:[%s7791_s7 + $0x50] sm:$0xff]  }
 0x3d7   :  { %4587 = vmatprep.subr.bf16.mxu0 %v7963_v23  ;;  %2691 = vmatpush1.bf16.msra.mxu1 %v7067_v10 }
 0x3d8   :  { %4025 = vmatprep.subr.msk.bf16.mxu1 %vm2669_vm3, %v7078_v35 }
 0x3da   :  { %4588 = vmatpush3.bf16.msra.mxu0 %v2278_v1  ;;  %v7104_v1 = vld [vmem:[%s7790_s6 + $0x8] sm:$0xff]  }
 0x3db   :  { %4641 = vmatprep.subr.bf16.mxu0 %v7993_v47 }
 0x3dd   :  { %4590 = vmatmul.mubr.bf16.vlgmr.msra.gmra.mxu0 %v4855_v54  ;;  %v7110_v54 = vld [vmem:[%s7790_s6 + $0x10] sm:$0xff]  }
 0x3de   :  { %4642 = vmatpush3.bf16.msra.mxu0 %v7993_v47  ;;  %4593 = vmatprep.mubr.msk.bf16.mxu0 %vm5191_vm2, %v7963_v23  ;;  %v7116_v47 = vld [vmem:[%s7790_s6 + $0x18] sm:$0xff]  }
 0x3df   :  { %4643 = vmatprep.subr.bf16.mxu0 %v7994_v36 }
 0x3e2   :  { %4644 = vmatpush3.bf16.msra.mxu0 %v7994_v36  ;;  %v7122_v36 = vld [vmem:[%s7790_s6 + $0x20] sm:$0xff]  }
 0x3e3   :  { %4645 = vmatprep.subr.bf16.mxu0 %v7995_v32 }
 0x3e5   :  { %4594 = vmatmul.mubr.bf16.gmra.mxu0 %v4856_v61  ;;  %v7128_v61 = vld [vmem:[%s7790_s6 + $0x28] sm:$0xff]  }
 0x3e6   :  { %4646 = vmatpush3.bf16.msra.mxu0 %v7995_v32  ;;  %4597 = vmatprep.mubr.msk.bf16.mxu0 %vm5191_vm2, %v7963_v23  ;;  %v7134_v32 = vld [vmem:[%s7790_s6 + $0x30] sm:$0xff]  }
 0x3e7   :  { %4647 = vmatprep.subr.bf16.mxu0 %v7996_v6 }
 0x3ea   :  { %4648 = vmatpush3.bf16.msra.mxu0 %v7996_v6  ;;  %v7140_v6 = vld [vmem:[%s7790_s6 + $0x38] sm:$0xff]  }
 0x3eb   :  { %4649 = vmatprep.subr.bf16.mxu0 %v7997_v26 }
 0x3ed   :  { %4598 = vmatmul.mubr.bf16.gmra.mxu0 %v4857_v38  ;;  %v7145_v38 = vpop.permute.xlu1 %2287 }
 0x3ee   :  { %4650 = vmatpush3.bf16.msra.mxu0 %v7997_v26  ;;  %4601 = vmatprep.mubr.msk.bf16.mxu0 %vm5191_vm2, %v7963_v23  ;;  %8001 = vst [vmem:[#allocation18_spill] sm:$0xff] %v7145_v38 }
 0x3ef   :  { %4651 = vmatprep.subr.bf16.mxu0 %v7998_v57 }
 0x3f2   :  { %4652 = vmatpush3.bf16.msra.mxu0 %v7998_v57 }
 0x3f3   :  { %4653 = vmatprep.subr.bf16.mxu0 %v7999_v29 }
 0x3f5   :  { %4602 = vmatmul.mubr.bf16.gmra.mxu0 %v4858_v53  ;;  %v4023_v53 = vcombine.low %v871_v5, %v871_v5 }
 0x3f6   :  { %4654 = vmatpush3.bf16.msra.mxu0 %v7999_v29  ;;  %4605 = vmatprep.mubr.msk.bf16.mxu0 %vm5191_vm2, %v7963_v23  ;;  %v7147_v29 = vpop.permute.xlu0 %2291 }
 0x3f7   :  { %4655 = vmatprep.subr.bf16.mxu0 %v8000_v51  ;;  %8002 = vst [vmem:[#allocation31_spill] sm:$0xff] %v7147_v29 }
 0x3fa   :  { %4656 = vmatpush3.bf16.msra.mxu0 %v8000_v51 }
 0x3fb   :  { %4705 = vmatprep.subr.bf16.mxu0 %v7963_v23 }
 0x3fd   :  { %4606 = vmatmul.mubr.bf16.gmra.mxu0 %v4859_v34 }
 0x3fe   :  { %4609 = vmatprep.mubr.msk.bf16.mxu0 %vm5191_vm2, %v7963_v23 }
 0x405   :  { %4610 = vmatmul.mubr.bf16.gmra.mxu0 %v4860_v17 }
 0x406   :  { %4613 = vmatprep.mubr.msk.bf16.mxu0 %vm5191_vm2, %v7963_v23 }
 0x40d   :  { %4614 = vmatmul.mubr.bf16.gmra.mxu0 %v4861_v16  ;;  %v7151_v16 = vpop.permute.xlu1 %2295 }
 0x40e   :  { %4617 = vmatprep.mubr.msk.bf16.mxu0 %vm5191_vm2, %v7963_v23  ;;  %8003 = vst [vmem:[#allocation29_spill] sm:$0xff] %v7151_v16 }
 0x415   :  { %4618 = vmatmul.mubr.bf16.gmra.mxu0 %v4862_v9 }
 0x416   :  { %4621 = vmatprep.mubr.msk.bf16.mxu0 %vm5191_vm2, %v7963_v23 }
 0x41d   :  { %4622 = vmatmul.mubr.bf16.gmra.mxu0 %v4863_v12 }
 0x41e   :  { %4625 = vmatprep.mubr.msk.bf16.mxu0 %vm5191_vm2, %v7963_v23 }
 0x425   :  { %4626 = vmatmul.mubr.bf16.gmra.mxu0 %v4864_v43  ;;  %v7154_v43 = vsel %vm2669_vm3, %v4023_v53, 0  ;;  %v7168_v53 = vpop.permute.xlu1 %2299 }
 0x426   :  { %4629 = vmatprep.mubr.msk.bf16.mxu0 %vm5191_vm2, %v7963_v23  ;;  %8004 = vst [vmem:[#allocation30_spill] sm:$0xff] %v7154_v43  ;;  %8006 = vst [vmem:[#allocation27_spill] sm:$0xff] %v7168_v53 }
 0x42d   :  { %4630 = vmatmul.mubr.bf16.gmra.mxu0 %v4865_v33  ;;  %v4883_v33 = vld [vmem:[%s7792_s8 + $0x24] ss:$8 sps:$4 sm:$0xff]  }
 0x42e   :  { %4633 = vmatprep.mubr.msk.bf16.mxu0 %vm5191_vm2, %v7963_v23 }
 0x435   :  { %4634 = vmatmul.mubr.bf16.gmra.mxu0 %v4866_v56 }
 0x436   :  { %4637 = vmatprep.mubr.msk.bf16.mxu0 %vm5191_vm2, %v7963_v23 }
 0x43d   :  { %4638 = vmatmul.mubr.bf16.gmra.mxu0 %v4867_v42  ;;  %v4881_v42 = vld [vmem:[%s7792_s8 + $0x20] ss:$8 sps:$4 sm:$0xff]  }
 0x43e   :  { %4657 = vmatprep.mubr.bf16.mxu0 %v7098_v28 }
 0x445   :  { %4658 = vmatmul.mubr.bf16.vlgmr.msra.gmra.mxu0 %v7104_v1 }
 0x446   :  { %4661 = vmatprep.mubr.bf16.mxu0 %v7110_v54 }
 0x44d   :  { %4662 = vmatmul.mubr.bf16.gmra.mxu0 %v7116_v47 }
 0x44e   :  { %4665 = vmatprep.mubr.bf16.mxu0 %v7122_v36 }
 0x455   :  { %4666 = vmatmul.mubr.bf16.gmra.mxu0 %v7128_v61 }
 0x456   :  { %4669 = vmatprep.mubr.bf16.mxu0 %v7134_v32 }
 0x45d   :  { %4670 = vmatmul.mubr.bf16.gmra.mxu0 %v7140_v6 }
 0x45e   :  { %4721 = vmatprep.mubr.msk.bf16.mxu0 %vm5191_vm2, %v7963_v23 }
 0x49d   :  { %v2502_v26 = vpop.f32.mrf.mxu0 }
 0x49e   :  { %v2503_v34 = vadd.f32 %v2502_v26, %v7145_v38  ;;  %v8005_v26 = vmov 0  }
 0x49f   :  { %v4591_v57 = vpop.f32.mrf.mxu0 }
 0x4a0   :  { %v4886_v57 = vld [vmem:[%s7792_s8 + $0x14] ss:$8 sps:$4 sm:$0xff]  }
 0x4a1   :  { %v2505_v51 = vpop.f32.mrf.mxu0 }
 0x4a2   :  { %v2506_v17 = vadd.f32 %v2505_v51, %v7147_v29 }
 0x4a3   :  { %v4592_v9 = vpop.f32.mrf.mxu0 }
 0x4a4   :  { %v2605_v12 = vpack.c.bf16 %v2506_v17, %v2503_v34 }
 0x4a5   :  { %v2510_v5 = vpop.f32.mrf.mxu0 }
 0x4a6   :  { %4012 = vmatmul.mubr.msk.bf16.vlgmr.msra.gmra.mxu1 %vm2653_vm4, %v2605_v12  ;;  %v2511_v34 = vadd.f32 %v2510_v5, %v7151_v16  ;;  %v4884_v12 = vld [vmem:[%s7792_s8 + $0x10] ss:$8 sps:$4 sm:$0xff]   ;;  %v4887_v5 = vld [vmem:[%s7792_s8] ss:$8 sps:$4 sm:$0xff]  }
 0x4a7   :  { %2853 = vmatpush1.bf16.msra.mxu1 %v7154_v43  ;;  %v4595_v56 = vpop.f32.mrf.mxu0  ;;  %2718 = vmatprep.mubr.bf16.mxu1 %v8005_v26 }
 0x4a8   :  { %2854 = vmatprep.subr.bf16.mxu1 %v4883_v33  ;;  %v4889_v33 = vld [vmem:[%s7792_s8 + $0x4] ss:$8 sps:$4 sm:$0xff]  }
 0x4a9   :  { %v2513_v51 = vpop.f32.mrf.mxu0 }
 0x4aa   :  { %v2514_v17 = vadd.f32 %v2513_v51, %v7168_v53  ;;  %v7185_v51 = vpop.permute.xlu1 %2307 }
 0x4ab   :  { %2855 = vmatpush1.bf16.msra.mxu1 %v4881_v42  ;;  %v4596_v9 = vpop.f32.mrf.mxu0  ;;  %v7183_v42 = vpop.permute.xlu0 %2303  ;;  %8008 = vst [vmem:[#allocation25_spill] sm:$0xff] %v7185_v51 }
 0x4ac   :  { %v2606_v56 = vpack.c.bf16 %v2514_v17, %v2511_v34  ;;  %2856 = vmatprep.subr.bf16.mxu1 %v4886_v57  ;;  %8007 = vst [vmem:[#allocation28_spill] sm:$0xff] %v7183_v42 }
 0x4ad   :  { %v2518_v43 = vpop.f32.mrf.mxu0 }
 0x4ae   :  { %4013 = vmatmul.mubr.msk.bf16.gmra.mxu1 %vm2653_vm4, %v2606_v56  ;;  %v2519_v34 = vadd.f32 %v2518_v43, %v7183_v42 }
 0x4af   :  { %2857 = vmatpush1.bf16.msra.mxu1 %v4884_v12  ;;  %v4599_v29 = vpop.f32.mrf.mxu0  ;;  %2728 = vmatprep.mubr.bf16.mxu1 %v8005_v26  ;;  %v7192_v16 = vpop.permute.xlu0 %2311 }
 0x4b0   :  { %2858 = vmatprep.subr.bf16.mxu1 %v4889_v33  ;;  %v8009_v29 = vld [vmem:[#allocation17_spill] sm:$0xff]  ;;  %8010 = vst [vmem:[#allocation26_spill] sm:$0xff] %v7192_v16  ;;  %v7194_v33 = vpop.permute.xlu1 %2315 }
 0x4b1   :  { %v2521_v57 = vpop.f32.mrf.mxu0  ;;  %8011 = vst [vmem:[#allocation17_spill] sm:$0xff] %v7194_v33 }
 0x4b2   :  { %v2522_v17 = vadd.f32 %v2521_v57, %v7185_v51 }
 0x4b3   :  { %2859 = vmatpush1.bf16.msra.mxu1 %v4887_v5  ;;  %v4600_v9 = vpop.f32.mrf.mxu0 }
 0x4b4   :  { %v2607_v12 = vpack.c.bf16 %v2522_v17, %v2519_v34  ;;  %4673 = vmatprep.subr.bf16.mxu1 %v8009_v29 }
 0x4b5   :  { %v2526_v56 = vpop.f32.mrf.mxu0 }
 0x4b6   :  { %4014 = vmatmul.mubr.msk.bf16.gmra.mxu1 %vm2653_vm4, %v2607_v12  ;;  %v2527_v43 = vadd.f32 %v2526_v56, %v7192_v16  ;;  %v7202_v12 = vpop.permute.xlu1 %2323 }
 0x4b7   :  { %v4603_v53 = vpop.f32.mrf.mxu0  ;;  %2738 = vmatprep.mubr.bf16.mxu1 %v8005_v26  ;;  %8013 = vst [vmem:[#allocation46_spill] sm:$0xff] %v7202_v12 }
 0x4b8   :  { %v7200_v53 = vpop.permute.xlu0 %2319 }
 0x4b9   :  { %v2529_v38 = vpop.f32.mrf.mxu0  ;;  %8012 = vst [vmem:[#allocation45_spill] sm:$0xff] %v7200_v53 }
 0x4ba   :  { %v2530_v57 = vadd.f32 %v2529_v38, %v7194_v33 }
 0x4bb   :  { %v4604_v5 = vpop.f32.mrf.mxu0 }
 0x4bc   :  { %v2608_v9 = vpack.c.bf16 %v2530_v57, %v2527_v43  ;;  %v7208_v57 = vpop.permute.xlu0 %2327  ;;  %v7210_v5 = vpop.permute.xlu1 %2331 }
 0x4bd   :  { %v2534_v34 = vpop.f32.mrf.mxu0  ;;  %8014 = vst [vmem:[#allocation47_spill] sm:$0xff] %v7208_v57  ;;  %8015 = vst [vmem:[#allocation48_spill] sm:$0xff] %v7210_v5 }
 0x4be   :  { %4015 = vmatmul.mubr.msk.bf16.gmra.mxu1 %vm2653_vm4, %v2608_v9  ;;  %v2535_v42 = vadd.f32 %v2534_v34, %v7200_v53 }
 0x4bf   :  { %v4607_v17 = vpop.f32.mrf.mxu0  ;;  %2748 = vmatprep.mubr.bf16.mxu1 %v8005_v26 }
 0x4c1   :  { %v2537_v51 = vpop.f32.mrf.mxu0 }
 0x4c2   :  { %v2538_v59 = vadd.f32 %v2537_v51, %v7202_v12 }
 0x4c3   :  { %v4608_v56 = vpop.f32.mrf.mxu0 }
 0x4c4   :  { %v2609_v16 = vpack.c.bf16 %v2538_v59, %v2535_v42  ;;  %v8017_v42 = vld [vmem:[#allocation24_spill] sm:$0xff]  ;;  %v7220_v56 = vpop.permute.xlu1 %2339 }
 0x4c5   :  { %v2542_v38 = vpop.f32.mrf.mxu0  ;;  %8018 = vst [vmem:[#allocation24_spill] sm:$0xff] %v7220_v56 }
 0x4c6   :  { %4016 = vmatmul.mubr.msk.bf16.gmra.mxu1 %vm2653_vm4, %v2609_v16  ;;  %v2543_v17 = vadd.f32 %v2542_v38, %v7208_v57  ;;  %v7217_v16 = vpop.permute.xlu0 %2335 }
 0x4c7   :  { %v4611_v43 = vpop.f32.mrf.mxu0  ;;  %2876 = vmatprep.mubr.bf16.mxu1 %v8005_v26  ;;  %8016 = vst [vmem:[#allocation49_spill] sm:$0xff] %v7217_v16 }
 0x4c9   :  { %v2545_v9 = vpop.f32.mrf.mxu0 }
 0x4ca   :  { %v2546_v33 = vadd.f32 %v2545_v9, %v7210_v5  ;;  %v8021_v5 = vld [vmem:[#allocation23_spill] sm:$0xff] }
 0x4cb   :  { %v4612_v34 = vpop.f32.mrf.mxu0 }
 0x4cc   :  { %v2610_v53 = vpack.c.bf16 %v2546_v33, %v2543_v17  ;;  %v8019_v17 = vld [vmem:[#allocation16_spill] sm:$0xff] }
 0x4cd   :  { %v2550_v51 = vpop.f32.mrf.mxu0 }
 0x4ce   :  { %4026 = vmatmul.mubr.msk.bf16.vlgmr.msra.gmra.mxu1 %vm2653_vm4, %v2610_v53  ;;  %v2551_v38 = vadd.f32 %v2550_v51, %v7217_v16  ;;  %v7232_v51 = vpop.permute.xlu1 %2347  ;;  %v8025_v16 = vld [vmem:[#allocation15_spill] sm:$0xff] }
 0x4cf   :  { %4674 = vmatpush3.bf16.msra.mxu1 %v8009_v29  ;;  %v4615_v59 = vpop.f32.mrf.mxu0  ;;  %2886 = vmatprep.mubr.bf16.mxu1 %v8005_v26  ;;  %8022 = vst [vmem:[#allocation23_spill] sm:$0xff] %v7232_v51 }
 0x4d0   :  { %4675 = vmatprep.subr.bf16.mxu1 %v8017_v42  ;;  %v7229_v59 = vpop.permute.xlu0 %2343 }
 0x4d1   :  { %v2553_v43 = vpop.f32.mrf.mxu0  ;;  %8020 = vst [vmem:[#allocation16_spill] sm:$0xff] %v7229_v59 }
 0x4d2   :  { %v2554_v9 = vadd.f32 %v2553_v43, %v7220_v56 }
 0x4d3   :  { %4676 = vmatpush3.bf16.msra.mxu1 %v8017_v42  ;;  %v4616_v33 = vpop.f32.mrf.mxu0 }
 0x4d4   :  { %v2611_v53 = vpack.c.bf16 %v2554_v9, %v2551_v38  ;;  %4677 = vmatprep.subr.bf16.mxu1 %v8019_v17  ;;  %v7241_v56 = vpop.permute.xlu0 %2351 }
 0x4d5   :  { %v2558_v29 = vpop.f32.mrf.mxu0 }
 0x4d6   :  { %4027 = vmatmul.mubr.msk.bf16.gmra.mxu1 %vm2653_vm4, %v2611_v53  ;;  %v2559_v42 = vadd.f32 %v2558_v29, %v7229_v59  ;;  %v8023_v53 = vld [vmem:[#allocation20_spill] sm:$0xff]  ;;  %v7244_v29 = vpop.permute.xlu1 %2355  ;;  %v8029_v59 = vld [vmem:[#allocation21_spill] sm:$0xff] }
 0x4d7   :  { %4678 = vmatpush3.bf16.msra.mxu1 %v8019_v17  ;;  %v4619_v34 = vpop.f32.mrf.mxu0  ;;  %2896 = vmatprep.mubr.bf16.mxu1 %v8005_v26  ;;  %8024 = vst [vmem:[#allocation20_spill] sm:$0xff] %v7241_v56  ;;  %8026 = vst [vmem:[#allocation15_spill] sm:$0xff] %v7244_v29 }
 0x4d8   :  { %4679 = vmatprep.subr.bf16.mxu1 %v8021_v5 }
 0x4d9   :  { %v2561_v43 = vpop.f32.mrf.mxu0 }
 0x4da   :  { %v2562_v38 = vadd.f32 %v2561_v43, %v7232_v51  ;;  %v7253_v51 = vpop.permute.xlu0 %2359 }
 0x4db   :  { %4680 = vmatpush3.bf16.msra.mxu1 %v8021_v5  ;;  %v4620_v9 = vpop.f32.mrf.mxu0 }
 0x4dc   :  { %v2612_v33 = vpack.c.bf16 %v2562_v38, %v2559_v42  ;;  %4681 = vmatprep.subr.bf16.mxu1 %v8023_v53 }
 0x4dd   :  { %v2566_v17 = vpop.f32.mrf.mxu0 }
 0x4de   :  { %4028 = vmatmul.mubr.msk.bf16.gmra.mxu1 %vm2653_vm4, %v2612_v33  ;;  %v2567_v5 = vadd.f32 %v2566_v17, %v7241_v56  ;;  %v8027_v33 = vld [vmem:[#allocation19_spill] sm:$0xff]  ;;  %v7256_v17 = vpop.permute.xlu1 %2363 }
 0x4df   :  { %4682 = vmatpush3.bf16.msra.mxu1 %v8023_v53  ;;  %v4623_v34 = vpop.f32.mrf.mxu0  ;;  %2906 = vmatprep.mubr.bf16.mxu1 %v8005_v26  ;;  %8028 = vst [vmem:[#allocation19_spill] sm:$0xff] %v7253_v51  ;;  %8030 = vst [vmem:[#allocation21_spill] sm:$0xff] %v7256_v17 }
 0x4e0   :  { %4683 = vmatprep.subr.bf16.mxu1 %v8025_v16 }
 0x4e1   :  { %v2569_v43 = vpop.f32.mrf.mxu0 }
 0x4e2   :  { %v2570_v42 = vadd.f32 %v2569_v43, %v7244_v29  ;;  %v7267_v29 = vpop.permute.xlu1 %2371 }
 0x4e3   :  { %4684 = vmatpush3.bf16.msra.mxu1 %v8025_v16  ;;  %v4624_v38 = vpop.f32.mrf.mxu0  ;;  %8032 = vst [vmem:[#allocation51_spill] sm:$0xff] %v7267_v29 }
 0x4e4   :  { %v2613_v9 = vpack.c.bf16 %v2570_v42, %v2567_v5  ;;  %4685 = vmatprep.subr.bf16.mxu1 %v8027_v33 }
 0x4e5   :  { %v2574_v53 = vpop.f32.mrf.mxu0 }
 0x4e6   :  { %4029 = vmatmul.mubr.msk.bf16.gmra.mxu1 %vm2653_vm4, %v2613_v9  ;;  %v2575_v16 = vadd.f32 %v2574_v53, %v7253_v51 }
 0x4e7   :  { %4686 = vmatpush3.bf16.msra.mxu1 %v8027_v33  ;;  %v4627_v34 = vpop.f32.mrf.mxu0  ;;  %2916 = vmatprep.mubr.bf16.mxu1 %v8005_v26 }
 0x4e8   :  { %4687 = vmatprep.subr.bf16.mxu1 %v8029_v59  ;;  %v7265_v34 = vpop.permute.xlu0 %2367 }
 0x4e9   :  { %v2577_v43 = vpop.f32.mrf.mxu0  ;;  %8031 = vst [vmem:[#allocation50_spill] sm:$0xff] %v7265_v34 }
 0x4ea   :  { %v2578_v5 = vadd.f32 %v2577_v43, %v7256_v17 }
 0x4eb   :  { %4688 = vmatpush3.bf16.msra.mxu1 %v8029_v59  ;;  %v4628_v42 = vpop.f32.mrf.mxu0 }
 0x4ec   :  { %v2614_v38 = vpack.c.bf16 %v2578_v5, %v2575_v16  ;;  %4773 = vmatprep.subr.msk.bf16.mxu1 %vm2669_vm3, %v6893_v24 }
 0x4ed   :  { %v2582_v9 = vpop.f32.mrf.mxu0 }
 0x4ee   :  { %4030 = vmatmul.mubr.msk.bf16.gmra.mxu1 %vm2653_vm4, %v2614_v38  ;;  %v2583_v43 = vadd.f32 %v2582_v9, %v7265_v34  ;;  %v7273_v38 = vpop.permute.xlu0 %2375 }
 0x4ef   :  { %v4631_v33 = vpop.f32.mrf.mxu0  ;;  %2926 = vmatprep.mubr.bf16.mxu1 %v8005_v26  ;;  %8033 = vst [vmem:[#allocation52_spill] sm:$0xff] %v7273_v38 }
 0x4f0   :  { %v7275_v33 = vpop.permute.xlu1 %2379 }
 0x4f1   :  { %v2585_v53 = vpop.f32.mrf.mxu0  ;;  %8034 = vst [vmem:[#allocation53_spill] sm:$0xff] %v7275_v33 }
 0x4f2   :  { %v2586_v59 = vadd.f32 %v2585_v53, %v7267_v29 }
 0x4f3   :  { %v4632_v42 = vpop.f32.mrf.mxu0 }
 0x4f4   :  { %v2615_v16 = vpack.c.bf16 %v2586_v59, %v2583_v43  ;;  %v7283_v59 = vpop.permute.xlu1 %2387 }
 0x4f5   :  { %v2590_v5 = vpop.f32.mrf.mxu0  ;;  %8036 = vst [vmem:[#allocation55_spill] sm:$0xff] %v7283_v59 }
 0x4f6   :  { %4031 = vmatmul.mubr.msk.bf16.gmra.mxu1 %vm2653_vm4, %v2615_v16  ;;  %v2591_v56 = vadd.f32 %v2590_v5, %v7273_v38 }
 0x4f7   :  { %v4635_v17 = vpop.f32.mrf.mxu0  ;;  %2936 = vmatprep.mubr.bf16.mxu1 %v8005_v26 }
 0x4f8   :  { %v7281_v17 = vpop.permute.xlu0 %2383 }
 0x4f9   :  { %v2593_v51 = vpop.f32.mrf.mxu0  ;;  %8035 = vst [vmem:[#allocation54_spill] sm:$0xff] %v7281_v17 }
 0x4fa   :  { %v2594_v57 = vadd.f32 %v2593_v51, %v7275_v33 }
 0x4fb   :  { %v4636_v9 = vpop.f32.mrf.mxu0 }
 0x4fc   :  { %v2616_v34 = vpack.c.bf16 %v2594_v57, %v2591_v56 }
 0x4fd   :  { %v2598_v53 = vpop.f32.mrf.mxu0 }
 0x4fe   :  { %4032 = vmatmul.mubr.msk.bf16.gmra.mxu1 %vm2653_vm4, %v2616_v34  ;;  %v2599_v16 = vadd.f32 %v2598_v53, %v7281_v17 }
 0x4ff   :  { %v4639_v43 = vpop.f32.mrf.mxu0  ;;  %2946 = vmatprep.mubr.bf16.mxu1 %v8005_v26 }
 0x501   :  { %v2601_v42 = vpop.f32.mrf.mxu0 }
 0x502   :  { %v2602_v29 = vadd.f32 %v2601_v42, %v7283_v59 }
 0x503   :  { %v4640_v5 = vpop.f32.mrf.mxu0 }
 0x504   :  { %v2617_v38 = vpack.c.bf16 %v2602_v29, %v2599_v16 }
 0x506   :  { %4033 = vmatmul.mubr.msk.bf16.gmra.mxu1 %vm2653_vm4, %v2617_v38 }
 0x507   :  { %4689 = vmatprep.mubr.bf16.mxu1 %v7098_v28 }
 0x50e   :  { %4690 = vmatmul.mubr.bf16.vlgmr.msra.gmra.mxu1 %v7104_v1 }
 0x50f   :  { %4693 = vmatprep.mubr.bf16.mxu1 %v7110_v54  ;;  %4777 = vmatpush1.bf16.msra.mxu1 %v6907_v46 }
 0x510   :  { %4774 = vmatprep.subr.bf16.mxu1 %v6895_v25 }
 0x513   :  { %4778 = vmatpush1.bf16.msra.mxu1 %v6920_v58 }
 0x514   :  { %4775 = vmatprep.subr.bf16.mxu1 %v7060_v7 }
 0x516   :  { %4694 = vmatmul.mubr.bf16.gmra.mxu1 %v7116_v47 }
 0x517   :  { %4697 = vmatprep.mubr.bf16.mxu1 %v7122_v36  ;;  %4779 = vmatpush1.bf16.msra.mxu1 %v7058_v52 }
 0x518   :  { %4776 = vmatprep.subr.bf16.mxu1 %v7069_v31 }
 0x51b   :  { %4780 = vmatpush1.bf16.msra.mxu1 %v7067_v10 }
 0x51c   :  { %4060 = vmatprep.subr.msk.bf16.mxu1 %vm2669_vm3, %v7078_v35 }
 0x51e   :  { %4698 = vmatmul.mubr.bf16.gmra.mxu1 %v7128_v61 }
 0x51f   :  { %4701 = vmatprep.mubr.bf16.mxu1 %v7134_v32 }
 0x526   :  { %4702 = vmatmul.mubr.bf16.gmra.mxu1 %v7140_v6 }
 0x527   :  { %3654 = vmatprep.mubr.bf16.mxu1 %v8005_v26 }
 0x566   :  { %v2710_v25 = vpop.f32.mrf.mxu1 }
 0x567   :  { %2759 = vst [vmem:[%s7796_s12] sm:$0xff] %v2710_v25 }
 0x568   :  { %v2712_v58 = vpop.f32.mrf.mxu1 }
 0x569   :  { %2760 = vst.msk [vmem:[%s7796_s12 + $0x8] sm:$0xff] %vm589_vm0, %v2712_v58 }
 0x56a   :  { %v2714_v52 = vpop.f32.mrf.mxu1 }
 0x56b   :  { %2761 = vst [vmem:[%s7796_s12 + $0x10] sm:$0xff] %v2714_v52 }
 0x56c   :  { %v2716_v7 = vpop.f32.mrf.mxu1 }
 0x56d   :  { %2762 = vst.msk [vmem:[%s7796_s12 + $0x18] sm:$0xff] %vm589_vm0, %v2716_v7 }
 0x56e   :  { %v2720_v10 = vpop.f32.mrf.mxu1 }
 0x56f   :  { %2763 = vst [vmem:[%s7796_s12 + $0x20] sm:$0xff] %v2720_v10 }
 0x570   :  { %v2722_v31 = vpop.f32.mrf.mxu1 }
 0x571   :  { %2764 = vst.msk [vmem:[%s7796_s12 + $0x28] sm:$0xff] %vm589_vm0, %v2722_v31 }
 0x572   :  { %v2724_v35 = vpop.f32.mrf.mxu1 }
 0x573   :  { %2765 = vst [vmem:[%s7796_s12 + $0x30] sm:$0xff] %v2724_v35 }
 0x574   :  { %v2726_v28 = vpop.f32.mrf.mxu1 }
 0x575   :  { %2766 = vst.msk [vmem:[%s7796_s12 + $0x38] sm:$0xff] %vm589_vm0, %v2726_v28 }
 0x576   :  { %v2730_v1 = vpop.f32.mrf.mxu1 }
 0x577   :  { %2767 = vst [vmem:[%s7796_s12 + $0x40] sm:$0xff] %v2730_v1 }
 0x578   :  { %v2732_v54 = vpop.f32.mrf.mxu1 }
 0x579   :  { %2768 = vst.msk [vmem:[%s7796_s12 + $0x48] sm:$0xff] %vm589_vm0, %v2732_v54 }
 0x57a   :  { %v2734_v47 = vpop.f32.mrf.mxu1 }
 0x57b   :  { %2769 = vst [vmem:[%s7796_s12 + $0x50] sm:$0xff] %v2734_v47 }
 0x57c   :  { %v2736_v36 = vpop.f32.mrf.mxu1 }
 0x57d   :  { %2770 = vst.msk [vmem:[%s7796_s12 + $0x58] sm:$0xff] %vm589_vm0, %v2736_v36 }
 0x57e   :  { %v2740_v61 = vpop.f32.mrf.mxu1 }
 0x57f   :  { %2771 = vst [vmem:[%s7796_s12 + $0x60] sm:$0xff] %v2740_v61 }
 0x580   :  { %v2742_v32 = vpop.f32.mrf.mxu1 }
 0x581   :  { %2772 = vst.msk [vmem:[%s7796_s12 + $0x68] sm:$0xff] %vm589_vm0, %v2742_v32  ;;  %v4659_v32 = vpop.f32.mrf.mxu0 }
 0x582   :  { %v2744_v6 = vpop.f32.mrf.mxu1 }
 0x583   :  { %2773 = vst [vmem:[%s7796_s12 + $0x70] sm:$0xff] %v2744_v6 }
 0x584   :  { %v2746_v57 = vpop.f32.mrf.mxu1 }
 0x585   :  { %2774 = vst.msk [vmem:[%s7796_s12 + $0x78] sm:$0xff] %vm589_vm0, %v2746_v57 }
 0x586   :  { %v2750_v56 = vpop.f32.mrf.mxu1 }
 0x587   :  { %2775 = vst [vmem:[%s7796_s12 + $0x80] sm:$0xff] %v2750_v56  ;;  %v3047_v56 = vpop.f32.mrf.mxu0 }
 0x588   :  { %v2752_v51 = vpop.f32.mrf.mxu1 }
 0x589   :  { %2776 = vst.msk [vmem:[%s7796_s12 + $0x88] sm:$0xff] %vm589_vm0, %v2752_v51 }
 0x58a   :  { %v2754_v29 = vpop.f32.mrf.mxu1 }
 0x58b   :  { %2777 = vst [vmem:[%s7796_s12 + $0x90] sm:$0xff] %v2754_v29 }
 0x58c   :  { %v2756_v34 = vpop.f32.mrf.mxu1 }
 0x58d   :  { %2778 = vst.msk [vmem:[%s7796_s12 + $0x98] sm:$0xff] %vm589_vm0, %v2756_v34  ;;  %v4660_v34 = vpop.f32.mrf.mxu0 }
 0x58e   :  { %v2878_v38 = vpop.f32.mrf.mxu1 }
 0x58f   :  { %2957 = vst [vmem:[#allocation5] sm:$0xff] %v2878_v38 }
 0x590   :  { %v2880_v9 = vpop.f32.mrf.mxu1 }
 0x591   :  { %2958 = vst [vmem:[#allocation5 + $0x8] sm:$0xff] %v2880_v9 }
 0x592   :  { %v2882_v53 = vpop.f32.mrf.mxu1 }
 0x593   :  { %2959 = vst [vmem:[#allocation5 + $0x10] sm:$0xff] %v2882_v53  ;;  %v7376_v53 = vpop.f32.mrf.mxu0 }
 0x594   :  { %v2884_v43 = vpop.f32.mrf.mxu1 }
 0x595   :  { %2960 = vst [vmem:[#allocation5 + $0x18] sm:$0xff] %v2884_v43 }
 0x596   :  { %v2888_v42 = vpop.f32.mrf.mxu1 }
 0x597   :  { %2961 = vst [vmem:[#allocation5 + $0x20] sm:$0xff] %v2888_v42 }
 0x598   :  { %v2890_v16 = vpop.f32.mrf.mxu1 }
 0x599   :  { %2962 = vst [vmem:[#allocation5 + $0x28] sm:$0xff] %v2890_v16  ;;  %v7378_v16 = vpop.f32.mrf.mxu0 }
 0x59a   :  { %v2892_v5 = vpop.f32.mrf.mxu1 }
 0x59b   :  { %2963 = vst [vmem:[#allocation5 + $0x30] sm:$0xff] %v2892_v5 }
 0x59c   :  { %v2894_v25 = vpop.f32.mrf.mxu1 }
 0x59d   :  { %2964 = vst [vmem:[#allocation5 + $0x38] sm:$0xff] %v2894_v25 }
 0x59e   :  { %v2898_v58 = vpop.f32.mrf.mxu1 }
 0x59f   :  { %2965 = vst [vmem:[#allocation5 + $0x40] sm:$0xff] %v2898_v58  ;;  %v7380_v58 = vpop.f32.mrf.mxu0 }
 0x5a0   :  { %v2900_v52 = vpop.f32.mrf.mxu1 }
 0x5a1   :  { %2966 = vst [vmem:[#allocation5 + $0x48] sm:$0xff] %v2900_v52 }
 0x5a2   :  { %v2902_v7 = vpop.f32.mrf.mxu1 }
 0x5a3   :  { %2967 = vst [vmem:[#allocation5 + $0x50] sm:$0xff] %v2902_v7 }
 0x5a4   :  { %v2904_v10 = vpop.f32.mrf.mxu1 }
 0x5a5   :  { %2968 = vst [vmem:[#allocation5 + $0x58] sm:$0xff] %v2904_v10  ;;  %v7382_v10 = vpop.f32.mrf.mxu0 }
 0x5a6   :  { %v2908_v31 = vpop.f32.mrf.mxu1 }
 0x5a7   :  { %2969 = vst [vmem:[#allocation5 + $0x60] sm:$0xff] %v2908_v31 }
 0x5a8   :  { %v2910_v35 = vpop.f32.mrf.mxu1 }
 0x5a9   :  { %2970 = vst [vmem:[#allocation5 + $0x68] sm:$0xff] %v2910_v35 }
 0x5aa   :  { %v2912_v28 = vpop.f32.mrf.mxu1 }
 0x5ab   :  { %2971 = vst [vmem:[#allocation5 + $0x70] sm:$0xff] %v2912_v28  ;;  %v7386_v28 = vpop.f32.mrf.mxu0 }
 0x5ac   :  { %v2914_v1 = vpop.f32.mrf.mxu1 }
 0x5ad   :  { %2972 = vst [vmem:[#allocation5 + $0x78] sm:$0xff] %v2914_v1 }
 0x5ae   :  { %v2918_v54 = vpop.f32.mrf.mxu1 }
 0x5af   :  { %2973 = vst [vmem:[#allocation5 + $0x80] sm:$0xff] %v2918_v54 }
 0x5b0   :  { %v2920_v47 = vpop.f32.mrf.mxu1 }
 0x5b1   :  { %2974 = vst [vmem:[#allocation5 + $0x88] sm:$0xff] %v2920_v47  ;;  %v4667_v47 = vpop.f32.mrf.mxu0 }
 0x5b2   :  { %v2922_v36 = vpop.f32.mrf.mxu1 }
 0x5b3   :  { %2975 = vst [vmem:[#allocation5 + $0x90] sm:$0xff] %v2922_v36 }
 0x5b4   :  { %v2924_v61 = vpop.f32.mrf.mxu1 }
 0x5b5   :  { %2976 = vst [vmem:[#allocation5 + $0x98] sm:$0xff] %v2924_v61 }
 0x5b6   :  { %v2928_v6 = vpop.f32.mrf.mxu1 }
 0x5b7   :  { %2977 = vst [vmem:[#allocation5 + $0xa0] sm:$0xff] %v2928_v6  ;;  %v7394_v6 = vpop.f32.mrf.mxu0 }
 0x5b8   :  { %v2930_v57 = vpop.f32.mrf.mxu1 }
 0x5b9   :  { %2978 = vst [vmem:[#allocation5 + $0xa8] sm:$0xff] %v2930_v57 }
 0x5ba   :  { %v2932_v51 = vpop.f32.mrf.mxu1 }
 0x5bb   :  { %2979 = vst [vmem:[#allocation5 + $0xb0] sm:$0xff] %v2932_v51 }
 0x5bc   :  { %v2934_v29 = vpop.f32.mrf.mxu1 }
 0x5bd   :  { %2980 = vst [vmem:[#allocation5 + $0xb8] sm:$0xff] %v2934_v29  ;;  %v4668_v29 = vpop.f32.mrf.mxu0 }
 0x5be   :  { %v2938_v38 = vpop.f32.mrf.mxu1 }
 0x5bf   :  { %2981 = vst [vmem:[#allocation5 + $0xc0] sm:$0xff] %v2938_v38 }
 0x5c0   :  { %v2940_v9 = vpop.f32.mrf.mxu1 }
 0x5c1   :  { %2982 = vst [vmem:[#allocation5 + $0xc8] sm:$0xff] %v2940_v9 }
 0x5c2   :  { %v2942_v43 = vpop.f32.mrf.mxu1 }
 0x5c3   :  { %2983 = vst [vmem:[#allocation5 + $0xd0] sm:$0xff] %v2942_v43  ;;  %v7402_v43 = vpop.f32.mrf.mxu0 }
 0x5c4   :  { %v2944_v42 = vpop.f32.mrf.mxu1 }
 0x5c5   :  { %2984 = vst [vmem:[#allocation5 + $0xd8] sm:$0xff] %v2944_v42  ;;  %v4671_v59 = vpop.f32.mrf.mxu0 }
 0x5c6   :  { %v2948_v5 = vpop.f32.mrf.mxu1 }
 0x5c7   :  { %2985 = vst [vmem:[#allocation5 + $0xe0] sm:$0xff] %v2948_v5  ;;  %v3095_v22 = vpop.f32.mrf.mxu0 }
 0x5c8   :  { %v2950_v25 = vpop.f32.mrf.mxu1 }
 0x5c9   :  { %2986 = vst [vmem:[#allocation5 + $0xe8] sm:$0xff] %v2950_v25  ;;  %v4672_v14 = vpop.f32.mrf.mxu0 }
 0x5ca   :  { %v2952_v52 = vpop.f32.mrf.mxu1 }
 0x5cb   :  { %2987 = vst [vmem:[#allocation5 + $0xf0] sm:$0xff] %v2952_v52 }
 0x5cc   :  { %v2954_v7 = vpop.f32.mrf.mxu1 }
 0x5cd   :  { %2988 = vst [vmem:[#allocation5 + $0xf8] sm:$0xff] %v2954_v7 }
 0x5ce   :  { %v4691_v31 = vpop.f32.mrf.mxu1 }
 0x5cf   :  { %v3233_v42 = vmax.f32 %v4659_v32, %v4691_v31 }
 0x5d0   :  { %v7384_v35 = vpop.f32.mrf.mxu1 }
 0x5d1   :  { %v7405_v25 = vmax.f32 %v3047_v56, %v7384_v35  ;;  %v3249_v17 = vsub.f32 %v4659_v32, %v3233_v42  ;;  %v3297_v12 = vsub.f32 %v4691_v31, %v3233_v42 }
 0x5d2   :  { %v4692_v1 = vpop.f32.mrf.mxu1 }
 0x5d3   :  { %v3234_v7 = vmax.f32 %v4660_v34, %v4692_v1  ;;  %v3247_v46 = vsub.f32 %v3047_v56, %v7405_v25  ;;  %v3267_v44 = vmul.f32 1.442695, %v3249_v17  ;;  %v3315_v15 = vmul.f32 1.442695, %v3297_v12 }
 0x5d4   :  { %v7388_v54 = vpop.f32.mrf.mxu1 }
 0x5d5   :  { %v3250_v27 = vsub.f32 %v4660_v34, %v3234_v7  ;;  %v3298_v11 = vsub.f32 %v4692_v1, %v3234_v7  ;;  %v3263_v4 = vmul.f32 1.442695, %v3247_v46  ;;  %4986 = vpow2.f32 %v3267_v44 }
 0x5d6   :  { %v7390_v36 = vpop.f32.mrf.mxu1  ;;  %4988 = vpow2.f32 %v3315_v15 }
 0x5d7   :  { %v3269_v30 = vmul.f32 1.442695, %v3250_v27  ;;  %v3317_v31 = vmul.f32 1.442695, %v3298_v11  ;;  %4990 = vpow2.f32 %v3263_v4 }
 0x5d8   :  { %v7392_v61 = vpop.f32.mrf.mxu1 }
 0x5d9   :  { %4992 = vpow2.f32 %v3269_v30 }
 0x5da   :  { %v7396_v57 = vpop.f32.mrf.mxu1  ;;  %4994 = vpow2.f32 %v3317_v31 }
 0x5dc   :  { %v7398_v51 = vpop.f32.mrf.mxu1 }
 0x5de   :  { %v4699_v38 = vpop.f32.mrf.mxu1 }
 0x5df   :  { %v3241_v26 = vmax.f32 %v4667_v47, %v4699_v38 }
 0x5e0   :  { %v7400_v9 = vpop.f32.mrf.mxu1 }
 0x5e1   :  { %v3257_v39 = vsub.f32 %v4667_v47, %v3241_v26  ;;  %v3305_v0 = vsub.f32 %v4699_v38, %v3241_v26  ;;  %v3098_v26 = vpop.f32.mrf.mxu0  ;;  %v3237_v38 = vmax.f32 %v7378_v16, %v7390_v36 }
 0x5e2   :  { %v4700_v5 = vpop.f32.mrf.mxu1  ;;  %v7422_v7 = vpop.eup %4986 }
 0x5e3   :  { %v3242_v41 = vmax.f32 %v4668_v29, %v4700_v5  ;;  %v3283_v56 = vmul.f32 1.442695, %v3257_v39  ;;  %v3331_v17 = vmul.f32 1.442695, %v3305_v0  ;;  %v3238_v0 = vmax.f32 %v7382_v10, %v7396_v57  ;;  %v7427_v31 = vpop.eup %4988 }
 0x5e4   :  { %v7407_v52 = vpop.f32.mrf.mxu1 }
 0x5e5   :  { %v3258_v60 = vsub.f32 %v4668_v29, %v3242_v41  ;;  %v3306_v1 = vsub.f32 %v4700_v5, %v3242_v41  ;;  %v3240_v12 = vmax.f32 %v7402_v43, %v7407_v52  ;;  %4996 = vpow2.f32 %v3283_v56  ;;  %v7430_v56 = vpop.eup %4990 }
 0x5e6   :  { %v4703_v33 = vpop.f32.mrf.mxu1  ;;  %4998 = vpow2.f32 %v3331_v17 }
 0x5e7   :  { %v3245_v49 = vmax.f32 %v4671_v59, %v4703_v33  ;;  %v3285_v46 = vmul.f32 1.442695, %v3258_v60  ;;  %v3256_v4 = vsub.f32 %v7402_v43, %v3240_v12  ;;  %v3239_v60 = vmax.f32 %v7394_v6, %v7400_v9 }
 0x5e8   :  { %v3216_v24 = vpop.f32.mrf.mxu1  ;;  %v3304_v29 = vsub.f32 %v7407_v52, %v3240_v12  ;;  %v3254_v43 = vsub.f32 %v7382_v10, %v3238_v0 }
 0x5e9   :  { %v3243_v32 = vmax.f32 %v3095_v22, %v3216_v24  ;;  %v3261_v42 = vsub.f32 %v4671_v59, %v3245_v49  ;;  %v3309_v34 = vsub.f32 %v4703_v33, %v3245_v49  ;;  %v3333_v49 = vmul.f32 1.442695, %v3306_v1  ;;  %v7435_v1 = vpop.eup %4992 }
 0x5ea   :  { %v4704_v8 = vpop.f32.mrf.mxu1  ;;  %5000 = vpow2.f32 %v3285_v46  ;;  %v3329_v10 = vmul.f32 1.442695, %v3304_v29  ;;  %v3277_v17 = vmul.f32 1.442695, %v3254_v43  ;;  %v7438_v46 = vpop.eup %4994  ;;  %v3295_v43 = vsub.f32 %v7384_v35, %v7405_v25 }
 0x5eb   :  { %v3246_v3 = vmax.f32 %v4672_v14, %v4704_v8  ;;  %v3259_v27 = vsub.f32 %v3095_v22, %v3243_v32  ;;  %v3291_v47 = vmul.f32 1.442695, %v3261_v42  ;;  %v3307_v44 = vsub.f32 %v3216_v24, %v3243_v32 }
 0x5ec   :  { %v3219_v20 = vpop.f32.mrf.mxu1  ;;  %v3339_v15 = vmul.f32 1.442695, %v3309_v34  ;;  %v3303_v32 = vsub.f32 %v7400_v9, %v3239_v60  ;;  %v3302_v42 = vsub.f32 %v7396_v57, %v3238_v0  ;;  %v3235_v34 = vmax.f32 %v7380_v58, %v7392_v61 }
 0x5ed   :  { %v3244_v11 = vmax.f32 %v3098_v26, %v3219_v20  ;;  %v3262_v39 = vsub.f32 %v4672_v14, %v3246_v3  ;;  %v3287_v41 = vmul.f32 1.442695, %v3259_v27  ;;  %v3310_v30 = vsub.f32 %v4704_v8, %v3246_v3 }
 0x5ee   :  { %5002 = vpow2.f32 %v3291_v47  ;;  %v3335_v22 = vmul.f32 1.442695, %v3307_v44  ;;  %v3281_v14 = vmul.f32 1.442695, %v3256_v4  ;;  %v3255_v8 = vsub.f32 %v7394_v6, %v3239_v60 }
 0x5ef   :  { %v3260_v24 = vsub.f32 %v3098_v26, %v3244_v11  ;;  %5004 = vpow2.f32 %v3339_v15  ;;  %v3293_v33 = vmul.f32 1.442695, %v3262_v39  ;;  %v3308_v59 = vsub.f32 %v3219_v20, %v3244_v11 }
 0x5f0   :  { %5006 = vpow2.f32 %v3333_v49  ;;  %v3341_v3 = vmul.f32 1.442695, %v3310_v30  ;;  %v3236_v20 = vmax.f32 %v7386_v28, %v7398_v51  ;;  %v3253_v6 = vsub.f32 %v7378_v16, %v3237_v38 }
 0x5f1   :  { %5008 = vpow2.f32 %v3287_v41  ;;  %v3289_v5 = vmul.f32 1.442695, %v3260_v24  ;;  %v3337_v52 = vmul.f32 1.442695, %v3308_v59  ;;  %v3301_v9 = vsub.f32 %v7390_v36, %v3237_v38 }
 0x5f2   :  { %5010 = vpow2.f32 %v3335_v22  ;;  %v3279_v12 = vmul.f32 1.442695, %v3255_v8  ;;  %v3252_v57 = vsub.f32 %v7386_v28, %v3236_v20  ;;  %v3327_v27 = vmul.f32 1.442695, %v3303_v32  ;;  %v7441_v26 = vpop.eup %4996 }
 0x5f3   :  { %5012 = vpow2.f32 %v3293_v33  ;;  %v3232_v16 = vmax.f32 %v7376_v53, %v7388_v54  ;;  %v3325_v47 = vmul.f32 1.442695, %v3302_v42  ;;  %v3300_v44 = vsub.f32 %v7398_v51, %v3236_v20  ;;  %v7446_v11 = vpop.eup %4998 }
 0x5f4   :  { %5014 = vpow2.f32 %v3281_v14  ;;  %v3275_v36 = vmul.f32 1.442695, %v3253_v6  ;;  %v3251_v15 = vsub.f32 %v7380_v58, %v3235_v34  ;;  %v3323_v28 = vmul.f32 1.442695, %v3301_v9 }
 0x5f5   :  { %5016 = vpow2.f32 %v3341_v3  ;;  %v3299_v49 = vsub.f32 %v7392_v61, %v3235_v34  ;;  %v3273_v0 = vmul.f32 1.442695, %v3252_v57  ;;  %v3248_v30 = vsub.f32 %v7376_v53, %v3232_v16 }
 0x5f6   :  { %5018 = vpow2.f32 %v3289_v5  ;;  %v3321_v51 = vmul.f32 1.442695, %v3300_v44  ;;  %v3271_v22 = vmul.f32 1.442695, %v3251_v15  ;;  %v3296_v29 = vsub.f32 %v7388_v54, %v3232_v16 }
 0x5f7   :  { %5020 = vpow2.f32 %v3337_v52  ;;  %v7449_v39 = vpop.eup %5000  ;;  %v3319_v24 = vmul.f32 1.442695, %v3299_v49  ;;  %v3265_v14 = vmul.f32 1.442695, %v3248_v30  ;;  %v3311_v6 = vmul.f32 1.442695, %v3295_v43 }
 0x5f8   :  { %5022 = vpow2.f32 %v3329_v10  ;;  %v3313_v32 = vmul.f32 1.442695, %v3296_v29  ;;  %v3353_v25 = vadd.f32 %v7446_v11, %v7441_v26 }
 0x5f9   :  { %5024 = vpow2.f32 %v3277_v17 }
 0x5fa   :  { %5026 = vpow2.f32 %v3279_v12 }
 0x5fb   :  { %v5003_v4 = vpop.eup %5002  ;;  %5028 = vpow2.f32 %v3327_v27 }
 0x5fc   :  { %v5005_v41 = vpop.eup %5004  ;;  %5030 = vpow2.f32 %v3325_v47 }
 0x5fd   :  { %v7453_v60 = vpop.eup %5006  ;;  %5032 = vpow2.f32 %v3275_v36  ;;  %v3357_v59 = vadd.f32 %v5005_v41, %v5003_v4  ;;  %v3389_v36 = vmul.f32 %v5003_v4, %v6767_v45 }
 0x5fe   :  { %v5009_v58 = vpop.eup %5008  ;;  %5034 = vpow2.f32 %v3323_v28  ;;  %v3354_v54 = vadd.f32 %v7453_v60, %v7449_v39  ;;  %v3405_v28 = vmul.f32 %v5005_v41, %v6804_v62 }
 0x5ff   :  { %v5011_v33 = vpop.eup %5010  ;;  %5036 = vpow2.f32 %v3273_v0  ;;  %v3387_v4 = vmul.f32 %v5009_v58, %v6775_v37  ;;  %v3346_v37 = vadd.f32 %v7438_v46, %v7435_v1 }
 0x600   :  { %v5013_v61 = vpop.eup %5012  ;;  %5038 = vpow2.f32 %v3321_v51  ;;  %v3355_v3 = vadd.f32 %v5011_v33, %v5009_v58  ;;  %v3421_v62 = vadd.f32 %v3405_v28, %v3389_v36  ;;  %v3403_v41 = vmul.f32 %v5011_v33, %v6845_v48  ;;  %v8039_v28 = vld [vmem:[#allocation41_spill] sm:$0xff] }
 0x601   :  { %v7456_v38 = vpop.eup %5014  ;;  %5040 = vpow2.f32 %v3271_v22  ;;  %v3390_v15 = vmul.f32 %v5013_v61, %v6779_v21  ;;  %v3385_v48 = vmul.f32 %v7441_v26, %v6788_v55 }
 0x602   :  { %v5017_v53 = vpop.eup %5016  ;;  %5042 = vpow2.f32 %v3319_v24  ;;  %v3384_v55 = vmul.f32 %v7456_v38, %v6815_v40 }
 0x603   :  { %v5019_v8 = vpop.eup %5018  ;;  %5044 = vrcp.f32 %v3357_v59  ;;  %v3358_v5 = vadd.f32 %v5017_v53, %v5013_v61  ;;  %v3406_v49 = vmul.f32 %v5017_v53, %v6808_v63 }
 0x604   :  { %v5021_v20 = vpop.eup %5020  ;;  %5046 = vpow2.f32 %v3265_v14  ;;  %v3388_v22 = vmul.f32 %v5019_v8, %v6783_v18 }
 0x605   :  { %v7460_v52 = vpop.eup %5022  ;;  %5048 = vrcp.f32 %v3358_v5  ;;  %v3356_v42 = vadd.f32 %v5021_v20, %v5019_v8  ;;  %v3404_v24 = vmul.f32 %v5021_v20, %v6819_v2  ;;  %v3422_v63 = vadd.f32 %v3406_v49, %v3390_v15  ;;  %v8040_v49 = vld [vmem:[#allocation39_spill] sm:$0xff] }
 0x606   :  { %v7464_v10 = vpop.eup %5024  ;;  %5050 = vrcp.f32 %v3355_v3  ;;  %v3352_v17 = vadd.f32 %v7460_v52, %v7456_v38  ;;  %v3386_v2 = vmul.f32 %v7449_v39, %v6792_v19  ;;  %v3402_v3 = vmul.f32 %v7453_v60, %v6858_v50  ;;  %v8037_v39 = vld [vmem:[#allocation40_spill] sm:$0xff] }
 0x607   :  { %v7466_v35 = vpop.eup %5026  ;;  %5052 = vrcp.f32 %v3356_v42  ;;  %v3420_v43 = vadd.f32 %v3404_v24, %v3388_v22  ;;  %v3419_v5 = vadd.f32 %v3403_v41, %v3387_v4  ;;  %v3401_v20 = vmul.f32 %v7446_v11, %v8037_v39  ;;  %v8041_v22 = vld [vmem:[#allocation42_spill] sm:$0xff]  ;;  %v8043_v41 = vld [vmem:[#allocation35_spill] sm:$0xff] }
 0x608   :  { %v7470_v34 = vpop.eup %5028  ;;  %5054 = vpow2.f32 %v3313_v32  ;;  %v3345_v50 = vadd.f32 %v7427_v31, %v7422_v7  ;;  %v3418_v42 = vadd.f32 %v3402_v3, %v3386_v2  ;;  %v3400_v26 = vmul.f32 %v7460_v52, %v6869_v13 }
 0x609   :  { %v7474_v9 = vpop.eup %5030  ;;  %5056 = vrcp.f32 %v3354_v54  ;;  %v3351_v27 = vadd.f32 %v7470_v34, %v7466_v35  ;;  %v3417_v36 = vadd.f32 %v3401_v20, %v3385_v48  ;;  %v3399_v40 = vmul.f32 %v7470_v34, %v8039_v28  ;;  %v8047_v48 = vld [vmem:[#allocation36_spill] sm:$0xff]  ;;  %v8054_v28 = vld [vmem:[#allocation13_spill] sm:$0xff] }
 0x60a   :  { %v7476_v12 = vpop.eup %5032  ;;  %5058 = vpow2.f32 %v3311_v6  ;;  %v3350_v47 = vadd.f32 %v7474_v9, %v7464_v10  ;;  %v3416_v52 = vadd.f32 %v3400_v26, %v3384_v55 }
 0x60b   :  { %v7478_v57 = vpop.eup %5034  ;;  %5060 = vrcp.f32 %v3353_v25  ;;  %v8038_v25 = vld [vmem:[#allocation38_spill] sm:$0xff] }
 0x60c   :  { %v7482_v16 = vpop.eup %5036  ;;  %5062 = vrcp.f32 %v3352_v17  ;;  %v3349_v30 = vadd.f32 %v7478_v57, %v7476_v12  ;;  %v3383_v17 = vmul.f32 %v7466_v35, %v8038_v25  ;;  %v3398_v35 = vmul.f32 %v7474_v9, %v8041_v22  ;;  %v8044_v9 = vld [vmem:[#allocation10_spill] sm:$0xff] }
 0x60d   :  { %v7486_v44 = vpop.eup %5038  ;;  %5064 = vrcp.f32 %v3351_v27 }
 0x60e   :  { %v7492_v0 = vpop.eup %5040  ;;  %5066 = vrcp.f32 %v3350_v47  ;;  %v3348_v45 = vadd.f32 %v7486_v44, %v7482_v16 }
 0x60f   :  { %v7496_v51 = vpop.eup %5042  ;;  %5068 = vrcp.f32 %v3349_v30  ;;  %v3382_v30 = vmul.f32 %v7464_v10, %v8040_v49 }
 0x610   :  { %v5045_v59 = vpop.eup %5044  ;;  %v3347_v18 = vadd.f32 %v7496_v51, %v7492_v0  ;;  %5070 = vrcp.f32 %v3348_v45 }
 0x611   :  { %v7502_v21 = vpop.eup %5046  ;;  %v3437_v29 = vmul.f32 %v5045_v59, %v3421_v62  ;;  %v8042_v59 = vld [vmem:[#allocation9_spill] sm:$0xff]  ;;  %v3414_v2 = vadd.f32 %v3398_v35, %v3382_v30 }
 0x612   :  { %v5049_v61 = vpop.eup %5048  ;;  %5072 = vrcp.f32 %v3347_v18  ;;  %v3381_v34 = vmul.f32 %v7476_v12, %v8042_v59  ;;  %v8046_v12 = vld [vmem:[#allocation14_spill] sm:$0xff]  ;;  %v8056_v59 = vld [vmem:[#allocation43_spill] sm:$0xff] }
 0x613   :  { %v5051_v14 = vpop.eup %5050  ;;  %v3438_v53 = vmul.f32 %v5049_v61, %v3422_v63  ;;  %5074 = vrcp.f32 %v3346_v37  ;;  %v3415_v63 = vadd.f32 %v3399_v40, %v3383_v17  ;;  %v3397_v61 = vmul.f32 %v7478_v57, %v8043_v41  ;;  %v5122_v41 = vld [vmem:[#allocation2 + $0x4] ss:$8 sps:$4 sm:$0xff]  }
 0x614   :  { %v5053_v8 = vpop.eup %5052  ;;  %v3435_v54 = vmul.f32 %v5051_v14, %v3419_v5  ;;  %5076 = vrcp.f32 %v3345_v50  ;;  %v3380_v14 = vmul.f32 %v7482_v16, %v8044_v9  ;;  %v8048_v16 = vld [vmem:[#allocation12_spill] sm:$0xff]  ;;  %v3375_v40 = vmul.f32 %v7430_v56, %v8054_v28  ;;  %v5127_v9 = vld [vmem:[%s7791_s7 + $0x28] sm:$0xff]  }
 0x615   :  { %v7516_v58 = vpop.eup %5054  ;;  %v3446_v33 = vpack.c.bf16 %v3438_v53, %v3437_v29  ;;  %v3436_v19 = vmul.f32 %v5053_v8, %v3420_v43  ;;  %v8045_v29 = vld [vmem:[#allocation37_spill] sm:$0xff]  ;;  %v3379_v43 = vmul.f32 %v7492_v0, %v8046_v12  ;;  %v3413_v37 = vadd.f32 %v3397_v61, %v3381_v34  ;;  %v8050_v0 = vld [vmem:[#allocation11_spill] sm:$0xff]  ;;  %v5131_v12 = vld [vmem:[%s7791_s7 + $0x48] sm:$0xff]  }
 0x616   :  { %v5057_v32 = vpop.eup %5056  ;;  %v3344_v11 = vadd.f32 %v7516_v58, %v7502_v21  ;;  %v3396_v53 = vmul.f32 %v7486_v44, %v8045_v29  ;;  %v3378_v20 = vmul.f32 %v7435_v1, %v8048_v16  ;;  %v8049_v44 = vld [vmem:[#allocation33_spill] sm:$0xff]  ;;  %v3377_v50 = vmul.f32 %v7422_v7, %v8050_v0  ;;  %v8052_v1 = vld [vmem:[#allocation8_spill] sm:$0xff] }
 0x617   :  { %v7522_v60 = vpop.eup %5058  ;;  %4706 = vmatpush3.bf16.msra.mxu0 %v3446_v33  ;;  %v3445_v47 = vpack.c.bf16 %v3436_v19, %v3435_v54  ;;  %v3434_v15 = vmul.f32 %v5057_v32, %v3418_v42  ;;  %v3395_v33 = vmul.f32 %v7496_v51, %v8047_v48  ;;  %v3394_v32 = vmul.f32 %v7438_v46, %v8049_v44  ;;  %v8051_v54 = vld [vmem:[#allocation22_spill] sm:$0xff]  ;;  %v5129_v29 = vld [vmem:[%s7791_s7 + $0x38] sm:$0xff]  }
 0x618   :  { %v5061_v6 = vpop.eup %5060  ;;  %4707 = vmatprep.subr.bf16.mxu0 %v7963_v23  ;;  %v3343_v13 = vadd.f32 %v7522_v60, %v7430_v56  ;;  %5078 = vrcp.f32 %v3344_v11  ;;  %v3412_v39 = vadd.f32 %v3396_v53, %v3380_v14  ;;  %v3393_v42 = vmul.f32 %v7427_v31, %v8051_v54  ;;  %v8053_v46 = vld [vmem:[#allocation34_spill] sm:$0xff]  ;;  %v5116_v56 = vld [vmem:[%s7791_s7] sm:$0xff]   ;;  %v5128_v14 = vld [vmem:[%s7791_s7 + $0x30] sm:$0xff]  }
 0x619   :  { %v5063_v27 = vpop.eup %5062  ;;  %v3433_v38 = vmul.f32 %v5061_v6, %v3417_v36  ;;  %v3411_v26 = vadd.f32 %v3395_v33, %v3379_v43  ;;  %v3410_v17 = vadd.f32 %v3394_v32, %v3378_v20  ;;  %v5117_v34 = vld [vmem:[#allocation2 + $0x24] ss:$8 sps:$4 sm:$0xff]   ;;  %v5123_v61 = vld [vmem:[#allocation2] ss:$8 sps:$4 sm:$0xff]   ;;  %v5132_v43 = vld [vmem:[%s7791_s7 + $0x50] sm:$0xff]  }
 0x61a   :  { %v5065_v24 = vpop.eup %5064  ;;  %v3432_v4 = vmul.f32 %v5063_v27, %v3416_v52  ;;  %5080 = vrcp.f32 %v3343_v13  ;;  %v3376_v27 = vmul.f32 %v7502_v21, %v8052_v1  ;;  %v3409_v7 = vadd.f32 %v3393_v42, %v3377_v50  ;;  %v8055_v13 = vld [vmem:[#allocation32_spill] sm:$0xff]  ;;  %v5130_v53 = vld [vmem:[%s7791_s7 + $0x40] sm:$0xff]   ;;  %v8062_v42 = vld [vmem:[#allocation27_spill] sm:$0xff] }
 0x61b   :  { %4708 = vmatpush3.bf16.msra.mxu0 %v3445_v47  ;;  %v5067_v45 = vpop.eup %5066  ;;  %v3444_v62 = vpack.c.bf16 %v3434_v15, %v3433_v38  ;;  %v3431_v10 = vmul.f32 %v5065_v24, %v3415_v63  ;;  %v3392_v47 = vmul.f32 %v7516_v58, %v8053_v46  ;;  %v3391_v38 = vmul.f32 %v7522_v60, %v8055_v13  ;;  %v8057_v60 = vld [vmem:[#allocation44_spill] sm:$0xff]  ;;  %v5120_v63 = vld [vmem:[%s7791_s7 + $0x8] sm:$0xff]   ;;  %v8061_v50 = vld [vmem:[#allocation29_spill] sm:$0xff] }
 0x61c   :  { %4709 = vmatprep.subr.bf16.mxu0 %v7963_v23  ;;  %v5069_v18 = vpop.eup %5068  ;;  %v3430_v57 = vmul.f32 %v5067_v45, %v3414_v2  ;;  %v5118_v45 = vld [vmem:[#allocation2 + $0x20] ss:$8 sps:$4 sm:$0xff]   ;;  %v5137_v28 = vld [vmem:[%s7792_s8 + $0x14] ss:$8 sps:$4 sm:$0xff]  }
 0x61d   :  { %v5071_v3 = vpop.eup %5070  ;;  %v3443_v8 = vpack.c.bf16 %v3432_v4, %v3431_v10  ;;  %v3429_v19 = vmul.f32 %v5069_v18, %v3413_v37  ;;  %v3408_v30 = vadd.f32 %v3392_v47, %v3376_v27  ;;  %v3407_v58 = vadd.f32 %v3391_v38, %v3375_v40  ;;  %v5121_v4 = vld [vmem:[#allocation2 + $0x10] ss:$8 sps:$4 sm:$0xff]   ;;  %v5126_v2 = vld [vmem:[%s7791_s7 + $0x20] sm:$0xff]  }
 0x61e   :  { %v3428_v6 = vmul.f32 %v5071_v3, %v3412_v39  ;;  %v5124_v18 = vld [vmem:[%s7791_s7 + $0x10] sm:$0xff]   ;;  %v5125_v10 = vld [vmem:[%s7791_s7 + $0x18] sm:$0xff]   ;;  %v8058_v37 = vmov 0   ;;  %v8065_v47 = vld [vmem:[#allocation25_spill] sm:$0xff] }
 0x61f   :  { %4710 = vmatpush3.bf16.msra.mxu0 %v3444_v62  ;;  %v5073_v5 = vpop.eup %5072  ;;  %v3442_v51 = vpack.c.bf16 %v3430_v57, %v3429_v19  ;;  %v5119_v62 = vld [vmem:[#allocation2 + $0x14] ss:$8 sps:$4 sm:$0xff]   ;;  %v5138_v38 = vld [vmem:[%s7792_s8 + $0x10] ss:$8 sps:$4 sm:$0xff]  }
 0x620   :  { %4711 = vmatprep.subr.bf16.mxu0 %v7963_v23  ;;  %v5075_v55 = vpop.eup %5074  ;;  %v3427_v25 = vmul.f32 %v5073_v5, %v3411_v26  ;;  %v5133_v3 = vld [vmem:[%s7791_s7 + $0x58] sm:$0xff]   ;;  %v8059_v5 = vld [vmem:[#allocation18_spill] sm:$0xff]  ;;  %v8060_v39 = vld [vmem:[#allocation31_spill] sm:$0xff] }
 0x621   :  { %v5077_v11 = vpop.eup %5076  ;;  %v3426_v31 = vmul.f32 %v5075_v55, %v3410_v17  ;;  %v5135_v17 = vld [vmem:[%s7792_s8 + $0x24] ss:$8 sps:$4 sm:$0xff]   ;;  %v8064_v27 = vld [vmem:[#allocation28_spill] sm:$0xff] }
 0x622   :  { %v3441_v15 = vpack.c.bf16 %v3428_v6, %v3427_v25  ;;  %v3425_v49 = vmul.f32 %v5077_v11, %v3409_v7  ;;  %v8063_v25 = vld [vmem:[#allocation30_spill] sm:$0xff] }
 0x623   :  { %4712 = vmatpush3.bf16.msra.mxu0 %v3443_v8  ;;  %v5134_v8 = vld [vmem:[%s7791_s7 + $0x60] sm:$0xff]  }
 0x624   :  { %4713 = vmatprep.subr.bf16.mxu0 %v7963_v23  ;;  %v3440_v21 = vpack.c.bf16 %v3426_v31, %v3425_v49 }
 0x625   :  { %v5079_v36 = vpop.eup %5078 }
 0x626   :  { %v3424_v22 = vmul.f32 %v5079_v36, %v3408_v30  ;;  %v8066_v30 = vld [vmem:[#allocation26_spill] sm:$0xff] }
 0x627   :  { %4714 = vmatpush3.bf16.msra.mxu0 %v3442_v51  ;;  %v5081_v52 = vpop.eup %5080 }
 0x628   :  { %4715 = vmatprep.subr.bf16.mxu0 %v7963_v23  ;;  %v3423_v35 = vmul.f32 %v5081_v52, %v3407_v58  ;;  %v5139_v52 = vld [vmem:[%s7792_s8 + $0x4] ss:$8 sps:$4 sm:$0xff]  }
 0x629   :  { %v8067_v58 = vld [vmem:[#allocation17_spill] sm:$0xff] }
 0x62a   :  { %v3439_v24 = vpack.c.bf16 %v3424_v22, %v3423_v35 }
 0x62b   :  { %4716 = vmatpush3.bf16.msra.mxu0 %v3441_v15  ;;  %v5136_v15 = vld [vmem:[%s7792_s8 + $0x20] ss:$8 sps:$4 sm:$0xff]  }
 0x62c   :  { %4717 = vmatprep.subr.bf16.mxu0 %v7963_v23 }
 0x62f   :  { %4718 = vmatpush3.bf16.msra.mxu0 %v3440_v21 }
 0x630   :  { %4719 = vmatprep.subr.bf16.mxu0 %v7963_v23 }
 0x633   :  { %4720 = vmatpush3.bf16.msra.mxu0 %v3439_v24  ;;  %v5140_v24 = vld [vmem:[%s7792_s8] ss:$8 sps:$4 sm:$0xff]  }
 0x634   :  { %4034 = vmatprep.subr.msk.bf16.mxu0 %vm2669_vm3, %v8056_v59 }
 0x636   :  { %4722 = vmatmul.mubr.bf16.vlgmr.msra.gmra.mxu0 %v5116_v56 }
 0x637   :  { %4725 = vmatprep.mubr.msk.bf16.mxu0 %vm5191_vm2, %v7963_v23  ;;  %3621 = vmatpush1.bf16.msra.mxu0 %v8057_v60 }
 0x638   :  { %3622 = vmatprep.subr.bf16.mxu0 %v5117_v34 }
 0x63b   :  { %3623 = vmatpush1.bf16.msra.mxu0 %v5118_v45  ;;  %v8068_v45 = vld [vmem:[#allocation45_spill] sm:$0xff] }
 0x63c   :  { %3624 = vmatprep.subr.bf16.mxu0 %v5119_v62 }
 0x63e   :  { %4726 = vmatmul.mubr.bf16.gmra.mxu0 %v5120_v63  ;;  %v8069_v63 = vld [vmem:[#allocation46_spill] sm:$0xff] }
 0x63f   :  { %4729 = vmatprep.mubr.msk.bf16.mxu0 %vm5191_vm2, %v7963_v23  ;;  %3625 = vmatpush1.bf16.msra.mxu0 %v5121_v4 }
 0x640   :  { %3626 = vmatprep.subr.bf16.mxu0 %v5122_v41 }
 0x643   :  { %3627 = vmatpush1.bf16.msra.mxu0 %v5123_v61 }
 0x646   :  { %4730 = vmatmul.mubr.bf16.gmra.mxu0 %v5124_v18 }
 0x647   :  { %4733 = vmatprep.mubr.msk.bf16.mxu0 %vm5191_vm2, %v7963_v23 }
 0x64e   :  { %4734 = vmatmul.mubr.bf16.gmra.mxu0 %v5125_v10 }
 0x64f   :  { %4737 = vmatprep.mubr.msk.bf16.mxu0 %vm5191_vm2, %v7963_v23 }
 0x656   :  { %4738 = vmatmul.mubr.bf16.gmra.mxu0 %v5126_v2 }
 0x657   :  { %4741 = vmatprep.mubr.msk.bf16.mxu0 %vm5191_vm2, %v7963_v23 }
 0x65e   :  { %4742 = vmatmul.mubr.bf16.gmra.mxu0 %v5127_v9  ;;  %v8070_v9 = vld [vmem:[#allocation47_spill] sm:$0xff] }
 0x65f   :  { %4745 = vmatprep.mubr.msk.bf16.mxu0 %vm5191_vm2, %v7963_v23 }
 0x666   :  { %4746 = vmatmul.mubr.bf16.gmra.mxu0 %v5128_v14 }
 0x667   :  { %4749 = vmatprep.mubr.msk.bf16.mxu0 %vm5191_vm2, %v7963_v23 }
 0x66e   :  { %4750 = vmatmul.mubr.bf16.gmra.mxu0 %v5129_v29  ;;  %v8071_v29 = vld [vmem:[#allocation48_spill] sm:$0xff] }
 0x66f   :  { %4753 = vmatprep.mubr.msk.bf16.mxu0 %vm5191_vm2, %v7963_v23 }
 0x676   :  { %4754 = vmatmul.mubr.bf16.gmra.mxu0 %v5130_v53 }
 0x677   :  { %4757 = vmatprep.mubr.msk.bf16.mxu0 %vm5191_vm2, %v7963_v23 }
 0x67e   :  { %4758 = vmatmul.mubr.bf16.gmra.mxu0 %v5131_v12 }
 0x67f   :  { %4761 = vmatprep.mubr.msk.bf16.mxu0 %vm5191_vm2, %v7963_v23 }
 0x686   :  { %4762 = vmatmul.mubr.bf16.gmra.mxu0 %v5132_v43 }
 0x687   :  { %4765 = vmatprep.mubr.msk.bf16.mxu0 %vm5191_vm2, %v7963_v23 }
 0x68e   :  { %4766 = vmatmul.mubr.bf16.gmra.mxu0 %v5133_v3 }
 0x68f   :  { %4769 = vmatprep.mubr.msk.bf16.mxu0 %vm5191_vm2, %v7963_v23 }
 0x696   :  { %4770 = vmatmul.mubr.bf16.gmra.mxu0 %v5134_v8 }
 0x697   :  { %3644 = vmatprep.mubr.bf16.mxu0 %v8058_v37 }
 0x6f6   :  { %v3481_v57 = vpop.f32.mrf.mxu0 }
 0x6f7   :  { %v3482_v19 = vadd.f32 %v3481_v57, %v8059_v5  ;;  %v8073_v5 = vld [vmem:[#allocation24_spill] sm:$0xff] }
 0x6f8   :  { %v4723_v48 = vpop.f32.mrf.mxu0 }
 0x6f9   :  { %v8072_v48 = vld [vmem:[#allocation49_spill] sm:$0xff] }
 0x6fa   :  { %v3484_v33 = vpop.f32.mrf.mxu0 }
 0x6fb   :  { %v3485_v16 = vadd.f32 %v3484_v33, %v8060_v39 }
 0x6fc   :  { %v4724_v20 = vpop.f32.mrf.mxu0 }
 0x6fd   :  { %v3584_v44 = vpack.c.bf16 %v3485_v16, %v3482_v19 }
 0x6fe   :  { %v3489_v32 = vpop.f32.mrf.mxu0 }
 0x6ff   :  { %4035 = vmatmul.mubr.msk.bf16.vlgmr.msra.gmra.mxu0 %vm2653_vm4, %v3584_v44  ;;  %v3490_v54 = vadd.f32 %v3489_v32, %v8061_v50  ;;  %v8075_v50 = vld [vmem:[#allocation23_spill] sm:$0xff] }
 0x700   :  { %v4727_v23 = vpop.f32.mrf.mxu0 }
 0x701   :  { %v8074_v23 = vld [vmem:[#allocation16_spill] sm:$0xff] }
 0x702   :  { %v3492_v0 = vpop.f32.mrf.mxu0 }
 0x703   :  { %v3493_v55 = vadd.f32 %v3492_v0, %v8062_v42 }
 0x704   :  { %v4728_v51 = vpop.f32.mrf.mxu0 }
 0x705   :  { %v3585_v26 = vpack.c.bf16 %v3493_v55, %v3490_v54 }
 0x706   :  { %v3497_v6 = vpop.f32.mrf.mxu0 }
 0x707   :  { %4036 = vmatmul.mubr.msk.bf16.vlgmr.msra.gmra.mxu1 %vm2653_vm4, %v3585_v26  ;;  %v3498_v46 = vadd.f32 %v3497_v6, %v8064_v27 }
 0x708   :  { %v4731_v11 = vpop.f32.mrf.mxu0  ;;  %3664 = vmatprep.mubr.bf16.mxu1 %v8058_v37  ;;  %3749 = vmatpush1.bf16.msra.mxu1 %v8063_v25 }
 0x709   :  { %3750 = vmatprep.subr.bf16.mxu1 %v5135_v17  ;;  %v8076_v11 = vld [vmem:[#allocation20_spill] sm:$0xff]  ;;  %v8077_v17 = vld [vmem:[#allocation15_spill] sm:$0xff] }
 0x70a   :  { %v3500_v1 = vpop.f32.mrf.mxu0 }
 0x70b   :  { %v3501_v7 = vadd.f32 %v3500_v1, %v8065_v47 }
 0x70c   :  { %v4732_v36 = vpop.f32.mrf.mxu0  ;;  %3751 = vmatpush1.bf16.msra.mxu1 %v5136_v15  ;;  %v8078_v15 = vld [vmem:[#allocation19_spill] sm:$0xff] }
 0x70d   :  { %v3586_v31 = vpack.c.bf16 %v3501_v7, %v3498_v46  ;;  %3752 = vmatprep.subr.bf16.mxu1 %v5137_v28  ;;  %v8079_v28 = vld [vmem:[#allocation21_spill] sm:$0xff] }
 0x70e   :  { %v3505_v40 = vpop.f32.mrf.mxu0 }
 0x70f   :  { %4037 = vmatmul.mubr.msk.bf16.gmra.mxu1 %vm2653_vm4, %v3586_v31  ;;  %v3506_v21 = vadd.f32 %v3505_v40, %v8066_v30 }
 0x710   :  { %v4735_v13 = vpop.f32.mrf.mxu0  ;;  %3674 = vmatprep.mubr.bf16.mxu1 %v8058_v37  ;;  %3753 = vmatpush1.bf16.msra.mxu1 %v5138_v38 }
 0x711   :  { %3754 = vmatprep.subr.bf16.mxu1 %v5139_v52 }
 0x712   :  { %v3508_v49 = vpop.f32.mrf.mxu0 }
 0x713   :  { %v3509_v22 = vadd.f32 %v3508_v49, %v8067_v58 }
 0x714   :  { %v4736_v35 = vpop.f32.mrf.mxu0  ;;  %3755 = vmatpush1.bf16.msra.mxu1 %v5140_v24 }
 0x715   :  { %v3587_v59 = vpack.c.bf16 %v3509_v22, %v3506_v21  ;;  %v8080_v21 = vld [vmem:[#allocation50_spill] sm:$0xff]  ;;  %v8081_v22 = vld [vmem:[#allocation51_spill] sm:$0xff] }
 0x716   :  { %v3513_v56 = vpop.f32.mrf.mxu0 }
 0x717   :  { %4038 = vmatmul.mubr.msk.bf16.gmra.mxu1 %vm2653_vm4, %v3587_v59  ;;  %v3514_v62 = vadd.f32 %v3513_v56, %v8068_v45  ;;  %v8082_v45 = vld [vmem:[#allocation52_spill] sm:$0xff] }
 0x718   :  { %v4739_v60 = vpop.f32.mrf.mxu0  ;;  %3684 = vmatprep.mubr.bf16.mxu1 %v8058_v37 }
 0x71a   :  { %v3516_v34 = vpop.f32.mrf.mxu0 }
 0x71b   :  { %v3517_v4 = vadd.f32 %v3516_v34, %v8069_v63  ;;  %v8083_v63 = vld [vmem:[#allocation53_spill] sm:$0xff] }
 0x71c   :  { %v4740_v41 = vpop.f32.mrf.mxu0 }
 0x71d   :  { %v3588_v61 = vpack.c.bf16 %v3517_v4, %v3514_v62 }
 0x71e   :  { %v3521_v18 = vpop.f32.mrf.mxu0 }
 0x71f   :  { %4039 = vmatmul.mubr.msk.bf16.gmra.mxu1 %vm2653_vm4, %v3588_v61  ;;  %v3522_v14 = vadd.f32 %v3521_v18, %v8070_v9  ;;  %v8084_v9 = vld [vmem:[#allocation54_spill] sm:$0xff] }
 0x720   :  { %v4743_v10 = vpop.f32.mrf.mxu0  ;;  %3772 = vmatprep.mubr.bf16.mxu1 %v8058_v37 }
 0x722   :  { %v3524_v2 = vpop.f32.mrf.mxu0 }
 0x723   :  { %v3525_v53 = vadd.f32 %v3524_v2, %v8071_v29  ;;  %v8085_v29 = vld [vmem:[#allocation55_spill] sm:$0xff] }
 0x724   :  { %v4744_v12 = vpop.f32.mrf.mxu0 }
 0x725   :  { %v3589_v43 = vpack.c.bf16 %v3525_v53, %v3522_v14 }
 0x726   :  { %v3529_v3 = vpop.f32.mrf.mxu0 }
 0x727   :  { %4061 = vmatmul.mubr.msk.bf16.vlgmr.msra.gmra.mxu1 %vm2653_vm4, %v3589_v43  ;;  %v3530_v33 = vadd.f32 %v3529_v3, %v8072_v48 }
 0x728   :  { %v4747_v8 = vpop.f32.mrf.mxu0  ;;  %3782 = vmatprep.mubr.bf16.mxu1 %v8058_v37 }
 0x72a   :  { %v3532_v57 = vpop.f32.mrf.mxu0 }
 0x72b   :  { %v3533_v19 = vadd.f32 %v3532_v57, %v8073_v5 }
 0x72c   :  { %v4748_v39 = vpop.f32.mrf.mxu0 }
 0x72d   :  { %v3590_v16 = vpack.c.bf16 %v3533_v19, %v3530_v33 }
 0x72e   :  { %v3537_v20 = vpop.f32.mrf.mxu0 }
 0x72f   :  { %4062 = vmatmul.mubr.msk.bf16.gmra.mxu1 %vm2653_vm4, %v3590_v16  ;;  %v3538_v0 = vadd.f32 %v3537_v20, %v8074_v23 }
 0x730   :  { %v4751_v44 = vpop.f32.mrf.mxu0  ;;  %3792 = vmatprep.mubr.bf16.mxu1 %v8058_v37 }
 0x732   :  { %v3540_v32 = vpop.f32.mrf.mxu0 }
 0x733   :  { %v3541_v54 = vadd.f32 %v3540_v32, %v8075_v50 }
 0x734   :  { %v4752_v42 = vpop.f32.mrf.mxu0 }
 0x735   :  { %v3591_v55 = vpack.c.bf16 %v3541_v54, %v3538_v0 }
 0x736   :  { %v3545_v51 = vpop.f32.mrf.mxu0 }
 0x737   :  { %4063 = vmatmul.mubr.msk.bf16.gmra.mxu1 %vm2653_vm4, %v3591_v55  ;;  %v3546_v25 = vadd.f32 %v3545_v51, %v8076_v11 }
 0x738   :  { %v4755_v26 = vpop.f32.mrf.mxu0  ;;  %3802 = vmatprep.mubr.bf16.mxu1 %v8058_v37 }
 0x73a   :  { %v3548_v6 = vpop.f32.mrf.mxu0 }
 0x73b   :  { %v3549_v1 = vadd.f32 %v3548_v6, %v8077_v17 }
 0x73c   :  { %v4756_v27 = vpop.f32.mrf.mxu0 }
 0x73d   :  { %v3592_v46 = vpack.c.bf16 %v3549_v1, %v3546_v25 }
 0x73e   :  { %v3553_v47 = vpop.f32.mrf.mxu0 }
 0x73f   :  { %4064 = vmatmul.mubr.msk.bf16.gmra.mxu1 %vm2653_vm4, %v3592_v46  ;;  %v3554_v31 = vadd.f32 %v3553_v47, %v8078_v15 }
 0x740   :  { %v4759_v7 = vpop.f32.mrf.mxu0  ;;  %3812 = vmatprep.mubr.bf16.mxu1 %v8058_v37 }
 0x742   :  { %v3556_v36 = vpop.f32.mrf.mxu0 }
 0x743   :  { %v3557_v40 = vadd.f32 %v3556_v36, %v8079_v28 }
 0x744   :  { %v4760_v13 = vpop.f32.mrf.mxu0 }
 0x745   :  { %v3593_v38 = vpack.c.bf16 %v3557_v40, %v3554_v31 }
 0x746   :  { %v3561_v52 = vpop.f32.mrf.mxu0 }
 0x747   :  { %4065 = vmatmul.mubr.msk.bf16.gmra.mxu1 %vm2653_vm4, %v3593_v38  ;;  %v3562_v58 = vadd.f32 %v3561_v52, %v8080_v21 }
 0x748   :  { %v4763_v49 = vpop.f32.mrf.mxu0  ;;  %3822 = vmatprep.mubr.bf16.mxu1 %v8058_v37 }
 0x74a   :  { %v3564_v30 = vpop.f32.mrf.mxu0 }
 0x74b   :  { %v3565_v35 = vadd.f32 %v3564_v30, %v8081_v22 }
 0x74c   :  { %v4764_v24 = vpop.f32.mrf.mxu0 }
 0x74d   :  { %v3594_v59 = vpack.c.bf16 %v3565_v35, %v3562_v58 }
 0x74e   :  { %v3569_v56 = vpop.f32.mrf.mxu0 }
 0x74f   :  { %4066 = vmatmul.mubr.msk.bf16.gmra.mxu1 %vm2653_vm4, %v3594_v59  ;;  %v3570_v62 = vadd.f32 %v3569_v56, %v8082_v45 }
 0x750   :  { %v4767_v60 = vpop.f32.mrf.mxu0  ;;  %3832 = vmatprep.mubr.bf16.mxu1 %v8058_v37 }
 0x752   :  { %v3572_v34 = vpop.f32.mrf.mxu0 }
 0x753   :  { %v3573_v4 = vadd.f32 %v3572_v34, %v8083_v63 }
 0x754   :  { %v4768_v41 = vpop.f32.mrf.mxu0 }
 0x755   :  { %v3595_v61 = vpack.c.bf16 %v3573_v4, %v3570_v62 }
 0x756   :  { %v3577_v18 = vpop.f32.mrf.mxu0 }
 0x757   :  { %4067 = vmatmul.mubr.msk.bf16.gmra.mxu1 %vm2653_vm4, %v3595_v61  ;;  %v3578_v14 = vadd.f32 %v3577_v18, %v8084_v9 }
 0x758   :  { %v4771_v10 = vpop.f32.mrf.mxu0  ;;  %3842 = vmatprep.mubr.bf16.mxu1 %v8058_v37 }
 0x75a   :  { %v3580_v2 = vpop.f32.mrf.mxu0 }
 0x75b   :  { %v3581_v53 = vadd.f32 %v3580_v2, %v8085_v29 }
 0x75c   :  { %v4772_v12 = vpop.f32.mrf.mxu0 }
 0x75d   :  { %v3596_v43 = vpack.c.bf16 %v3581_v53, %v3578_v14 }
 0x75f   :  { %4068 = vmatmul.mubr.msk.bf16.gmra.mxu1 %vm2653_vm4, %v3596_v43 }
 0x7bf   :  { %v3646_v3 = vpop.f32.mrf.mxu0 }
 0x7c0   :  { %4040 = vst [vmem:[%s7796_s12 + $0xa0] sm:$0xff] %v3646_v3 }
 0x7c1   :  { %v3648_v8 = vpop.f32.mrf.mxu0 }
 0x7c2   :  { %4041 = vst.msk [vmem:[%s7796_s12 + $0xa8] sm:$0xff] %vm589_vm0, %v3648_v8 }
 0x7c3   :  { %v3650_v37 = vpop.f32.mrf.mxu0 }
 0x7c4   :  { %4042 = vst [vmem:[%s7796_s12 + $0xb0] sm:$0xff] %v3650_v37 }
 0x7c5   :  { %v3652_v57 = vpop.f32.mrf.mxu0 }
 0x7c6   :  { %4043 = vst.msk [vmem:[%s7796_s12 + $0xb8] sm:$0xff] %vm589_vm0, %v3652_v57 }
 0x7c7   :  { %v3656_v48 = vpop.f32.mrf.mxu1 }
 0x7c8   :  { %4044 = vst [vmem:[%s7796_s12 + $0xc0] sm:$0xff] %v3656_v48 }
 0x7c9   :  { %v3658_v33 = vpop.f32.mrf.mxu1 }
 0x7ca   :  { %4045 = vst.msk [vmem:[%s7796_s12 + $0xc8] sm:$0xff] %vm589_vm0, %v3658_v33 }
 0x7cb   :  { %v3660_v5 = vpop.f32.mrf.mxu1 }
 0x7cc   :  { %4046 = vst [vmem:[%s7796_s12 + $0xd0] sm:$0xff] %v3660_v5 }
 0x7cd   :  { %v3662_v19 = vpop.f32.mrf.mxu1 }
 0x7ce   :  { %4047 = vst.msk [vmem:[%s7796_s12 + $0xd8] sm:$0xff] %vm589_vm0, %v3662_v19 }
 0x7cf   :  { %v3666_v39 = vpop.f32.mrf.mxu1 }
 0x7d0   :  { %4048 = vst [vmem:[%s7796_s12 + $0xe0] sm:$0xff] %v3666_v39 }
 0x7d1   :  { %v3668_v16 = vpop.f32.mrf.mxu1 }
 0x7d2   :  { %4049 = vst.msk [vmem:[%s7796_s12 + $0xe8] sm:$0xff] %vm589_vm0, %v3668_v16 }
 0x7d3   :  { %v3670_v20 = vpop.f32.mrf.mxu1 }
 0x7d4   :  { %4050 = vst [vmem:[%s7796_s12 + $0xf0] sm:$0xff] %v3670_v20 }
 0x7d5   :  { %v3672_v44 = vpop.f32.mrf.mxu1 }
 0x7d6   :  { %4051 = vst.msk [vmem:[%s7796_s12 + $0xf8] sm:$0xff] %vm589_vm0, %v3672_v44 }
 0x7d7   :  { %v3676_v32 = vpop.f32.mrf.mxu1 }
 0x7d8   :  { %4052 = vst [vmem:[%s7796_s12 + $0x100] sm:$0xff] %v3676_v32 }
 0x7d9   :  { %v3678_v23 = vpop.f32.mrf.mxu1 }
 0x7da   :  { %4053 = vst.msk [vmem:[%s7796_s12 + $0x108] sm:$0xff] %vm589_vm0, %v3678_v23 }
 0x7db   :  { %v3680_v0 = vpop.f32.mrf.mxu1 }
 0x7dc   :  { %4054 = vst [vmem:[%s7796_s12 + $0x110] sm:$0xff] %v3680_v0 }
 0x7dd   :  { %v3682_v50 = vpop.f32.mrf.mxu1 }
 0x7de   :  { %4055 = vst.msk [vmem:[%s7796_s12 + $0x118] sm:$0xff] %vm589_vm0, %v3682_v50 }
 0x7df   :  { %v3686_v54 = vpop.f32.mrf.mxu1 }
 0x7e0   :  { %4056 = vst [vmem:[%s7796_s12 + $0x120] sm:$0xff] %v3686_v54 }
 0x7e1   :  { %v3688_v42 = vpop.f32.mrf.mxu1 }
 0x7e2   :  { %4057 = vst.msk [vmem:[%s7796_s12 + $0x128] sm:$0xff] %vm589_vm0, %v3688_v42 }
 0x7e3   :  { %v3690_v55 = vpop.f32.mrf.mxu1 }
 0x7e4   :  { %4058 = vst [vmem:[%s7796_s12 + $0x130] sm:$0xff] %v3690_v55 }
 0x7e5   :  { %v3692_v51 = vpop.f32.mrf.mxu1 }
 0x7e6   :  { %4059 = vst.msk [vmem:[%s7796_s12 + $0x138] sm:$0xff] %vm589_vm0, %v3692_v51  ;;  %s5193_s12 = smov [#allocation5]  }
 0x7e7   :  { %v3774_v26 = vpop.f32.mrf.mxu1  ;;  %s3891_s9 = sshll.u32 %s5193_s12, 4  ;;  %s3892_s9 = int_to_ptr.vmem [resolvable:$true] %s3891_s9 }
 0x7e8   :  { %3854 = vst [vmem:[#allocation5 + $0x100] sm:$0xff] %v3774_v26  ;;  %s5161_s18 = scalar_lea.vmem %s3892_s9, 8192  ;;  %p5166_p6 = scmp.lt.s32.totalorder %s3892_s9, %s3892_s9 }
 0x7e9   :  { %v3776_v6 = vpop.f32.mrf.mxu1  ;;  %p5162_p5 = scmp.ne.s32.totalorder %s3892_s9, %s5161_s18  ;;  %p5167_p7 = scmp.lt.s32.totalorder %s5161_s18, %s5161_s18 }
 0x7ea   :  { %3855 = vst [vmem:[#allocation5 + $0x108] sm:$0xff] %v3776_v6 }
 0x7eb   :  { %v3778_v11 = vpop.f32.mrf.mxu1  ;;  %p5168_p8 = por %p5167_p7, %p5166_p6 }
 0x7ec   :  { %3856 = vst [vmem:[#allocation5 + $0x110] sm:$0xff] %v3778_v11 }
 0x7ed   :  { %v3780_v25 = vpop.f32.mrf.mxu1  ;;  %p5169_p9 = pnand %p5168_p8, %p5162_p5 }
 0x7ee   :  { %3857 = vst [vmem:[#allocation5 + $0x118] sm:$0xff] %v3780_v25 }
 0x7ef   :  { %v3784_v17 = vpop.f32.mrf.mxu1 }
 0x7f0   :  { %3858 = vst [vmem:[#allocation5 + $0x120] sm:$0xff] %v3784_v17 }
 0x7f1   :  { %v3786_v1 = vpop.f32.mrf.mxu1 }
 0x7f2   :  { %3859 = vst [vmem:[#allocation5 + $0x128] sm:$0xff] %v3786_v1 }
 0x7f3   :  { %v3788_v27 = vpop.f32.mrf.mxu1 }
 0x7f4   :  { %3860 = vst [vmem:[#allocation5 + $0x130] sm:$0xff] %v3788_v27 }
 0x7f5   :  { %v3790_v46 = vpop.f32.mrf.mxu1 }
 0x7f6   :  { %3861 = vst [vmem:[#allocation5 + $0x138] sm:$0xff] %v3790_v46 }
 0x7f7   :  { %v3794_v47 = vpop.f32.mrf.mxu1 }
 0x7f8   :  { %3862 = vst [vmem:[#allocation5 + $0x140] sm:$0xff] %v3794_v47 }
 0x7f9   :  { %v3796_v7 = vpop.f32.mrf.mxu1 }
 0x7fa   :  { %3863 = vst [vmem:[#allocation5 + $0x148] sm:$0xff] %v3796_v7 }
 0x7fb   :  { %v3798_v36 = vpop.f32.mrf.mxu1 }
 0x7fc   :  { %3864 = vst [vmem:[#allocation5 + $0x150] sm:$0xff] %v3798_v36 }
 0x7fd   :  { %v3800_v15 = vpop.f32.mrf.mxu1 }
 0x7fe   :  { %3865 = vst [vmem:[#allocation5 + $0x158] sm:$0xff] %v3800_v15 }
 0x7ff   :  { %v3804_v31 = vpop.f32.mrf.mxu1 }
 0x800   :  { %3866 = vst [vmem:[#allocation5 + $0x160] sm:$0xff] %v3804_v31 }
 0x801   :  { %v3806_v28 = vpop.f32.mrf.mxu1 }
 0x802   :  { %3867 = vst [vmem:[#allocation5 + $0x168] sm:$0xff] %v3806_v28 }
 0x803   :  { %v3808_v40 = vpop.f32.mrf.mxu1 }
 0x804   :  { %3868 = vst [vmem:[#allocation5 + $0x170] sm:$0xff] %v3808_v40 }
 0x805   :  { %v3810_v13 = vpop.f32.mrf.mxu1 }
 0x806   :  { %3869 = vst [vmem:[#allocation5 + $0x178] sm:$0xff] %v3810_v13 }
 0x807   :  { %v3814_v38 = vpop.f32.mrf.mxu1 }
 0x808   :  { %3870 = vst [vmem:[#allocation5 + $0x180] sm:$0xff] %v3814_v38 }
 0x809   :  { %v3816_v52 = vpop.f32.mrf.mxu1 }
 0x80a   :  { %3871 = vst [vmem:[#allocation5 + $0x188] sm:$0xff] %v3816_v52 }
 0x80b   :  { %v3818_v49 = vpop.f32.mrf.mxu1 }
 0x80c   :  { %3872 = vst [vmem:[#allocation5 + $0x190] sm:$0xff] %v3818_v49 }
 0x80d   :  { %v3820_v30 = vpop.f32.mrf.mxu1 }
 0x80e   :  { %3873 = vst [vmem:[#allocation5 + $0x198] sm:$0xff] %v3820_v30 }
 0x80f   :  { %v3824_v21 = vpop.f32.mrf.mxu1 }
 0x810   :  { %3874 = vst [vmem:[#allocation5 + $0x1a0] sm:$0xff] %v3824_v21 }
 0x811   :  { %v3826_v58 = vpop.f32.mrf.mxu1 }
 0x812   :  { %3875 = vst [vmem:[#allocation5 + $0x1a8] sm:$0xff] %v3826_v58 }
 0x813   :  { %v3828_v22 = vpop.f32.mrf.mxu1 }
 0x814   :  { %3876 = vst [vmem:[#allocation5 + $0x1b0] sm:$0xff] %v3828_v22 }
 0x815   :  { %v3830_v35 = vpop.f32.mrf.mxu1 }
 0x816   :  { %3877 = vst [vmem:[#allocation5 + $0x1b8] sm:$0xff] %v3830_v35 }
 0x817   :  { %v3834_v24 = vpop.f32.mrf.mxu1 }
 0x818   :  { %3878 = vst [vmem:[#allocation5 + $0x1c0] sm:$0xff] %v3834_v24 }
 0x819   :  { %v3836_v59 = vpop.f32.mrf.mxu1 }
 0x81a   :  { %3879 = vst [vmem:[#allocation5 + $0x1c8] sm:$0xff] %v3836_v59 }
 0x81b   :  { %v3838_v56 = vpop.f32.mrf.mxu1 }
 0x81c   :  { %3880 = vst [vmem:[#allocation5 + $0x1d0] sm:$0xff] %v3838_v56 }
 0x81d   :  { %v3840_v60 = vpop.f32.mrf.mxu1 }
 0x81e   :  { %3881 = vst [vmem:[#allocation5 + $0x1d8] sm:$0xff] %v3840_v60 }
 0x81f   :  { %v3844_v34 = vpop.f32.mrf.mxu1 }
 0x820   :  { %3882 = vst [vmem:[#allocation5 + $0x1e0] sm:$0xff] %v3844_v34 }
 0x821   :  { %v3846_v45 = vpop.f32.mrf.mxu1 }
 0x822   :  { %3883 = vst [vmem:[#allocation5 + $0x1e8] sm:$0xff] %v3846_v45 }
 0x823   :  { %v3848_v62 = vpop.f32.mrf.mxu1 }
 0x824   :  { %3884 = vst [vmem:[#allocation5 + $0x1f0] sm:$0xff] %v3848_v62 }
 0x825   :  { %v3850_v63 = vpop.f32.mrf.mxu1 }
 0x826   :  { %3885 = vst [vmem:[#allocation5 + $0x1f8] sm:$0xff] %v3850_v63 }
 0x827   :  { %5172 = shalt.err (!%p5169_p9)
}
 0x828   :  { %s5194_s19 = smov 256   ;;  %s5195_s20 = smov 16  }
 0x829   :  { %3897 = dma.vmem_to_hbm [thread:$0]  %s3892_s9, 8192, %s7795_s11, [#allocation4], %s5194_s19, %s5194_s19, %s5195_s20  }
 0x82a   :  { %5183 = dma.done.wait [#allocation4], 8192  }
 0x82b   :  { %5184 = vsyncadd [#allocation4], 4294959104 }
 0x82c   :  { %3905 = vsyncpa [#allocation3], 1 }
 0x82d   :  { %3906 = vsyncpa [#allocation4], 1 }

</bundles_post_ra>
